<compile_context>
chip_gen: v6e
topology: v6e:2x2x1
jax: 0.10.0
libtpu: 0.0.40
codegen_flags: <defaults>
</compile_context>

<pallas_src>
import jax
import jax.numpy as jnp
from jax.experimental import pallas as pl
from jax.experimental.pallas import tpu as pltpu

# conv / pool geometry for a 28x28 input, three VALID 3x3 convs + 2x2 pools
H1, OH1, PH1 = 28, 26, 13     # conv1 input grid, conv1 valid output, pool1 out
H2, OH2, PH2 = 13, 11, 5      # conv2 ...
H3, OH3, PH3 = 5, 3, 1        # conv3 ...
# number of flattened-grid rows that must be computed so every valid conv
# output row r = h*W + w (h < OH, w < OH) is covered; rows with w >= OH are
# garbage and are simply never read by the following pooling stage.
L1 = (OH1 - 1) * H1 + OH1     # 726
L2 = (OH2 - 1) * H2 + OH2     # 141
L3 = (OH3 - 1) * H3 + OH3     # 13


# ----------------------------- fused kernel --------------------------------

def _fused_forward_kernel(x_ref, w1_ref, b1_ref, w2_ref, b2_ref, w3_ref, b3_ref,
                          l1w_ref, l1b_ref, l2w_ref, l2b_ref, o_ref,
                          a1_ref, a2_ref, r2_ref, a3_ref):
    f32 = jnp.float32

    # -------- conv1 + ReLU (channel-first, single input channel) ----------
    # out1[oc, r] = relu(b1[oc] + sum_k w1[oc,k] * x[r + (k//3)*28 + (k%3)])
    acc1 = jnp.zeros((10, L1), f32)
    for k in range(9):
        dr = (k // 3) * H1 + (k % 3)
        xs = x_ref[0, :, pl.ds(dr, L1)]              # (1, L1)  lane-dense
        acc1 = acc1 + w1_ref[:, k:k + 1] * xs        # (10,1)*(1,L1) -> (10,L1)
    relu1 = jnp.maximum(acc1 + b1_ref[...], 0.0)     # (10, L1)
    # channel-last copy (rows = flattened 28-grid) for pooling / conv2
    a1_ref[...] = jnp.transpose(relu1)               # (L1, 10)

    # -------- maxpool1 2x2 : valid 26x26 -> 13x13 --------------------------
    for ph in range(PH1):
        q = [a1_ref[pl.ds((2 * ph + di) * H1 + dj, PH1, stride=2), :]
             for di in (0, 1) for dj in (0, 1)]       # 4 x (13, 10)
        a2_ref[ph * PH1:(ph + 1) * PH1, :] = jnp.maximum(
            jnp.maximum(q[0], q[1]), jnp.maximum(q[2], q[3]))

    # -------- conv2 + ReLU (channel-last, 9 shifted MXU matmuls) -----------
    acc2 = jnp.zeros((L2, 20), f32)
    for k in range(9):
        dr = (k // 3) * H2 + (k % 3)
        acc2 = acc2 + jnp.dot(a2_ref[dr:dr + L2, :], w2_ref[k],
                              preferred_element_type=f32)
    r2_ref[...] = jnp.maximum(acc2 + b2_ref[...], 0.0)            # (L2, 20)

    # -------- maxpool2 2x2 : valid 11x11 -> 5x5 ----------------------------
    for ph in range(PH2):
        q = [r2_ref[pl.ds((2 * ph + di) * H2 + dj, PH2, stride=2), :]
             for di in (0, 1) for dj in (0, 1)]       # 4 x (5, 20)
        a3_ref[ph * PH2:(ph + 1) * PH2, :] = jnp.maximum(
            jnp.maximum(q[0], q[1]), jnp.maximum(q[2], q[3]))

    # -------- conv3 + ReLU (channel-last) ----------------------------------
    acc3 = jnp.zeros((L3, 40), f32)
    for k in range(9):
        dr = (k // 3) * H3 + (k % 3)
        acc3 = acc3 + jnp.dot(a3_ref[dr:dr + L3, :], w3_ref[k],
                              preferred_element_type=f32)
    relu3 = jnp.maximum(acc3 + b3_ref[...], 0.0)                  # (13, 40)

    # -------- maxpool3 2x2 : valid 3x3 -> 1x1 (rows 0,1,5,6 of the 5-grid) --
    feat = jnp.maximum(
        jnp.maximum(relu3[0:1, :], relu3[1:2, :]),
        jnp.maximum(relu3[H3:H3 + 1, :], relu3[H3 + 1:H3 + 2, :]))  # (1, 40)

    # -------- linear1 -> linear2 -------------------------------------------
    h = jnp.dot(feat, l1w_ref[...], preferred_element_type=f32) + l1b_ref[...]
    y = jnp.dot(h, l2w_ref[...], preferred_element_type=f32) + l2b_ref[...]
    o_ref[0] = y                                                   # (1, 10)


# ------------------------------ wrapper -------------------------------------

def _prep_weights(params):
    """Reshape torch-layout weights into the kernel's matmul layouts."""
    w1 = params["conv1_w"].reshape(10, 9)                          # (OC, 3*3)
    b1 = params["conv1_b"].reshape(10, 1)
    w2 = params["conv2_w"].reshape(20, 10, 9).transpose(2, 1, 0)   # (9, IC, OC)
    b2 = params["conv2_b"].reshape(1, 20)
    w3 = params["conv3_w"].reshape(40, 20, 9).transpose(2, 1, 0)   # (9, IC, OC)
    b3 = params["conv3_b"].reshape(1, 40)
    l1w = params["lin1_w"].T                                       # (40, 32)
    l1b = params["lin1_b"].reshape(1, 32)
    l2w = params["lin2_w"].T                                       # (32, 10)
    l2b = params["lin2_b"].reshape(1, 10)
    return w1, b1, w2, b2, w3, b3, l1w, l1b, l2w, l2b


def my_network_forward(params, x):
    # x: (N, 1, 28, 28) NCHW float32
    N = x.shape[0]
    xf = x.astype(jnp.float32).reshape(N, 1, H1 * H1)      # (N, 1, 784)
    ws = _prep_weights(params)
    w1, b1, w2, b2, w3, b3, l1w, l1b, l2w, l2b = ws

    flops = 2 * N * (OH1 * OH1 * 9 * 1 * 10 + OH2 * OH2 * 9 * 10 * 20
                     + OH3 * OH3 * 9 * 20 * 40 + 40 * 32 + 32 * 10)
    bytes_accessed = 4 * (N * H1 * H1 + N * 10 + sum(int(w.size) for w in ws))

    def full(shape):
        return pl.BlockSpec(shape, lambda n: (0,) * len(shape))

    out = pl.pallas_call(
        _fused_forward_kernel,
        out_shape=jax.ShapeDtypeStruct((N, 1, 10), jnp.float32),
        grid=(N,),
        in_specs=[
            pl.BlockSpec((1, 1, H1 * H1), lambda n: (n, 0, 0)),   # x (per image)
            full((10, 9)), full((10, 1)),                          # conv1
            full((9, 10, 20)), full((1, 20)),                      # conv2
            full((9, 20, 40)), full((1, 40)),                      # conv3
            full((40, 32)), full((1, 32)),                         # linear1
            full((32, 10)), full((1, 10)),                         # linear2
        ],
        out_specs=pl.BlockSpec((1, 1, 10), lambda n: (n, 0, 0)),
        scratch_shapes=[
            pltpu.VMEM((L1, 10), jnp.float32),          # conv1 out, channel-last
            pltpu.VMEM((PH1 * PH1, 10), jnp.float32),   # pooled1 (169, 10)
            pltpu.VMEM((L2, 20), jnp.float32),          # conv2 out (141, 20)
            pltpu.VMEM((PH2 * PH2, 20), jnp.float32),   # pooled2 (25, 20)
        ],
        compiler_params=pltpu.CompilerParams(
            dimension_semantics=("parallel",)),
        cost_estimate=pl.CostEstimate(flops=flops, transcendentals=0,
                                      bytes_accessed=bytes_accessed),
    )(xf, w1, b1, w2, b2, w3, b3, l1w, l1b, l2w, l2b)
    return out.reshape(N, 10)


# ------------------------------ parameters ----------------------------------

def init_params(key):
    """Deterministic init mimicking torch's uniform(-1/sqrt(fan_in), ...)."""
    def uni(k, shape, fan_in):
        bound = 1.0 / jnp.sqrt(jnp.float32(fan_in))
        return jax.random.uniform(k, shape, jnp.float32, -bound, bound)

    ks = jax.random.split(key, 10)
    return {
        "conv1_w": uni(ks[0], (10, 1, 3, 3), 1 * 9),
        "conv1_b": uni(ks[1], (10,), 1 * 9),
        "conv2_w": uni(ks[2], (20, 10, 3, 3), 10 * 9),
        "conv2_b": uni(ks[3], (20,), 10 * 9),
        "conv3_w": uni(ks[4], (40, 20, 3, 3), 20 * 9),
        "conv3_b": uni(ks[5], (40,), 20 * 9),
        "lin1_w": uni(ks[6], (32, 40), 40),    # torch Linear layout: (out, in)
        "lin1_b": uni(ks[7], (32,), 40),
        "lin2_w": uni(ks[8], (10, 32), 32),
        "lin2_b": uni(ks[9], (10,), 32),
    }


if __name__ == "__main__":
    key = jax.random.PRNGKey(0)
    pkey, xkey = jax.random.split(key)
    params = init_params(pkey)
    # MNIST-like input implied by the 40-feature flatten: (batch=2, 1, 28, 28)
    x = jax.random.normal(xkey, (2, 1, 28, 28), dtype=jnp.float32)

    out = jax.jit(my_network_forward)(params, x)
    out = jax.block_until_ready(out)
    assert out.shape == (2, 10), out.shape
    print("KERNEL_OK")
</pallas_src>

<mosaic_0001>
module attributes {stable_mosaic.version = 11 : i64} {
  func.func @_fused_forward_kernel(%arg0: i32, %arg1: memref<1x1x784xf32, #tpu.memory_space<vmem>>, %arg2: memref<10x9xf32, #tpu.memory_space<vmem>>, %arg3: memref<10x1xf32, #tpu.memory_space<vmem>>, %arg4: memref<9x10x20xf32, #tpu.memory_space<vmem>>, %arg5: memref<1x20xf32, #tpu.memory_space<vmem>>, %arg6: memref<9x20x40xf32, #tpu.memory_space<vmem>>, %arg7: memref<1x40xf32, #tpu.memory_space<vmem>>, %arg8: memref<40x32xf32, #tpu.memory_space<vmem>>, %arg9: memref<1x32xf32, #tpu.memory_space<vmem>>, %arg10: memref<32x10xf32, #tpu.memory_space<vmem>>, %arg11: memref<1x10xf32, #tpu.memory_space<vmem>>, %arg12: memref<1x1x10xf32, #tpu.memory_space<vmem>>, %arg13: memref<726x10xf32, #tpu.memory_space<vmem>>, %arg14: memref<169x10xf32, #tpu.memory_space<vmem>>, %arg15: memref<141x20xf32, #tpu.memory_space<vmem>>, %arg16: memref<25x20xf32, #tpu.memory_space<vmem>>) attributes {dimension_semantics = [#tpu.dimension_semantics<parallel>], iteration_bounds = array<i64: 2>, scalar_prefetch = 0 : i64, scratch_operands = 4 : i64, tpu.core_type = #tpu.core_type<tc>, window_params = [{transform_indices = @transform_0, window_bounds = array<i64: 1, 1, 784>}, {pipeline_mode = #tpu.pipeline_mode<synchronous>, transform_indices = @transform_1, window_bounds = array<i64: 10, 9>}, {pipeline_mode = #tpu.pipeline_mode<synchronous>, transform_indices = @transform_2, window_bounds = array<i64: 10, 1>}, {pipeline_mode = #tpu.pipeline_mode<synchronous>, transform_indices = @transform_3, window_bounds = array<i64: 9, 10, 20>}, {pipeline_mode = #tpu.pipeline_mode<synchronous>, transform_indices = @transform_4, window_bounds = array<i64: 1, 20>}, {pipeline_mode = #tpu.pipeline_mode<synchronous>, transform_indices = @transform_5, window_bounds = array<i64: 9, 20, 40>}, {pipeline_mode = #tpu.pipeline_mode<synchronous>, transform_indices = @transform_6, window_bounds = array<i64: 1, 40>}, {pipeline_mode = #tpu.pipeline_mode<synchronous>, transform_indices = @transform_7, window_bounds = array<i64: 40, 32>}, {pipeline_mode = #tpu.pipeline_mode<synchronous>, transform_indices = @transform_8, window_bounds = array<i64: 1, 32>}, {pipeline_mode = #tpu.pipeline_mode<synchronous>, transform_indices = @transform_9, window_bounds = array<i64: 32, 10>}, {pipeline_mode = #tpu.pipeline_mode<synchronous>, transform_indices = @transform_10, window_bounds = array<i64: 1, 10>}, {transform_indices = @transform_11, window_bounds = array<i64: 1, 1, 10>}]} {
    %cst = arith.constant 0.000000e+00 : f32
    %0 = vector.broadcast %cst : f32 to vector<10x726xf32>
    %c0 = arith.constant 0 : index
    %c0_0 = arith.constant 0 : index
    %c0_1 = arith.constant 0 : index
    %1 = vector.load %arg1[%c0, %c0_0, %c0_1] : memref<1x1x784xf32, #tpu.memory_space<vmem>>, vector<1x1x726xf32>
    %2 = vector.shape_cast %1 : vector<1x1x726xf32> to vector<1x726xf32>
    %c0_2 = arith.constant 0 : index
    %c0_3 = arith.constant 0 : index
    %3 = vector.load %arg2[%c0_2, %c0_3] : memref<10x9xf32, #tpu.memory_space<vmem>>, vector<10x1xf32>
    %4 = vector.broadcast %3 : vector<10x1xf32> to vector<10x726xf32>
    %5 = vector.broadcast %2 : vector<1x726xf32> to vector<10x726xf32>
    %6 = arith.mulf %4, %5 : vector<10x726xf32>
    %7 = arith.addf %0, %6 : vector<10x726xf32>
    %c0_4 = arith.constant 0 : index
    %c0_5 = arith.constant 0 : index
    %c1 = arith.constant 1 : index
    %8 = vector.load %arg1[%c0_4, %c0_5, %c1] : memref<1x1x784xf32, #tpu.memory_space<vmem>>, vector<1x1x726xf32>
    %9 = vector.shape_cast %8 : vector<1x1x726xf32> to vector<1x726xf32>
    %c0_6 = arith.constant 0 : index
    %c1_7 = arith.constant 1 : index
    %10 = vector.load %arg2[%c0_6, %c1_7] : memref<10x9xf32, #tpu.memory_space<vmem>>, vector<10x1xf32>
    %11 = vector.broadcast %10 : vector<10x1xf32> to vector<10x726xf32>
    %12 = vector.broadcast %9 : vector<1x726xf32> to vector<10x726xf32>
    %13 = arith.mulf %11, %12 : vector<10x726xf32>
    %14 = arith.addf %7, %13 : vector<10x726xf32>
    %c0_8 = arith.constant 0 : index
    %c0_9 = arith.constant 0 : index
    %c2 = arith.constant 2 : index
    %15 = vector.load %arg1[%c0_8, %c0_9, %c2] : memref<1x1x784xf32, #tpu.memory_space<vmem>>, vector<1x1x726xf32>
    %16 = vector.shape_cast %15 : vector<1x1x726xf32> to vector<1x726xf32>
    %c0_10 = arith.constant 0 : index
    %c2_11 = arith.constant 2 : index
    %17 = vector.load %arg2[%c0_10, %c2_11] : memref<10x9xf32, #tpu.memory_space<vmem>>, vector<10x1xf32>
    %18 = vector.broadcast %17 : vector<10x1xf32> to vector<10x726xf32>
    %19 = vector.broadcast %16 : vector<1x726xf32> to vector<10x726xf32>
    %20 = arith.mulf %18, %19 : vector<10x726xf32>
    %21 = arith.addf %14, %20 : vector<10x726xf32>
    %c0_12 = arith.constant 0 : index
    %c0_13 = arith.constant 0 : index
    %c28 = arith.constant 28 : index
    %22 = vector.load %arg1[%c0_12, %c0_13, %c28] : memref<1x1x784xf32, #tpu.memory_space<vmem>>, vector<1x1x726xf32>
    %23 = vector.shape_cast %22 : vector<1x1x726xf32> to vector<1x726xf32>
    %c0_14 = arith.constant 0 : index
    %c3 = arith.constant 3 : index
    %24 = vector.load %arg2[%c0_14, %c3] : memref<10x9xf32, #tpu.memory_space<vmem>>, vector<10x1xf32>
    %25 = vector.broadcast %24 : vector<10x1xf32> to vector<10x726xf32>
    %26 = vector.broadcast %23 : vector<1x726xf32> to vector<10x726xf32>
    %27 = arith.mulf %25, %26 : vector<10x726xf32>
    %28 = arith.addf %21, %27 : vector<10x726xf32>
    %c0_15 = arith.constant 0 : index
    %c0_16 = arith.constant 0 : index
    %c29 = arith.constant 29 : index
    %29 = vector.load %arg1[%c0_15, %c0_16, %c29] : memref<1x1x784xf32, #tpu.memory_space<vmem>>, vector<1x1x726xf32>
    %30 = vector.shape_cast %29 : vector<1x1x726xf32> to vector<1x726xf32>
    %c0_17 = arith.constant 0 : index
    %c4 = arith.constant 4 : index
    %31 = vector.load %arg2[%c0_17, %c4] : memref<10x9xf32, #tpu.memory_space<vmem>>, vector<10x1xf32>
    %32 = vector.broadcast %31 : vector<10x1xf32> to vector<10x726xf32>
    %33 = vector.broadcast %30 : vector<1x726xf32> to vector<10x726xf32>
    %34 = arith.mulf %32, %33 : vector<10x726xf32>
    %35 = arith.addf %28, %34 : vector<10x726xf32>
    %c0_18 = arith.constant 0 : index
    %c0_19 = arith.constant 0 : index
    %c30 = arith.constant 30 : index
    %36 = vector.load %arg1[%c0_18, %c0_19, %c30] : memref<1x1x784xf32, #tpu.memory_space<vmem>>, vector<1x1x726xf32>
    %37 = vector.shape_cast %36 : vector<1x1x726xf32> to vector<1x726xf32>
    %c0_20 = arith.constant 0 : index
    %c5 = arith.constant 5 : index
    %38 = vector.load %arg2[%c0_20, %c5] : memref<10x9xf32, #tpu.memory_space<vmem>>, vector<10x1xf32>
    %39 = vector.broadcast %38 : vector<10x1xf32> to vector<10x726xf32>
    %40 = vector.broadcast %37 : vector<1x726xf32> to vector<10x726xf32>
    %41 = arith.mulf %39, %40 : vector<10x726xf32>
    %42 = arith.addf %35, %41 : vector<10x726xf32>
    %c0_21 = arith.constant 0 : index
    %c0_22 = arith.constant 0 : index
    %c56 = arith.constant 56 : index
    %43 = vector.load %arg1[%c0_21, %c0_22, %c56] : memref<1x1x784xf32, #tpu.memory_space<vmem>>, vector<1x1x726xf32>
    %44 = vector.shape_cast %43 : vector<1x1x726xf32> to vector<1x726xf32>
    %c0_23 = arith.constant 0 : index
    %c6 = arith.constant 6 : index
    %45 = vector.load %arg2[%c0_23, %c6] : memref<10x9xf32, #tpu.memory_space<vmem>>, vector<10x1xf32>
    %46 = vector.broadcast %45 : vector<10x1xf32> to vector<10x726xf32>
    %47 = vector.broadcast %44 : vector<1x726xf32> to vector<10x726xf32>
    %48 = arith.mulf %46, %47 : vector<10x726xf32>
    %49 = arith.addf %42, %48 : vector<10x726xf32>
    %c0_24 = arith.constant 0 : index
    %c0_25 = arith.constant 0 : index
    %c57 = arith.constant 57 : index
    %50 = vector.load %arg1[%c0_24, %c0_25, %c57] : memref<1x1x784xf32, #tpu.memory_space<vmem>>, vector<1x1x726xf32>
    %51 = vector.shape_cast %50 : vector<1x1x726xf32> to vector<1x726xf32>
    %c0_26 = arith.constant 0 : index
    %c7 = arith.constant 7 : index
    %52 = vector.load %arg2[%c0_26, %c7] : memref<10x9xf32, #tpu.memory_space<vmem>>, vector<10x1xf32>
    %53 = vector.broadcast %52 : vector<10x1xf32> to vector<10x726xf32>
    %54 = vector.broadcast %51 : vector<1x726xf32> to vector<10x726xf32>
    %55 = arith.mulf %53, %54 : vector<10x726xf32>
    %56 = arith.addf %49, %55 : vector<10x726xf32>
    %c0_27 = arith.constant 0 : index
    %c0_28 = arith.constant 0 : index
    %c58 = arith.constant 58 : index
    %57 = vector.load %arg1[%c0_27, %c0_28, %c58] : memref<1x1x784xf32, #tpu.memory_space<vmem>>, vector<1x1x726xf32>
    %58 = vector.shape_cast %57 : vector<1x1x726xf32> to vector<1x726xf32>
    %c0_29 = arith.constant 0 : index
    %c8 = arith.constant 8 : index
    %59 = vector.load %arg2[%c0_29, %c8] : memref<10x9xf32, #tpu.memory_space<vmem>>, vector<10x1xf32>
    %60 = vector.broadcast %59 : vector<10x1xf32> to vector<10x726xf32>
    %61 = vector.broadcast %58 : vector<1x726xf32> to vector<10x726xf32>
    %62 = arith.mulf %60, %61 : vector<10x726xf32>
    %63 = arith.addf %56, %62 : vector<10x726xf32>
    %c0_30 = arith.constant 0 : index
    %c0_31 = arith.constant 0 : index
    %64 = vector.load %arg3[%c0_30, %c0_31] : memref<10x1xf32, #tpu.memory_space<vmem>>, vector<10x1xf32>
    %65 = vector.broadcast %64 : vector<10x1xf32> to vector<10x726xf32>
    %66 = arith.addf %63, %65 : vector<10x726xf32>
    %cst_32 = arith.constant 0.000000e+00 : f32
    %67 = vector.broadcast %cst_32 : f32 to vector<10x726xf32>
    %68 = arith.maximumf %66, %67 : vector<10x726xf32>
    %69 = tpu.transpose %68, [1, 0] : vector<10x726xf32> -> vector<726x10xf32>
    %c0_33 = arith.constant 0 : index
    %c0_34 = arith.constant 0 : index
    %70 = vector.load %arg13[%c0_33, %c0_34] : memref<726x10xf32, #tpu.memory_space<vmem>>, vector<726x10xf32>
    tpu.vector_store %arg13[%c0_33, %c0_34], %69 {strides = array<i32>} : memref<726x10xf32, #tpu.memory_space<vmem>>, vector<726x10xf32>,
    %c0_35 = arith.constant 0 : index
    %c0_36 = arith.constant 0 : index
    %71 = tpu.strided_load %arg13[%c0_35, %c0_36] {strides = array<i32: 2, 1>} : memref<726x10xf32, #tpu.memory_space<vmem>>, vector<13x10xf32>
    %c1_37 = arith.constant 1 : index
    %c0_38 = arith.constant 0 : index
    %72 = tpu.strided_load %arg13[%c1_37, %c0_38] {strides = array<i32: 2, 1>} : memref<726x10xf32, #tpu.memory_space<vmem>>, vector<13x10xf32>
    %c28_39 = arith.constant 28 : index
    %c0_40 = arith.constant 0 : index
    %73 = tpu.strided_load %arg13[%c28_39, %c0_40] {strides = array<i32: 2, 1>} : memref<726x10xf32, #tpu.memory_space<vmem>>, vector<13x10xf32>
    %c29_41 = arith.constant 29 : index
    %c0_42 = arith.constant 0 : index
    %74 = tpu.strided_load %arg13[%c29_41, %c0_42] {strides = array<i32: 2, 1>} : memref<726x10xf32, #tpu.memory_space<vmem>>, vector<13x10xf32>
    %75 = arith.maximumf %71, %72 : vector<13x10xf32>
    %76 = arith.maximumf %73, %74 : vector<13x10xf32>
    %77 = arith.maximumf %75, %76 : vector<13x10xf32>
    %c0_43 = arith.constant 0 : index
    %c0_44 = arith.constant 0 : index
    %78 = vector.load %arg14[%c0_43, %c0_44] : memref<169x10xf32, #tpu.memory_space<vmem>>, vector<13x10xf32>
    tpu.vector_store %arg14[%c0_43, %c0_44], %77 {strides = array<i32>} : memref<169x10xf32, #tpu.memory_space<vmem>>, vector<13x10xf32>,
    %c56_45 = arith.constant 56 : index
    %c0_46 = arith.constant 0 : index
    %79 = tpu.strided_load %arg13[%c56_45, %c0_46] {strides = array<i32: 2, 1>} : memref<726x10xf32, #tpu.memory_space<vmem>>, vector<13x10xf32>
    %c57_47 = arith.constant 57 : index
    %c0_48 = arith.constant 0 : index
    %80 = tpu.strided_load %arg13[%c57_47, %c0_48] {strides = array<i32: 2, 1>} : memref<726x10xf32, #tpu.memory_space<vmem>>, vector<13x10xf32>
    %c84 = arith.constant 84 : index
    %c0_49 = arith.constant 0 : index
    %81 = tpu.strided_load %arg13[%c84, %c0_49] {strides = array<i32: 2, 1>} : memref<726x10xf32, #tpu.memory_space<vmem>>, vector<13x10xf32>
    %c85 = arith.constant 85 : index
    %c0_50 = arith.constant 0 : index
    %82 = tpu.strided_load %arg13[%c85, %c0_50] {strides = array<i32: 2, 1>} : memref<726x10xf32, #tpu.memory_space<vmem>>, vector<13x10xf32>
    %83 = arith.maximumf %79, %80 : vector<13x10xf32>
    %84 = arith.maximumf %81, %82 : vector<13x10xf32>
    %85 = arith.maximumf %83, %84 : vector<13x10xf32>
    %c13 = arith.constant 13 : index
    %c0_51 = arith.constant 0 : index
    %86 = vector.load %arg14[%c13, %c0_51] : memref<169x10xf32, #tpu.memory_space<vmem>>, vector<13x10xf32>
    tpu.vector_store %arg14[%c13, %c0_51], %85 {strides = array<i32>} : memref<169x10xf32, #tpu.memory_space<vmem>>, vector<13x10xf32>,
    %c112 = arith.constant 112 : index
    %c0_52 = arith.constant 0 : index
    %87 = tpu.strided_load %arg13[%c112, %c0_52] {strides = array<i32: 2, 1>} : memref<726x10xf32, #tpu.memory_space<vmem>>, vector<13x10xf32>
    %c113 = arith.constant 113 : index
    %c0_53 = arith.constant 0 : index
    %88 = tpu.strided_load %arg13[%c113, %c0_53] {strides = array<i32: 2, 1>} : memref<726x10xf32, #tpu.memory_space<vmem>>, vector<13x10xf32>
    %c140 = arith.constant 140 : index
    %c0_54 = arith.constant 0 : index
    %89 = tpu.strided_load %arg13[%c140, %c0_54] {strides = array<i32: 2, 1>} : memref<726x10xf32, #tpu.memory_space<vmem>>, vector<13x10xf32>
    %c141 = arith.constant 141 : index
    %c0_55 = arith.constant 0 : index
    %90 = tpu.strided_load %arg13[%c141, %c0_55] {strides = array<i32: 2, 1>} : memref<726x10xf32, #tpu.memory_space<vmem>>, vector<13x10xf32>
    %91 = arith.maximumf %87, %88 : vector<13x10xf32>
    %92 = arith.maximumf %89, %90 : vector<13x10xf32>
    %93 = arith.maximumf %91, %92 : vector<13x10xf32>
    %c26 = arith.constant 26 : index
    %c0_56 = arith.constant 0 : index
    %94 = vector.load %arg14[%c26, %c0_56] : memref<169x10xf32, #tpu.memory_space<vmem>>, vector<13x10xf32>
    tpu.vector_store %arg14[%c26, %c0_56], %93 {strides = array<i32>} : memref<169x10xf32, #tpu.memory_space<vmem>>, vector<13x10xf32>,
    %c168 = arith.constant 168 : index
    %c0_57 = arith.constant 0 : index
    %95 = tpu.strided_load %arg13[%c168, %c0_57] {strides = array<i32: 2, 1>} : memref<726x10xf32, #tpu.memory_space<vmem>>, vector<13x10xf32>
    %c169 = arith.constant 169 : index
    %c0_58 = arith.constant 0 : index
    %96 = tpu.strided_load %arg13[%c169, %c0_58] {strides = array<i32: 2, 1>} : memref<726x10xf32, #tpu.memory_space<vmem>>, vector<13x10xf32>
    %c196 = arith.constant 196 : index
    %c0_59 = arith.constant 0 : index
    %97 = tpu.strided_load %arg13[%c196, %c0_59] {strides = array<i32: 2, 1>} : memref<726x10xf32, #tpu.memory_space<vmem>>, vector<13x10xf32>
    %c197 = arith.constant 197 : index
    %c0_60 = arith.constant 0 : index
    %98 = tpu.strided_load %arg13[%c197, %c0_60] {strides = array<i32: 2, 1>} : memref<726x10xf32, #tpu.memory_space<vmem>>, vector<13x10xf32>
    %99 = arith.maximumf %95, %96 : vector<13x10xf32>
    %100 = arith.maximumf %97, %98 : vector<13x10xf32>
    %101 = arith.maximumf %99, %100 : vector<13x10xf32>
    %c39 = arith.constant 39 : index
    %c0_61 = arith.constant 0 : index
    %102 = vector.load %arg14[%c39, %c0_61] : memref<169x10xf32, #tpu.memory_space<vmem>>, vector<13x10xf32>
    tpu.vector_store %arg14[%c39, %c0_61], %101 {strides = array<i32>} : memref<169x10xf32, #tpu.memory_space<vmem>>, vector<13x10xf32>,
    %c224 = arith.constant 224 : index
    %c0_62 = arith.constant 0 : index
    %103 = tpu.strided_load %arg13[%c224, %c0_62] {strides = array<i32: 2, 1>} : memref<726x10xf32, #tpu.memory_space<vmem>>, vector<13x10xf32>
    %c225 = arith.constant 225 : index
    %c0_63 = arith.constant 0 : index
    %104 = tpu.strided_load %arg13[%c225, %c0_63] {strides = array<i32: 2, 1>} : memref<726x10xf32, #tpu.memory_space<vmem>>, vector<13x10xf32>
    %c252 = arith.constant 252 : index
    %c0_64 = arith.constant 0 : index
    %105 = tpu.strided_load %arg13[%c252, %c0_64] {strides = array<i32: 2, 1>} : memref<726x10xf32, #tpu.memory_space<vmem>>, vector<13x10xf32>
    %c253 = arith.constant 253 : index
    %c0_65 = arith.constant 0 : index
    %106 = tpu.strided_load %arg13[%c253, %c0_65] {strides = array<i32: 2, 1>} : memref<726x10xf32, #tpu.memory_space<vmem>>, vector<13x10xf32>
    %107 = arith.maximumf %103, %104 : vector<13x10xf32>
    %108 = arith.maximumf %105, %106 : vector<13x10xf32>
    %109 = arith.maximumf %107, %108 : vector<13x10xf32>
    %c52 = arith.constant 52 : index
    %c0_66 = arith.constant 0 : index
    %110 = vector.load %arg14[%c52, %c0_66] : memref<169x10xf32, #tpu.memory_space<vmem>>, vector<13x10xf32>
    tpu.vector_store %arg14[%c52, %c0_66], %109 {strides = array<i32>} : memref<169x10xf32, #tpu.memory_space<vmem>>, vector<13x10xf32>,
    %c280 = arith.constant 280 : index
    %c0_67 = arith.constant 0 : index
    %111 = tpu.strided_load %arg13[%c280, %c0_67] {strides = array<i32: 2, 1>} : memref<726x10xf32, #tpu.memory_space<vmem>>, vector<13x10xf32>
    %c281 = arith.constant 281 : index
    %c0_68 = arith.constant 0 : index
    %112 = tpu.strided_load %arg13[%c281, %c0_68] {strides = array<i32: 2, 1>} : memref<726x10xf32, #tpu.memory_space<vmem>>, vector<13x10xf32>
    %c308 = arith.constant 308 : index
    %c0_69 = arith.constant 0 : index
    %113 = tpu.strided_load %arg13[%c308, %c0_69] {strides = array<i32: 2, 1>} : memref<726x10xf32, #tpu.memory_space<vmem>>, vector<13x10xf32>
    %c309 = arith.constant 309 : index
    %c0_70 = arith.constant 0 : index
    %114 = tpu.strided_load %arg13[%c309, %c0_70] {strides = array<i32: 2, 1>} : memref<726x10xf32, #tpu.memory_space<vmem>>, vector<13x10xf32>
    %115 = arith.maximumf %111, %112 : vector<13x10xf32>
    %116 = arith.maximumf %113, %114 : vector<13x10xf32>
    %117 = arith.maximumf %115, %116 : vector<13x10xf32>
    %c65 = arith.constant 65 : index
    %c0_71 = arith.constant 0 : index
    %118 = vector.load %arg14[%c65, %c0_71] : memref<169x10xf32, #tpu.memory_space<vmem>>, vector<13x10xf32>
    tpu.vector_store %arg14[%c65, %c0_71], %117 {strides = array<i32>} : memref<169x10xf32, #tpu.memory_space<vmem>>, vector<13x10xf32>,
    %c336 = arith.constant 336 : index
    %c0_72 = arith.constant 0 : index
    %119 = tpu.strided_load %arg13[%c336, %c0_72] {strides = array<i32: 2, 1>} : memref<726x10xf32, #tpu.memory_space<vmem>>, vector<13x10xf32>
    %c337 = arith.constant 337 : index
    %c0_73 = arith.constant 0 : index
    %120 = tpu.strided_load %arg13[%c337, %c0_73] {strides = array<i32: 2, 1>} : memref<726x10xf32, #tpu.memory_space<vmem>>, vector<13x10xf32>
    %c364 = arith.constant 364 : index
    %c0_74 = arith.constant 0 : index
    %121 = tpu.strided_load %arg13[%c364, %c0_74] {strides = array<i32: 2, 1>} : memref<726x10xf32, #tpu.memory_space<vmem>>, vector<13x10xf32>
    %c365 = arith.constant 365 : index
    %c0_75 = arith.constant 0 : index
    %122 = tpu.strided_load %arg13[%c365, %c0_75] {strides = array<i32: 2, 1>} : memref<726x10xf32, #tpu.memory_space<vmem>>, vector<13x10xf32>
    %123 = arith.maximumf %119, %120 : vector<13x10xf32>
    %124 = arith.maximumf %121, %122 : vector<13x10xf32>
    %125 = arith.maximumf %123, %124 : vector<13x10xf32>
    %c78 = arith.constant 78 : index
    %c0_76 = arith.constant 0 : index
    %126 = vector.load %arg14[%c78, %c0_76] : memref<169x10xf32, #tpu.memory_space<vmem>>, vector<13x10xf32>
    tpu.vector_store %arg14[%c78, %c0_76], %125 {strides = array<i32>} : memref<169x10xf32, #tpu.memory_space<vmem>>, vector<13x10xf32>,
    %c392 = arith.constant 392 : index
    %c0_77 = arith.constant 0 : index
    %127 = tpu.strided_load %arg13[%c392, %c0_77] {strides = array<i32: 2, 1>} : memref<726x10xf32, #tpu.memory_space<vmem>>, vector<13x10xf32>
    %c393 = arith.constant 393 : index
    %c0_78 = arith.constant 0 : index
    %128 = tpu.strided_load %arg13[%c393, %c0_78] {strides = array<i32: 2, 1>} : memref<726x10xf32, #tpu.memory_space<vmem>>, vector<13x10xf32>
    %c420 = arith.constant 420 : index
    %c0_79 = arith.constant 0 : index
    %129 = tpu.strided_load %arg13[%c420, %c0_79] {strides = array<i32: 2, 1>} : memref<726x10xf32, #tpu.memory_space<vmem>>, vector<13x10xf32>
    %c421 = arith.constant 421 : index
    %c0_80 = arith.constant 0 : index
    %130 = tpu.strided_load %arg13[%c421, %c0_80] {strides = array<i32: 2, 1>} : memref<726x10xf32, #tpu.memory_space<vmem>>, vector<13x10xf32>
    %131 = arith.maximumf %127, %128 : vector<13x10xf32>
    %132 = arith.maximumf %129, %130 : vector<13x10xf32>
    %133 = arith.maximumf %131, %132 : vector<13x10xf32>
    %c91 = arith.constant 91 : index
    %c0_81 = arith.constant 0 : index
    %134 = vector.load %arg14[%c91, %c0_81] : memref<169x10xf32, #tpu.memory_space<vmem>>, vector<13x10xf32>
    tpu.vector_store %arg14[%c91, %c0_81], %133 {strides = array<i32>} : memref<169x10xf32, #tpu.memory_space<vmem>>, vector<13x10xf32>,
    %c448 = arith.constant 448 : index
    %c0_82 = arith.constant 0 : index
    %135 = tpu.strided_load %arg13[%c448, %c0_82] {strides = array<i32: 2, 1>} : memref<726x10xf32, #tpu.memory_space<vmem>>, vector<13x10xf32>
    %c449 = arith.constant 449 : index
    %c0_83 = arith.constant 0 : index
    %136 = tpu.strided_load %arg13[%c449, %c0_83] {strides = array<i32: 2, 1>} : memref<726x10xf32, #tpu.memory_space<vmem>>, vector<13x10xf32>
    %c476 = arith.constant 476 : index
    %c0_84 = arith.constant 0 : index
    %137 = tpu.strided_load %arg13[%c476, %c0_84] {strides = array<i32: 2, 1>} : memref<726x10xf32, #tpu.memory_space<vmem>>, vector<13x10xf32>
    %c477 = arith.constant 477 : index
    %c0_85 = arith.constant 0 : index
    %138 = tpu.strided_load %arg13[%c477, %c0_85] {strides = array<i32: 2, 1>} : memref<726x10xf32, #tpu.memory_space<vmem>>, vector<13x10xf32>
    %139 = arith.maximumf %135, %136 : vector<13x10xf32>
    %140 = arith.maximumf %137, %138 : vector<13x10xf32>
    %141 = arith.maximumf %139, %140 : vector<13x10xf32>
    %c104 = arith.constant 104 : index
    %c0_86 = arith.constant 0 : index
    %142 = vector.load %arg14[%c104, %c0_86] : memref<169x10xf32, #tpu.memory_space<vmem>>, vector<13x10xf32>
    tpu.vector_store %arg14[%c104, %c0_86], %141 {strides = array<i32>} : memref<169x10xf32, #tpu.memory_space<vmem>>, vector<13x10xf32>,
    %c504 = arith.constant 504 : index
    %c0_87 = arith.constant 0 : index
    %143 = tpu.strided_load %arg13[%c504, %c0_87] {strides = array<i32: 2, 1>} : memref<726x10xf32, #tpu.memory_space<vmem>>, vector<13x10xf32>
    %c505 = arith.constant 505 : index
    %c0_88 = arith.constant 0 : index
    %144 = tpu.strided_load %arg13[%c505, %c0_88] {strides = array<i32: 2, 1>} : memref<726x10xf32, #tpu.memory_space<vmem>>, vector<13x10xf32>
    %c532 = arith.constant 532 : index
    %c0_89 = arith.constant 0 : index
    %145 = tpu.strided_load %arg13[%c532, %c0_89] {strides = array<i32: 2, 1>} : memref<726x10xf32, #tpu.memory_space<vmem>>, vector<13x10xf32>
    %c533 = arith.constant 533 : index
    %c0_90 = arith.constant 0 : index
    %146 = tpu.strided_load %arg13[%c533, %c0_90] {strides = array<i32: 2, 1>} : memref<726x10xf32, #tpu.memory_space<vmem>>, vector<13x10xf32>
    %147 = arith.maximumf %143, %144 : vector<13x10xf32>
    %148 = arith.maximumf %145, %146 : vector<13x10xf32>
    %149 = arith.maximumf %147, %148 : vector<13x10xf32>
    %c117 = arith.constant 117 : index
    %c0_91 = arith.constant 0 : index
    %150 = vector.load %arg14[%c117, %c0_91] : memref<169x10xf32, #tpu.memory_space<vmem>>, vector<13x10xf32>
    tpu.vector_store %arg14[%c117, %c0_91], %149 {strides = array<i32>} : memref<169x10xf32, #tpu.memory_space<vmem>>, vector<13x10xf32>,
    %c560 = arith.constant 560 : index
    %c0_92 = arith.constant 0 : index
    %151 = tpu.strided_load %arg13[%c560, %c0_92] {strides = array<i32: 2, 1>} : memref<726x10xf32, #tpu.memory_space<vmem>>, vector<13x10xf32>
    %c561 = arith.constant 561 : index
    %c0_93 = arith.constant 0 : index
    %152 = tpu.strided_load %arg13[%c561, %c0_93] {strides = array<i32: 2, 1>} : memref<726x10xf32, #tpu.memory_space<vmem>>, vector<13x10xf32>
    %c588 = arith.constant 588 : index
    %c0_94 = arith.constant 0 : index
    %153 = tpu.strided_load %arg13[%c588, %c0_94] {strides = array<i32: 2, 1>} : memref<726x10xf32, #tpu.memory_space<vmem>>, vector<13x10xf32>
    %c589 = arith.constant 589 : index
    %c0_95 = arith.constant 0 : index
    %154 = tpu.strided_load %arg13[%c589, %c0_95] {strides = array<i32: 2, 1>} : memref<726x10xf32, #tpu.memory_space<vmem>>, vector<13x10xf32>
    %155 = arith.maximumf %151, %152 : vector<13x10xf32>
    %156 = arith.maximumf %153, %154 : vector<13x10xf32>
    %157 = arith.maximumf %155, %156 : vector<13x10xf32>
    %c130 = arith.constant 130 : index
    %c0_96 = arith.constant 0 : index
    %158 = vector.load %arg14[%c130, %c0_96] : memref<169x10xf32, #tpu.memory_space<vmem>>, vector<13x10xf32>
    tpu.vector_store %arg14[%c130, %c0_96], %157 {strides = array<i32>} : memref<169x10xf32, #tpu.memory_space<vmem>>, vector<13x10xf32>,
    %c616 = arith.constant 616 : index
    %c0_97 = arith.constant 0 : index
    %159 = tpu.strided_load %arg13[%c616, %c0_97] {strides = array<i32: 2, 1>} : memref<726x10xf32, #tpu.memory_space<vmem>>, vector<13x10xf32>
    %c617 = arith.constant 617 : index
    %c0_98 = arith.constant 0 : index
    %160 = tpu.strided_load %arg13[%c617, %c0_98] {strides = array<i32: 2, 1>} : memref<726x10xf32, #tpu.memory_space<vmem>>, vector<13x10xf32>
    %c644 = arith.constant 644 : index
    %c0_99 = arith.constant 0 : index
    %161 = tpu.strided_load %arg13[%c644, %c0_99] {strides = array<i32: 2, 1>} : memref<726x10xf32, #tpu.memory_space<vmem>>, vector<13x10xf32>
    %c645 = arith.constant 645 : index
    %c0_100 = arith.constant 0 : index
    %162 = tpu.strided_load %arg13[%c645, %c0_100] {strides = array<i32: 2, 1>} : memref<726x10xf32, #tpu.memory_space<vmem>>, vector<13x10xf32>
    %163 = arith.maximumf %159, %160 : vector<13x10xf32>
    %164 = arith.maximumf %161, %162 : vector<13x10xf32>
    %165 = arith.maximumf %163, %164 : vector<13x10xf32>
    %c143 = arith.constant 143 : index
    %c0_101 = arith.constant 0 : index
    %166 = vector.load %arg14[%c143, %c0_101] : memref<169x10xf32, #tpu.memory_space<vmem>>, vector<13x10xf32>
    tpu.vector_store %arg14[%c143, %c0_101], %165 {strides = array<i32>} : memref<169x10xf32, #tpu.memory_space<vmem>>, vector<13x10xf32>,
    %c672 = arith.constant 672 : index
    %c0_102 = arith.constant 0 : index
    %167 = tpu.strided_load %arg13[%c672, %c0_102] {strides = array<i32: 2, 1>} : memref<726x10xf32, #tpu.memory_space<vmem>>, vector<13x10xf32>
    %c673 = arith.constant 673 : index
    %c0_103 = arith.constant 0 : index
    %168 = tpu.strided_load %arg13[%c673, %c0_103] {strides = array<i32: 2, 1>} : memref<726x10xf32, #tpu.memory_space<vmem>>, vector<13x10xf32>
    %c700 = arith.constant 700 : index
    %c0_104 = arith.constant 0 : index
    %169 = tpu.strided_load %arg13[%c700, %c0_104] {strides = array<i32: 2, 1>} : memref<726x10xf32, #tpu.memory_space<vmem>>, vector<13x10xf32>
    %c701 = arith.constant 701 : index
    %c0_105 = arith.constant 0 : index
    %170 = tpu.strided_load %arg13[%c701, %c0_105] {strides = array<i32: 2, 1>} : memref<726x10xf32, #tpu.memory_space<vmem>>, vector<13x10xf32>
    %171 = arith.maximumf %167, %168 : vector<13x10xf32>
    %172 = arith.maximumf %169, %170 : vector<13x10xf32>
    %173 = arith.maximumf %171, %172 : vector<13x10xf32>
    %c156 = arith.constant 156 : index
    %c0_106 = arith.constant 0 : index
    %174 = vector.load %arg14[%c156, %c0_106] : memref<169x10xf32, #tpu.memory_space<vmem>>, vector<13x10xf32>
    tpu.vector_store %arg14[%c156, %c0_106], %173 {strides = array<i32>} : memref<169x10xf32, #tpu.memory_space<vmem>>, vector<13x10xf32>,
    %cst_107 = arith.constant 0.000000e+00 : f32
    %175 = vector.broadcast %cst_107 : f32 to vector<141x20xf32>
    %c0_108 = arith.constant 0 : index
    %c0_109 = arith.constant 0 : index
    %176 = vector.load %arg14[%c0_108, %c0_109] : memref<169x10xf32, #tpu.memory_space<vmem>>, vector<141x10xf32>
    %c0_110 = arith.constant 0 : index
    %c0_111 = arith.constant 0 : index
    %c0_112 = arith.constant 0 : index
    %177 = vector.load %arg4[%c0_110, %c0_111, %c0_112] : memref<9x10x20xf32, #tpu.memory_space<vmem>>, vector<1x10x20xf32>
    %178 = vector.shape_cast %177 : vector<1x10x20xf32> to vector<10x20xf32>
    %cst_113 = arith.constant dense<0.000000e+00> : vector<141x20xf32>
    %179 = tpu.matmul %176, %178, %cst_113 {dimension_numbers = #tpu.dot_dimension_numbers<[1], [0], [0], [1], [0, 0, 1, 1], [], []>} : vector<141x10xf32>, vector<10x20xf32>, vector<141x20xf32> -> vector<141x20xf32>
    %180 = arith.addf %175, %179 : vector<141x20xf32>
    %c1_114 = arith.constant 1 : index
    %c0_115 = arith.constant 0 : index
    %181 = vector.load %arg14[%c1_114, %c0_115] : memref<169x10xf32, #tpu.memory_space<vmem>>, vector<141x10xf32>
    %c1_116 = arith.constant 1 : index
    %c0_117 = arith.constant 0 : index
    %c0_118 = arith.constant 0 : index
    %182 = vector.load %arg4[%c1_116, %c0_117, %c0_118] : memref<9x10x20xf32, #tpu.memory_space<vmem>>, vector<1x10x20xf32>
    %183 = vector.shape_cast %182 : vector<1x10x20xf32> to vector<10x20xf32>
    %cst_119 = arith.constant dense<0.000000e+00> : vector<141x20xf32>
    %184 = tpu.matmul %181, %183, %cst_119 {dimension_numbers = #tpu.dot_dimension_numbers<[1], [0], [0], [1], [0, 0, 1, 1], [], []>} : vector<141x10xf32>, vector<10x20xf32>, vector<141x20xf32> -> vector<141x20xf32>
    %185 = arith.addf %180, %184 : vector<141x20xf32>
    %c2_120 = arith.constant 2 : index
    %c0_121 = arith.constant 0 : index
    %186 = vector.load %arg14[%c2_120, %c0_121] : memref<169x10xf32, #tpu.memory_space<vmem>>, vector<141x10xf32>
    %c2_122 = arith.constant 2 : index
    %c0_123 = arith.constant 0 : index
    %c0_124 = arith.constant 0 : index
    %187 = vector.load %arg4[%c2_122, %c0_123, %c0_124] : memref<9x10x20xf32, #tpu.memory_space<vmem>>, vector<1x10x20xf32>
    %188 = vector.shape_cast %187 : vector<1x10x20xf32> to vector<10x20xf32>
    %cst_125 = arith.constant dense<0.000000e+00> : vector<141x20xf32>
    %189 = tpu.matmul %186, %188, %cst_125 {dimension_numbers = #tpu.dot_dimension_numbers<[1], [0], [0], [1], [0, 0, 1, 1], [], []>} : vector<141x10xf32>, vector<10x20xf32>, vector<141x20xf32> -> vector<141x20xf32>
    %190 = arith.addf %185, %189 : vector<141x20xf32>
    %c13_126 = arith.constant 13 : index
    %c0_127 = arith.constant 0 : index
    %191 = vector.load %arg14[%c13_126, %c0_127] : memref<169x10xf32, #tpu.memory_space<vmem>>, vector<141x10xf32>
    %c3_128 = arith.constant 3 : index
    %c0_129 = arith.constant 0 : index
    %c0_130 = arith.constant 0 : index
    %192 = vector.load %arg4[%c3_128, %c0_129, %c0_130] : memref<9x10x20xf32, #tpu.memory_space<vmem>>, vector<1x10x20xf32>
    %193 = vector.shape_cast %192 : vector<1x10x20xf32> to vector<10x20xf32>
    %cst_131 = arith.constant dense<0.000000e+00> : vector<141x20xf32>
    %194 = tpu.matmul %191, %193, %cst_131 {dimension_numbers = #tpu.dot_dimension_numbers<[1], [0], [0], [1], [0, 0, 1, 1], [], []>} : vector<141x10xf32>, vector<10x20xf32>, vector<141x20xf32> -> vector<141x20xf32>
    %195 = arith.addf %190, %194 : vector<141x20xf32>
    %c14 = arith.constant 14 : index
    %c0_132 = arith.constant 0 : index
    %196 = vector.load %arg14[%c14, %c0_132] : memref<169x10xf32, #tpu.memory_space<vmem>>, vector<141x10xf32>
    %c4_133 = arith.constant 4 : index
    %c0_134 = arith.constant 0 : index
    %c0_135 = arith.constant 0 : index
    %197 = vector.load %arg4[%c4_133, %c0_134, %c0_135] : memref<9x10x20xf32, #tpu.memory_space<vmem>>, vector<1x10x20xf32>
    %198 = vector.shape_cast %197 : vector<1x10x20xf32> to vector<10x20xf32>
    %cst_136 = arith.constant dense<0.000000e+00> : vector<141x20xf32>
    %199 = tpu.matmul %196, %198, %cst_136 {dimension_numbers = #tpu.dot_dimension_numbers<[1], [0], [0], [1], [0, 0, 1, 1], [], []>} : vector<141x10xf32>, vector<10x20xf32>, vector<141x20xf32> -> vector<141x20xf32>
    %200 = arith.addf %195, %199 : vector<141x20xf32>
    %c15 = arith.constant 15 : index
    %c0_137 = arith.constant 0 : index
    %201 = vector.load %arg14[%c15, %c0_137] : memref<169x10xf32, #tpu.memory_space<vmem>>, vector<141x10xf32>
    %c5_138 = arith.constant 5 : index
    %c0_139 = arith.constant 0 : index
    %c0_140 = arith.constant 0 : index
    %202 = vector.load %arg4[%c5_138, %c0_139, %c0_140] : memref<9x10x20xf32, #tpu.memory_space<vmem>>, vector<1x10x20xf32>
    %203 = vector.shape_cast %202 : vector<1x10x20xf32> to vector<10x20xf32>
    %cst_141 = arith.constant dense<0.000000e+00> : vector<141x20xf32>
    %204 = tpu.matmul %201, %203, %cst_141 {dimension_numbers = #tpu.dot_dimension_numbers<[1], [0], [0], [1], [0, 0, 1, 1], [], []>} : vector<141x10xf32>, vector<10x20xf32>, vector<141x20xf32> -> vector<141x20xf32>
    %205 = arith.addf %200, %204 : vector<141x20xf32>
    %c26_142 = arith.constant 26 : index
    %c0_143 = arith.constant 0 : index
    %206 = vector.load %arg14[%c26_142, %c0_143] : memref<169x10xf32, #tpu.memory_space<vmem>>, vector<141x10xf32>
    %c6_144 = arith.constant 6 : index
    %c0_145 = arith.constant 0 : index
    %c0_146 = arith.constant 0 : index
    %207 = vector.load %arg4[%c6_144, %c0_145, %c0_146] : memref<9x10x20xf32, #tpu.memory_space<vmem>>, vector<1x10x20xf32>
    %208 = vector.shape_cast %207 : vector<1x10x20xf32> to vector<10x20xf32>
    %cst_147 = arith.constant dense<0.000000e+00> : vector<141x20xf32>
    %209 = tpu.matmul %206, %208, %cst_147 {dimension_numbers = #tpu.dot_dimension_numbers<[1], [0], [0], [1], [0, 0, 1, 1], [], []>} : vector<141x10xf32>, vector<10x20xf32>, vector<141x20xf32> -> vector<141x20xf32>
    %210 = arith.addf %205, %209 : vector<141x20xf32>
    %c27 = arith.constant 27 : index
    %c0_148 = arith.constant 0 : index
    %211 = vector.load %arg14[%c27, %c0_148] : memref<169x10xf32, #tpu.memory_space<vmem>>, vector<141x10xf32>
    %c7_149 = arith.constant 7 : index
    %c0_150 = arith.constant 0 : index
    %c0_151 = arith.constant 0 : index
    %212 = vector.load %arg4[%c7_149, %c0_150, %c0_151] : memref<9x10x20xf32, #tpu.memory_space<vmem>>, vector<1x10x20xf32>
    %213 = vector.shape_cast %212 : vector<1x10x20xf32> to vector<10x20xf32>
    %cst_152 = arith.constant dense<0.000000e+00> : vector<141x20xf32>
    %214 = tpu.matmul %211, %213, %cst_152 {dimension_numbers = #tpu.dot_dimension_numbers<[1], [0], [0], [1], [0, 0, 1, 1], [], []>} : vector<141x10xf32>, vector<10x20xf32>, vector<141x20xf32> -> vector<141x20xf32>
    %215 = arith.addf %210, %214 : vector<141x20xf32>
    %c28_153 = arith.constant 28 : index
    %c0_154 = arith.constant 0 : index
    %216 = vector.load %arg14[%c28_153, %c0_154] : memref<169x10xf32, #tpu.memory_space<vmem>>, vector<141x10xf32>
    %c8_155 = arith.constant 8 : index
    %c0_156 = arith.constant 0 : index
    %c0_157 = arith.constant 0 : index
    %217 = vector.load %arg4[%c8_155, %c0_156, %c0_157] : memref<9x10x20xf32, #tpu.memory_space<vmem>>, vector<1x10x20xf32>
    %218 = vector.shape_cast %217 : vector<1x10x20xf32> to vector<10x20xf32>
    %cst_158 = arith.constant dense<0.000000e+00> : vector<141x20xf32>
    %219 = tpu.matmul %216, %218, %cst_158 {dimension_numbers = #tpu.dot_dimension_numbers<[1], [0], [0], [1], [0, 0, 1, 1], [], []>} : vector<141x10xf32>, vector<10x20xf32>, vector<141x20xf32> -> vector<141x20xf32>
    %220 = arith.addf %215, %219 : vector<141x20xf32>
    %c0_159 = arith.constant 0 : index
    %c0_160 = arith.constant 0 : index
    %221 = vector.load %arg5[%c0_159, %c0_160] : memref<1x20xf32, #tpu.memory_space<vmem>>, vector<1x20xf32>
    %222 = vector.broadcast %221 : vector<1x20xf32> to vector<141x20xf32>
    %223 = arith.addf %220, %222 : vector<141x20xf32>
    %cst_161 = arith.constant 0.000000e+00 : f32
    %224 = vector.broadcast %cst_161 : f32 to vector<141x20xf32>
    %225 = arith.maximumf %223, %224 : vector<141x20xf32>
    %c0_162 = arith.constant 0 : index
    %c0_163 = arith.constant 0 : index
    %226 = vector.load %arg15[%c0_162, %c0_163] : memref<141x20xf32, #tpu.memory_space<vmem>>, vector<141x20xf32>
    tpu.vector_store %arg15[%c0_162, %c0_163], %225 {strides = array<i32>} : memref<141x20xf32, #tpu.memory_space<vmem>>, vector<141x20xf32>,
    %c0_164 = arith.constant 0 : index
    %c0_165 = arith.constant 0 : index
    %227 = tpu.strided_load %arg15[%c0_164, %c0_165] {strides = array<i32: 2, 1>} : memref<141x20xf32, #tpu.memory_space<vmem>>, vector<5x20xf32>
    %c1_166 = arith.constant 1 : index
    %c0_167 = arith.constant 0 : index
    %228 = tpu.strided_load %arg15[%c1_166, %c0_167] {strides = array<i32: 2, 1>} : memref<141x20xf32, #tpu.memory_space<vmem>>, vector<5x20xf32>
    %c13_168 = arith.constant 13 : index
    %c0_169 = arith.constant 0 : index
    %229 = tpu.strided_load %arg15[%c13_168, %c0_169] {strides = array<i32: 2, 1>} : memref<141x20xf32, #tpu.memory_space<vmem>>, vector<5x20xf32>
    %c14_170 = arith.constant 14 : index
    %c0_171 = arith.constant 0 : index
    %230 = tpu.strided_load %arg15[%c14_170, %c0_171] {strides = array<i32: 2, 1>} : memref<141x20xf32, #tpu.memory_space<vmem>>, vector<5x20xf32>
    %231 = arith.maximumf %227, %228 : vector<5x20xf32>
    %232 = arith.maximumf %229, %230 : vector<5x20xf32>
    %233 = arith.maximumf %231, %232 : vector<5x20xf32>
    %c0_172 = arith.constant 0 : index
    %c0_173 = arith.constant 0 : index
    %234 = vector.load %arg16[%c0_172, %c0_173] : memref<25x20xf32, #tpu.memory_space<vmem>>, vector<5x20xf32>
    tpu.vector_store %arg16[%c0_172, %c0_173], %233 {strides = array<i32>} : memref<25x20xf32, #tpu.memory_space<vmem>>, vector<5x20xf32>,
    %c26_174 = arith.constant 26 : index
    %c0_175 = arith.constant 0 : index
    %235 = tpu.strided_load %arg15[%c26_174, %c0_175] {strides = array<i32: 2, 1>} : memref<141x20xf32, #tpu.memory_space<vmem>>, vector<5x20xf32>
    %c27_176 = arith.constant 27 : index
    %c0_177 = arith.constant 0 : index
    %236 = tpu.strided_load %arg15[%c27_176, %c0_177] {strides = array<i32: 2, 1>} : memref<141x20xf32, #tpu.memory_space<vmem>>, vector<5x20xf32>
    %c39_178 = arith.constant 39 : index
    %c0_179 = arith.constant 0 : index
    %237 = tpu.strided_load %arg15[%c39_178, %c0_179] {strides = array<i32: 2, 1>} : memref<141x20xf32, #tpu.memory_space<vmem>>, vector<5x20xf32>
    %c40 = arith.constant 40 : index
    %c0_180 = arith.constant 0 : index
    %238 = tpu.strided_load %arg15[%c40, %c0_180] {strides = array<i32: 2, 1>} : memref<141x20xf32, #tpu.memory_space<vmem>>, vector<5x20xf32>
    %239 = arith.maximumf %235, %236 : vector<5x20xf32>
    %240 = arith.maximumf %237, %238 : vector<5x20xf32>
    %241 = arith.maximumf %239, %240 : vector<5x20xf32>
    %c5_181 = arith.constant 5 : index
    %c0_182 = arith.constant 0 : index
    %242 = vector.load %arg16[%c5_181, %c0_182] : memref<25x20xf32, #tpu.memory_space<vmem>>, vector<5x20xf32>
    tpu.vector_store %arg16[%c5_181, %c0_182], %241 {strides = array<i32>} : memref<25x20xf32, #tpu.memory_space<vmem>>, vector<5x20xf32>,
    %c52_183 = arith.constant 52 : index
    %c0_184 = arith.constant 0 : index
    %243 = tpu.strided_load %arg15[%c52_183, %c0_184] {strides = array<i32: 2, 1>} : memref<141x20xf32, #tpu.memory_space<vmem>>, vector<5x20xf32>
    %c53 = arith.constant 53 : index
    %c0_185 = arith.constant 0 : index
    %244 = tpu.strided_load %arg15[%c53, %c0_185] {strides = array<i32: 2, 1>} : memref<141x20xf32, #tpu.memory_space<vmem>>, vector<5x20xf32>
    %c65_186 = arith.constant 65 : index
    %c0_187 = arith.constant 0 : index
    %245 = tpu.strided_load %arg15[%c65_186, %c0_187] {strides = array<i32: 2, 1>} : memref<141x20xf32, #tpu.memory_space<vmem>>, vector<5x20xf32>
    %c66 = arith.constant 66 : index
    %c0_188 = arith.constant 0 : index
    %246 = tpu.strided_load %arg15[%c66, %c0_188] {strides = array<i32: 2, 1>} : memref<141x20xf32, #tpu.memory_space<vmem>>, vector<5x20xf32>
    %247 = arith.maximumf %243, %244 : vector<5x20xf32>
    %248 = arith.maximumf %245, %246 : vector<5x20xf32>
    %249 = arith.maximumf %247, %248 : vector<5x20xf32>
    %c10 = arith.constant 10 : index
    %c0_189 = arith.constant 0 : index
    %250 = vector.load %arg16[%c10, %c0_189] : memref<25x20xf32, #tpu.memory_space<vmem>>, vector<5x20xf32>
    tpu.vector_store %arg16[%c10, %c0_189], %249 {strides = array<i32>} : memref<25x20xf32, #tpu.memory_space<vmem>>, vector<5x20xf32>,
    %c78_190 = arith.constant 78 : index
    %c0_191 = arith.constant 0 : index
    %251 = tpu.strided_load %arg15[%c78_190, %c0_191] {strides = array<i32: 2, 1>} : memref<141x20xf32, #tpu.memory_space<vmem>>, vector<5x20xf32>
    %c79 = arith.constant 79 : index
    %c0_192 = arith.constant 0 : index
    %252 = tpu.strided_load %arg15[%c79, %c0_192] {strides = array<i32: 2, 1>} : memref<141x20xf32, #tpu.memory_space<vmem>>, vector<5x20xf32>
    %c91_193 = arith.constant 91 : index
    %c0_194 = arith.constant 0 : index
    %253 = tpu.strided_load %arg15[%c91_193, %c0_194] {strides = array<i32: 2, 1>} : memref<141x20xf32, #tpu.memory_space<vmem>>, vector<5x20xf32>
    %c92 = arith.constant 92 : index
    %c0_195 = arith.constant 0 : index
    %254 = tpu.strided_load %arg15[%c92, %c0_195] {strides = array<i32: 2, 1>} : memref<141x20xf32, #tpu.memory_space<vmem>>, vector<5x20xf32>
    %255 = arith.maximumf %251, %252 : vector<5x20xf32>
    %256 = arith.maximumf %253, %254 : vector<5x20xf32>
    %257 = arith.maximumf %255, %256 : vector<5x20xf32>
    %c15_196 = arith.constant 15 : index
    %c0_197 = arith.constant 0 : index
    %258 = vector.load %arg16[%c15_196, %c0_197] : memref<25x20xf32, #tpu.memory_space<vmem>>, vector<5x20xf32>
    tpu.vector_store %arg16[%c15_196, %c0_197], %257 {strides = array<i32>} : memref<25x20xf32, #tpu.memory_space<vmem>>, vector<5x20xf32>,
    %c104_198 = arith.constant 104 : index
    %c0_199 = arith.constant 0 : index
    %259 = tpu.strided_load %arg15[%c104_198, %c0_199] {strides = array<i32: 2, 1>} : memref<141x20xf32, #tpu.memory_space<vmem>>, vector<5x20xf32>
    %c105 = arith.constant 105 : index
    %c0_200 = arith.constant 0 : index
    %260 = tpu.strided_load %arg15[%c105, %c0_200] {strides = array<i32: 2, 1>} : memref<141x20xf32, #tpu.memory_space<vmem>>, vector<5x20xf32>
    %c117_201 = arith.constant 117 : index
    %c0_202 = arith.constant 0 : index
    %261 = tpu.strided_load %arg15[%c117_201, %c0_202] {strides = array<i32: 2, 1>} : memref<141x20xf32, #tpu.memory_space<vmem>>, vector<5x20xf32>
    %c118 = arith.constant 118 : index
    %c0_203 = arith.constant 0 : index
    %262 = tpu.strided_load %arg15[%c118, %c0_203] {strides = array<i32: 2, 1>} : memref<141x20xf32, #tpu.memory_space<vmem>>, vector<5x20xf32>
    %263 = arith.maximumf %259, %260 : vector<5x20xf32>
    %264 = arith.maximumf %261, %262 : vector<5x20xf32>
    %265 = arith.maximumf %263, %264 : vector<5x20xf32>
    %c20 = arith.constant 20 : index
    %c0_204 = arith.constant 0 : index
    %266 = vector.load %arg16[%c20, %c0_204] : memref<25x20xf32, #tpu.memory_space<vmem>>, vector<5x20xf32>
    tpu.vector_store %arg16[%c20, %c0_204], %265 {strides = array<i32>} : memref<25x20xf32, #tpu.memory_space<vmem>>, vector<5x20xf32>,
    %cst_205 = arith.constant 0.000000e+00 : f32
    %267 = vector.broadcast %cst_205 : f32 to vector<13x40xf32>
    %c0_206 = arith.constant 0 : index
    %c0_207 = arith.constant 0 : index
    %268 = vector.load %arg16[%c0_206, %c0_207] : memref<25x20xf32, #tpu.memory_space<vmem>>, vector<13x20xf32>
    %c0_208 = arith.constant 0 : index
    %c0_209 = arith.constant 0 : index
    %c0_210 = arith.constant 0 : index
    %269 = vector.load %arg6[%c0_208, %c0_209, %c0_210] : memref<9x20x40xf32, #tpu.memory_space<vmem>>, vector<1x20x40xf32>
    %270 = vector.shape_cast %269 : vector<1x20x40xf32> to vector<20x40xf32>
    %cst_211 = arith.constant dense<0.000000e+00> : vector<13x40xf32>
    %271 = tpu.matmul %268, %270, %cst_211 {dimension_numbers = #tpu.dot_dimension_numbers<[1], [0], [0], [1], [0, 0, 1, 1], [], []>} : vector<13x20xf32>, vector<20x40xf32>, vector<13x40xf32> -> vector<13x40xf32>
    %272 = arith.addf %267, %271 : vector<13x40xf32>
    %c1_212 = arith.constant 1 : index
    %c0_213 = arith.constant 0 : index
    %273 = vector.load %arg16[%c1_212, %c0_213] : memref<25x20xf32, #tpu.memory_space<vmem>>, vector<13x20xf32>
    %c1_214 = arith.constant 1 : index
    %c0_215 = arith.constant 0 : index
    %c0_216 = arith.constant 0 : index
    %274 = vector.load %arg6[%c1_214, %c0_215, %c0_216] : memref<9x20x40xf32, #tpu.memory_space<vmem>>, vector<1x20x40xf32>
    %275 = vector.shape_cast %274 : vector<1x20x40xf32> to vector<20x40xf32>
    %cst_217 = arith.constant dense<0.000000e+00> : vector<13x40xf32>
    %276 = tpu.matmul %273, %275, %cst_217 {dimension_numbers = #tpu.dot_dimension_numbers<[1], [0], [0], [1], [0, 0, 1, 1], [], []>} : vector<13x20xf32>, vector<20x40xf32>, vector<13x40xf32> -> vector<13x40xf32>
    %277 = arith.addf %272, %276 : vector<13x40xf32>
    %c2_218 = arith.constant 2 : index
    %c0_219 = arith.constant 0 : index
    %278 = vector.load %arg16[%c2_218, %c0_219] : memref<25x20xf32, #tpu.memory_space<vmem>>, vector<13x20xf32>
    %c2_220 = arith.constant 2 : index
    %c0_221 = arith.constant 0 : index
    %c0_222 = arith.constant 0 : index
    %279 = vector.load %arg6[%c2_220, %c0_221, %c0_222] : memref<9x20x40xf32, #tpu.memory_space<vmem>>, vector<1x20x40xf32>
    %280 = vector.shape_cast %279 : vector<1x20x40xf32> to vector<20x40xf32>
    %cst_223 = arith.constant dense<0.000000e+00> : vector<13x40xf32>
    %281 = tpu.matmul %278, %280, %cst_223 {dimension_numbers = #tpu.dot_dimension_numbers<[1], [0], [0], [1], [0, 0, 1, 1], [], []>} : vector<13x20xf32>, vector<20x40xf32>, vector<13x40xf32> -> vector<13x40xf32>
    %282 = arith.addf %277, %281 : vector<13x40xf32>
    %c5_224 = arith.constant 5 : index
    %c0_225 = arith.constant 0 : index
    %283 = vector.load %arg16[%c5_224, %c0_225] : memref<25x20xf32, #tpu.memory_space<vmem>>, vector<13x20xf32>
    %c3_226 = arith.constant 3 : index
    %c0_227 = arith.constant 0 : index
    %c0_228 = arith.constant 0 : index
    %284 = vector.load %arg6[%c3_226, %c0_227, %c0_228] : memref<9x20x40xf32, #tpu.memory_space<vmem>>, vector<1x20x40xf32>
    %285 = vector.shape_cast %284 : vector<1x20x40xf32> to vector<20x40xf32>
    %cst_229 = arith.constant dense<0.000000e+00> : vector<13x40xf32>
    %286 = tpu.matmul %283, %285, %cst_229 {dimension_numbers = #tpu.dot_dimension_numbers<[1], [0], [0], [1], [0, 0, 1, 1], [], []>} : vector<13x20xf32>, vector<20x40xf32>, vector<13x40xf32> -> vector<13x40xf32>
    %287 = arith.addf %282, %286 : vector<13x40xf32>
    %c6_230 = arith.constant 6 : index
    %c0_231 = arith.constant 0 : index
    %288 = vector.load %arg16[%c6_230, %c0_231] : memref<25x20xf32, #tpu.memory_space<vmem>>, vector<13x20xf32>
    %c4_232 = arith.constant 4 : index
    %c0_233 = arith.constant 0 : index
    %c0_234 = arith.constant 0 : index
    %289 = vector.load %arg6[%c4_232, %c0_233, %c0_234] : memref<9x20x40xf32, #tpu.memory_space<vmem>>, vector<1x20x40xf32>
    %290 = vector.shape_cast %289 : vector<1x20x40xf32> to vector<20x40xf32>
    %cst_235 = arith.constant dense<0.000000e+00> : vector<13x40xf32>
    %291 = tpu.matmul %288, %290, %cst_235 {dimension_numbers = #tpu.dot_dimension_numbers<[1], [0], [0], [1], [0, 0, 1, 1], [], []>} : vector<13x20xf32>, vector<20x40xf32>, vector<13x40xf32> -> vector<13x40xf32>
    %292 = arith.addf %287, %291 : vector<13x40xf32>
    %c7_236 = arith.constant 7 : index
    %c0_237 = arith.constant 0 : index
    %293 = vector.load %arg16[%c7_236, %c0_237] : memref<25x20xf32, #tpu.memory_space<vmem>>, vector<13x20xf32>
    %c5_238 = arith.constant 5 : index
    %c0_239 = arith.constant 0 : index
    %c0_240 = arith.constant 0 : index
    %294 = vector.load %arg6[%c5_238, %c0_239, %c0_240] : memref<9x20x40xf32, #tpu.memory_space<vmem>>, vector<1x20x40xf32>
    %295 = vector.shape_cast %294 : vector<1x20x40xf32> to vector<20x40xf32>
    %cst_241 = arith.constant dense<0.000000e+00> : vector<13x40xf32>
    %296 = tpu.matmul %293, %295, %cst_241 {dimension_numbers = #tpu.dot_dimension_numbers<[1], [0], [0], [1], [0, 0, 1, 1], [], []>} : vector<13x20xf32>, vector<20x40xf32>, vector<13x40xf32> -> vector<13x40xf32>
    %297 = arith.addf %292, %296 : vector<13x40xf32>
    %c10_242 = arith.constant 10 : index
    %c0_243 = arith.constant 0 : index
    %298 = vector.load %arg16[%c10_242, %c0_243] : memref<25x20xf32, #tpu.memory_space<vmem>>, vector<13x20xf32>
    %c6_244 = arith.constant 6 : index
    %c0_245 = arith.constant 0 : index
    %c0_246 = arith.constant 0 : index
    %299 = vector.load %arg6[%c6_244, %c0_245, %c0_246] : memref<9x20x40xf32, #tpu.memory_space<vmem>>, vector<1x20x40xf32>
    %300 = vector.shape_cast %299 : vector<1x20x40xf32> to vector<20x40xf32>
    %cst_247 = arith.constant dense<0.000000e+00> : vector<13x40xf32>
    %301 = tpu.matmul %298, %300, %cst_247 {dimension_numbers = #tpu.dot_dimension_numbers<[1], [0], [0], [1], [0, 0, 1, 1], [], []>} : vector<13x20xf32>, vector<20x40xf32>, vector<13x40xf32> -> vector<13x40xf32>
    %302 = arith.addf %297, %301 : vector<13x40xf32>
    %c11 = arith.constant 11 : index
    %c0_248 = arith.constant 0 : index
    %303 = vector.load %arg16[%c11, %c0_248] : memref<25x20xf32, #tpu.memory_space<vmem>>, vector<13x20xf32>
    %c7_249 = arith.constant 7 : index
    %c0_250 = arith.constant 0 : index
    %c0_251 = arith.constant 0 : index
    %304 = vector.load %arg6[%c7_249, %c0_250, %c0_251] : memref<9x20x40xf32, #tpu.memory_space<vmem>>, vector<1x20x40xf32>
    %305 = vector.shape_cast %304 : vector<1x20x40xf32> to vector<20x40xf32>
    %cst_252 = arith.constant dense<0.000000e+00> : vector<13x40xf32>
    %306 = tpu.matmul %303, %305, %cst_252 {dimension_numbers = #tpu.dot_dimension_numbers<[1], [0], [0], [1], [0, 0, 1, 1], [], []>} : vector<13x20xf32>, vector<20x40xf32>, vector<13x40xf32> -> vector<13x40xf32>
    %307 = arith.addf %302, %306 : vector<13x40xf32>
    %c12 = arith.constant 12 : index
    %c0_253 = arith.constant 0 : index
    %308 = vector.load %arg16[%c12, %c0_253] : memref<25x20xf32, #tpu.memory_space<vmem>>, vector<13x20xf32>
    %c8_254 = arith.constant 8 : index
    %c0_255 = arith.constant 0 : index
    %c0_256 = arith.constant 0 : index
    %309 = vector.load %arg6[%c8_254, %c0_255, %c0_256] : memref<9x20x40xf32, #tpu.memory_space<vmem>>, vector<1x20x40xf32>
    %310 = vector.shape_cast %309 : vector<1x20x40xf32> to vector<20x40xf32>
    %cst_257 = arith.constant dense<0.000000e+00> : vector<13x40xf32>
    %311 = tpu.matmul %308, %310, %cst_257 {dimension_numbers = #tpu.dot_dimension_numbers<[1], [0], [0], [1], [0, 0, 1, 1], [], []>} : vector<13x20xf32>, vector<20x40xf32>, vector<13x40xf32> -> vector<13x40xf32>
    %312 = arith.addf %307, %311 : vector<13x40xf32>
    %c0_258 = arith.constant 0 : index
    %c0_259 = arith.constant 0 : index
    %313 = vector.load %arg7[%c0_258, %c0_259] : memref<1x40xf32, #tpu.memory_space<vmem>>, vector<1x40xf32>
    %314 = vector.broadcast %313 : vector<1x40xf32> to vector<13x40xf32>
    %315 = arith.addf %312, %314 : vector<13x40xf32>
    %cst_260 = arith.constant 0.000000e+00 : f32
    %316 = vector.broadcast %cst_260 : f32 to vector<13x40xf32>
    %317 = arith.maximumf %315, %316 : vector<13x40xf32>
    %318 = vector.extract_strided_slice %317 {offsets = [0, 0], sizes = [1, 40], strides = [1, 1]} : vector<13x40xf32> to vector<1x40xf32>
    %319 = vector.extract_strided_slice %317 {offsets = [1, 0], sizes = [1, 40], strides = [1, 1]} : vector<13x40xf32> to vector<1x40xf32>
    %320 = arith.maximumf %318, %319 : vector<1x40xf32>
    %321 = vector.extract_strided_slice %317 {offsets = [5, 0], sizes = [1, 40], strides = [1, 1]} : vector<13x40xf32> to vector<1x40xf32>
    %322 = vector.extract_strided_slice %317 {offsets = [6, 0], sizes = [1, 40], strides = [1, 1]} : vector<13x40xf32> to vector<1x40xf32>
    %323 = arith.maximumf %321, %322 : vector<1x40xf32>
    %324 = arith.maximumf %320, %323 : vector<1x40xf32>
    %c0_261 = arith.constant 0 : index
    %c0_262 = arith.constant 0 : index
    %325 = vector.load %arg8[%c0_261, %c0_262] : memref<40x32xf32, #tpu.memory_space<vmem>>, vector<40x32xf32>
    %cst_263 = arith.constant dense<0.000000e+00> : vector<1x32xf32>
    %326 = tpu.matmul %324, %325, %cst_263 {dimension_numbers = #tpu.dot_dimension_numbers<[1], [0], [0], [1], [0, 0, 1, 1], [], []>} : vector<1x40xf32>, vector<40x32xf32>, vector<1x32xf32> -> vector<1x32xf32>
    %c0_264 = arith.constant 0 : index
    %c0_265 = arith.constant 0 : index
    %327 = vector.load %arg9[%c0_264, %c0_265] : memref<1x32xf32, #tpu.memory_space<vmem>>, vector<1x32xf32>
    %328 = arith.addf %326, %327 : vector<1x32xf32>
    %c0_266 = arith.constant 0 : index
    %c0_267 = arith.constant 0 : index
    %329 = vector.load %arg10[%c0_266, %c0_267] : memref<32x10xf32, #tpu.memory_space<vmem>>, vector<32x10xf32>
    %cst_268 = arith.constant dense<0.000000e+00> : vector<1x10xf32>
    %330 = tpu.matmul %328, %329, %cst_268 {dimension_numbers = #tpu.dot_dimension_numbers<[1], [0], [0], [1], [0, 0, 1, 1], [], []>} : vector<1x32xf32>, vector<32x10xf32>, vector<1x10xf32> -> vector<1x10xf32>
    %c0_269 = arith.constant 0 : index
    %c0_270 = arith.constant 0 : index
    %331 = vector.load %arg11[%c0_269, %c0_270] : memref<1x10xf32, #tpu.memory_space<vmem>>, vector<1x10xf32>
    %332 = arith.addf %330, %331 : vector<1x10xf32>
    %c0_271 = arith.constant 0 : index
    %c0_272 = arith.constant 0 : index
    %c0_273 = arith.constant 0 : index
    %333 = vector.load %arg12[%c0_271, %c0_272, %c0_273] : memref<1x1x10xf32, #tpu.memory_space<vmem>>, vector<1x1x10xf32>
    %334 = vector.shape_cast %333 : vector<1x1x10xf32> to vector<1x10xf32>
    %335 = vector.shape_cast %332 : vector<1x10xf32> to vector<1x1x10xf32>
    tpu.vector_store %arg12[%c0_271, %c0_272, %c0_273], %335 {strides = array<i32>} : memref<1x1x10xf32, #tpu.memory_space<vmem>>, vector<1x1x10xf32>,
    return
  }
  func.func @transform_0(%arg0: i32) -> (i32, i32, i32) {
    %c0_i32 = arith.constant 0 : i32
    %c0_i32_0 = arith.constant 0 : i32
    %c0_i32_1 = arith.constant 0 : i32
    return %arg0, %c0_i32, %c0_i32_0 : i32, i32, i32
  }
  func.func @transform_1(%arg0: i32) -> (i32, i32) {
    %c0_i32 = arith.constant 0 : i32
    %c0_i32_0 = arith.constant 0 : i32
    %c0_i32_1 = arith.constant 0 : i32
    return %c0_i32, %c0_i32_0 : i32, i32
  }
  func.func @transform_2(%arg0: i32) -> (i32, i32) {
    %c0_i32 = arith.constant 0 : i32
    %c0_i32_0 = arith.constant 0 : i32
    %c0_i32_1 = arith.constant 0 : i32
    return %c0_i32, %c0_i32_0 : i32, i32
  }
  func.func @transform_3(%arg0: i32) -> (i32, i32, i32) {
    %c0_i32 = arith.constant 0 : i32
    %c0_i32_0 = arith.constant 0 : i32
    %c0_i32_1 = arith.constant 0 : i32
    %c0_i32_2 = arith.constant 0 : i32
    return %c0_i32, %c0_i32_0, %c0_i32_1 : i32, i32, i32
  }
  func.func @transform_4(%arg0: i32) -> (i32, i32) {
    %c0_i32 = arith.constant 0 : i32
    %c0_i32_0 = arith.constant 0 : i32
    %c0_i32_1 = arith.constant 0 : i32
    return %c0_i32, %c0_i32_0 : i32, i32
  }
  func.func @transform_5(%arg0: i32) -> (i32, i32, i32) {
    %c0_i32 = arith.constant 0 : i32
    %c0_i32_0 = arith.constant 0 : i32
    %c0_i32_1 = arith.constant 0 : i32
    %c0_i32_2 = arith.constant 0 : i32
    return %c0_i32, %c0_i32_0, %c0_i32_1 : i32, i32, i32
  }
  func.func @transform_6(%arg0: i32) -> (i32, i32) {
    %c0_i32 = arith.constant 0 : i32
    %c0_i32_0 = arith.constant 0 : i32
    %c0_i32_1 = arith.constant 0 : i32
    return %c0_i32, %c0_i32_0 : i32, i32
  }
  func.func @transform_7(%arg0: i32) -> (i32, i32) {
    %c0_i32 = arith.constant 0 : i32
    %c0_i32_0 = arith.constant 0 : i32
    %c0_i32_1 = arith.constant 0 : i32
    return %c0_i32, %c0_i32_0 : i32, i32
  }
  func.func @transform_8(%arg0: i32) -> (i32, i32) {
    %c0_i32 = arith.constant 0 : i32
    %c0_i32_0 = arith.constant 0 : i32
    %c0_i32_1 = arith.constant 0 : i32
    return %c0_i32, %c0_i32_0 : i32, i32
  }
  func.func @transform_9(%arg0: i32) -> (i32, i32) {
    %c0_i32 = arith.constant 0 : i32
    %c0_i32_0 = arith.constant 0 : i32
    %c0_i32_1 = arith.constant 0 : i32
    return %c0_i32, %c0_i32_0 : i32, i32
  }
  func.func @transform_10(%arg0: i32) -> (i32, i32) {
    %c0_i32 = arith.constant 0 : i32
    %c0_i32_0 = arith.constant 0 : i32
    %c0_i32_1 = arith.constant 0 : i32
    return %c0_i32, %c0_i32_0 : i32, i32
  }
  func.func @transform_11(%arg0: i32) -> (i32, i32, i32) {
    %c0_i32 = arith.constant 0 : i32
    %c0_i32_0 = arith.constant 0 : i32
    %c0_i32_1 = arith.constant 0 : i32
    return %arg0, %c0_i32, %c0_i32_0 : i32, i32, i32
  }
}

</mosaic_0001>

<bundles_post_ra>
// kernel: my_network_forward.1
= control target key start
LH: loop header
LB: loop body
LE: loop exit
PB: predicated region body
PF: predicated region fallthrough
CT: control target
= control target key end

     0   :  { %s8020_s0 = inlined_call_operand.vmem [shape: f32[2,1,784], index: 0, kind: input, shape index: {}]   ;;  %s8021_s1 = inlined_call_operand.vmem [shape: f32[10,9], index: 1, kind: input, shape index: {}]   ;;  %s8022_s2 = inlined_call_operand.vmem [shape: f32[10,1], index: 2, kind: input, shape index: {}]   ;;  %s8023_s3 = inlined_call_operand.vmem [shape: f32[9,10,20], index: 3, kind: input, shape index: {}]   ;;  %s8024_s4 = inlined_call_operand.vmem [shape: f32[1,20], index: 4, kind: input, shape index: {}]   ;;  %s8025_s5 = inlined_call_operand.vmem [shape: f32[9,20,40], index: 5, kind: input, shape index: {}]   ;;  %s8026_s6 = inlined_call_operand.vmem [shape: f32[1,40], index: 6, kind: input, shape index: {}]   ;;  %s8027_s7 = inlined_call_operand.vmem [shape: f32[40,32], index: 7, kind: input, shape index: {}]   ;;  %s8028_s8 = inlined_call_operand.vmem [shape: f32[1,32], index: 8, kind: input, shape index: {}]   ;;  %s8029_s9 = inlined_call_operand.vmem [shape: f32[32,10], index: 9, kind: input, shape index: {}]   ;;  %s8030_s10 = inlined_call_operand.vmem [shape: f32[1,10], index: 10, kind: input, shape index: {}]   ;;  %s8031_s11 = inlined_call_operand.hbm [shape: f32[2,1,10], index: 11, kind: output, shape index: {}]  }
   0x1   :  { %8032 = sst [smem:[#allocation9_spill]] %s8020_s0 }
   0x2   :  { %16 = vsyncpa [#allocation7], 0 }
   0x3   :  { %18 = vsyncpa [#allocation7 + $0x1], 0  ;;  %s6360_s17 = smov 0   ;;  %s6362_s18 = smov 0  }
   0x4   :  { %s6364_s19 = smov 0   ;;  %s6366_s20 = smov 0  }
   0x5 LB: > { %s6381_s21 = sadd.s32 4294967295, %s6278_s20   ;;  %s5276_s22 = sadd.s32 4294967294, %s6278_s20   ;;  %s6278_s20 = sphi %s6366_s20, %s8039_s20   ;;  %s6274_s19 = sphi %s6364_s19, %s8038_s19   ;;  %s6270_s18 = sphi %s6362_s18, %s8037_s18   ;;  %s6266_s17 = sphi %s6360_s17, %s8036_s17  }
   0x6   : > { %s6385_s23 = sadd.s32 1, %s6278_s20   ;;  %s267_s24 = sadd.s32 1, %s6274_s19 }
   0x7   : > { %s264_s25 = ssub.s32 %s6278_s20, %s6385_s23  ;;  %p277_p0 = scmp.ne.s32.totalorder %s6274_s19, %s6270_s18 }
   0x8   : > { %p265_p1 = scmp.eq.s32.totalorder %s264_s25, 0  ;;  %p278_p2 = scmp.eq.s32.totalorder %s6381_s21, 1 }
   0x9   : > { %p283_p3 = scmp.ne.s32.totalorder %s6270_s18, %s6266_s17  ;;  %p284_p4 = scmp.eq.s32.totalorder %s5276_s22, 1 }
   0xa   : > { %s6396_s26 = scalar_select %p265_p1, %s6274_s19, %s267_s24  }
   0xb   : > { %p6398_p5 = por %p278_p2, %p277_p0  ;;  %p6402_p6 = por %p284_p4, %p283_p3 }
   0xc   : > { %p5279_p7 = scmp.ge.s32.totalorder %s6278_s20, 1  ;;  %p339_p8 = scmp.lt.s32.totalorder %s6278_s20, 3 }
   0xe   : > { %p340_p9 = pnand %p5279_p7, %p339_p8 }
   0xf   : > { %p377_p10 = scmp.lt.s32.totalorder (!%p340_p9), %s6381_s21, 1  ;;  %s8035_s0 = sld [smem:[#allocation9_spill]] (!%p340_p9) }
  0x10   : > { %343 = sbr.rel (%p340_p9) target bundleno = 1818 (0x71a), region = 64  ;;  %s6289_s13 = smov (!%p340_p9), 127  }
  0x11   : > { %s6292_s16 = smov (!%p340_p9), 99   ;;  %s6293_s22 = smov (!%p340_p9), 98  }
  0x12   : > { %s6295_s25 = smov (!%p340_p9), 71   ;;  %s6296_s29 = smov (!%p340_p9), 70  }
  0x13   : > { %s5522_s30 = sshll.u32 (!%p340_p9), %s6381_s21, 4 }
  0x15   : > { %v382_v0 = vld [vmem:[%s8021_s1] sm:$0xff]  ;;  %v395_v1 = vlaneseq  ;;  %v6280_v2 = vmov 1   ;;  %v6281_v3 = vmov 2   ;;  %v383_v4 = vld [vmem:[%s8021_s1 + $0x8] sm:$0x3]  ;;  %s378_s14 = scalar_select %p377_p10, %s6381_s21, 1 }
  0x16   : > { %6204 = vset.pattern.permute.xlu0 %v6280_v2  ;;  %6205 = vset.pattern.permute.xlu1 %v6281_v3  ;;  %v6282_v9 = vmov 3   ;;  %v6283_v12 = vmov 4   ;;  %v6284_v13 = vmov 5   ;;  %v6285_v14 = vmov 6   ;;  %v1245_v17 = vld [vmem:[%s8022_s2 + $0x8] sm:$0x3] }
  0x17   : > { %450 = vperm.xlu0 %6204, %v382_v0   ;;  %541 = vperm.xlu1 %6205, %v382_v0   ;;  %v6415_v5 = vshrl.u32 %v395_v1, 7  ;;  %s6145_s15 = smul.u32 7, %s378_s14  ;;  %v6286_v15 = vmov 7   ;;  %v6287_v16 = vmov 0   ;;  %v6288_v18 = vmov 8   ;;  %v1244_v26 = vld [vmem:[%s8022_s2] sm:$0xff] }
  0x18   : > { %s6290_s14 = smov 126   ;;  %vm505_vm0 = vcmask 1039360   ;;  %vm596_vm1 = vcmask 1031168   ;;  %vm687_vm2 = vcmask 818176   ;;  %vm778_vm3 = vcmask 809984   ;;  %s6299_s21 = smov [#allocation6]  }
  0x19   : > { %v413_v6 = vsub.s32 4, %v6415_v5  ;;  %v417_v7 = vsub.s32 5, %v6415_v5  ;;  %s6423_s24 = scalar_lea.vmem %s8035_s0, %s6145_s15  ;;  %v409_v20 = vsub.s32 3, %v6415_v5  ;;  %v940_v21 = vsub.s32 6, %v6415_v5  ;;  %s6291_s15 = smov 100  }
  0x1a   : > { %v6426_v8 = vld [vmem:[%s6423_s24] sm:$0x3f]  ;;  %v401_v27 = vsub.s32 1, %v6415_v5  ;;  %v397_v28 = vsub.s32 0, %v6415_v5  ;;  %v405_v50 = vsub.s32 2, %v6415_v5  ;;  %vm869_vm4 = vcmask 801792  }
  0x1b   : > { %454 = vperm.xlu0 %6204, %v383_v4   ;;  %545 = vperm.xlu1 %6205, %v383_v4   ;;  %v6429_v10 = vrot.slane %v6426_v8, %v413_v6  ;;  %v6432_v11 = vrot.slane %v6426_v8, %v417_v7  ;;  %v6438_v19 = vld [vmem:[%s6423_s24] sm:$0x7f]  ;;  %s6294_s24 = smov 72   ;;  %vm1005_vm5 = vcmask 588800   ;;  %vm1106_vm6 = vcmask 580608  }
  0x1c   : > { %v6445_v22 = vrot.slane %v6438_v19, %v409_v20  ;;  %v6448_v23 = vrot.slane %v6438_v19, %v413_v6  ;;  %v6451_v24 = vrot.slane %v6438_v19, %v417_v7  ;;  %v6454_v25 = vrot.slane %v6438_v19, %v940_v21 }
  0x1d   : > { %v6464_v29 = vrot.slane %v6426_v8, %v401_v27  ;;  %v6467_v30 = vrot.slane %v6426_v8, %v397_v28  ;;  %v6529_v54 = vrot.slane %v6426_v8, %v405_v50  ;;  %v917_v63 = vrot.slane %v6438_v19, %v397_v28 }
  0x1e   : > { %v921_v6 = vrot.slane %v6438_v19, %v401_v27  ;;  %vm1207_vm7 = vcmask 572416   ;;  %vm1972_vm8 = vcmask 1041408   ;;  %vm1472_vm9 = vcmask 80896  }
  0x1f   : > { %6206 = vset.pattern.permute.xlu0 %v6282_v9  ;;  %6207 = vset.pattern.permute.xlu1 %v6282_v9  ;;  %vm1587_vm10 = vcmask 77824   ;;  %vm1563_vm11 = vcmask 78848   ;;  %vm4239_vm12 = vcmask 1043456   ;;  %vm4143_vm13 = vcmask 162816  }
  0x20   : > { %632 = vperm.xlu0 %6206, %v382_v0   ;;  %636 = vperm.xlu1 %6207, %v383_v4   ;;  %vm4161_vm14 = vcmask 159744   ;;  %vm6298_vm15 = vmmov 0  }
  0x24   : > { %6208 = vset.pattern.permute.xlu1 %v6283_v12  ;;  %6209 = vset.pattern.permute.xlu0 %v6283_v12  ;;  %v6578_v12 = vrot.slane %v6426_v8, %v409_v20 }
  0x25   : > { %723 = vperm.xlu1 %6208, %v382_v0   ;;  %727 = vperm.xlu0 %6209, %v383_v4  }
  0x29   : > { %6210 = vset.pattern.permute.xlu1 %v6284_v13  ;;  %6211 = vset.pattern.permute.xlu0 %v6285_v14 }
  0x2a   : > { %814 = vperm.xlu1 %6210, %v382_v0   ;;  %906 = vperm.xlu0 %6211, %v382_v0  }
  0x2e   : > { %818 = vperm.xlu1 %6210, %v383_v4   ;;  %6214 = vset.pattern.permute.xlu0 %v6286_v15 }
  0x2f   : > { %1047 = vperm.xlu0 %6214, %v383_v4  }
  0x32   : > { %6212 = vset.pattern.permute.xlu1 %v6285_v14 }
  0x33   : > { %910 = vperm.xlu1 %6212, %v383_v4   ;;  %6216 = vset.pattern.permute.xlu0 %v6287_v16 }
  0x34   : > { %386 = vperm.xlu0 %6216, %v382_v0  }
  0x37   : > { %6213 = vset.pattern.permute.xlu1 %v6286_v15 }
  0x38   : > { %1043 = vperm.xlu1 %6213, %v382_v0   ;;  %1253 = vperm.xlu0 %6216, %v1245_v17  }
  0x3c   : > { %6215 = vset.pattern.permute.xlu1 %v6288_v18 }
  0x3d   : > { %1144 = vperm.xlu1 %6215, %v382_v0  }
  0x41   : > { %1148 = vperm.xlu1 %6215, %v383_v4  }
  0x45   : > { %6217 = vset.pattern.permute.xlu1 %v6287_v16 }
  0x46   : > { %391 = vperm.xlu1 %6217, %v383_v4  }
  0x4a   : > { %1248 = vperm.xlu1 %6217, %v1244_v26  }
  0x92   : > { %v6469_v31 = vpop.permute.xlu0 %450  ;;  %v6477_v34 = vpop.permute.xlu1 %541 }
  0x93   : > { %v458_v32 = vmul.f32 %v6469_v31, %v6464_v29  ;;  %v457_v33 = vmul.f32 %v6469_v31, %v6467_v30  ;;  %v549_v38 = vmul.f32 %v6477_v34, %v6464_v29  ;;  %v548_v39 = vmul.f32 %v6477_v34, %v6467_v30 }
  0x94   : > { %v459_v56 = vmul.f32 %v6469_v31, %v6529_v54  ;;  %v550_v2 = vmul.f32 %v6477_v34, %v6529_v54  ;;  %v460_v14 = vmul.f32 %v6469_v31, %v6578_v12 }
  0x95   : > { %483 = vrot.lane.b32.xlu0 %v458_v32, %s6289_s13  ;;  %481 = vrot.lane.b32.xlu1 %v457_v33, %s6289_s13  ;;  %v551_v32 = vmul.f32 %v6477_v34, %v6578_v12 }
  0x96   : > { %v6479_v35 = vpop.permute.xlu0 %454  ;;  %v6491_v40 = vpop.permute.xlu1 %545 }
  0x97   : > { %v464_v36 = vmul.f32 %v6479_v35, %v6464_v29  ;;  %v463_v37 = vmul.f32 %v6479_v35, %v6467_v30  ;;  %v555_v42 = vmul.f32 %v6491_v40, %v6464_v29  ;;  %v554_v43 = vmul.f32 %v6491_v40, %v6467_v30 }
  0x98   : > { %v465_v60 = vmul.f32 %v6479_v35, %v6529_v54  ;;  %v556_v7 = vmul.f32 %v6491_v40, %v6529_v54  ;;  %v466_v28 = vmul.f32 %v6479_v35, %v6578_v12 }
  0x99   : > { %495 = vrot.lane.b32.xlu0 %v464_v36, %s6289_s13  ;;  %493 = vrot.lane.b32.xlu1 %v463_v37, %s6289_s13 }
  0x9b   : > { %v6495_v41 = vpop.permute.xlu0 %632  ;;  %v6501_v44 = vpop.permute.xlu1 %636 }
  0x9c   : > { %v640_v45 = vmul.f32 %v6495_v41, %v6464_v29  ;;  %v639_v46 = vmul.f32 %v6495_v41, %v6467_v30  ;;  %v646_v47 = vmul.f32 %v6501_v44, %v6464_v29  ;;  %v645_v48 = vmul.f32 %v6501_v44, %v6467_v30 }
  0x9d   : > { %574 = vrot.lane.b32.xlu0 %v549_v38, %s6290_s14  ;;  %572 = vrot.lane.b32.xlu1 %v548_v39, %s6290_s14  ;;  %v641_v15 = vmul.f32 %v6495_v41, %v6529_v54  ;;  %v647_v21 = vmul.f32 %v6501_v44, %v6529_v54  ;;  %v648_v5 = vmul.f32 %v6501_v44, %v6578_v12 }
  0xa0   : > { %v6515_v49 = vpop.permute.xlu1 %723  ;;  %v6524_v53 = vpop.permute.xlu0 %727 }
  0xa1   : > { %586 = vrot.lane.b32.xlu0 %v555_v42, %s6290_s14  ;;  %584 = vrot.lane.b32.xlu1 %v554_v43, %s6290_s14  ;;  %v731_v51 = vmul.f32 %v6515_v49, %v6464_v29  ;;  %v730_v52 = vmul.f32 %v6515_v49, %v6467_v30  ;;  %v736_v55 = vmul.f32 %v6524_v53, %v6467_v30 }
  0xa2   : > { %v737_v59 = vmul.f32 %v6524_v53, %v6464_v29  ;;  %v732_v26 = vmul.f32 %v6515_v49, %v6529_v54  ;;  %v738_v43 = vmul.f32 %v6524_v53, %v6529_v54 }
  0xa5   : > { %665 = vrot.lane.b32.xlu0 %v640_v45, %s6291_s15  ;;  %663 = vrot.lane.b32.xlu1 %v639_v46, %s6291_s15  ;;  %v6537_v57 = vpop.permute.xlu1 %814  ;;  %v6556_v0 = vpop.permute.xlu0 %906  ;;  %v642_v45 = vmul.f32 %v6495_v41, %v6578_v12  ;;  %v557_v46 = vmul.f32 %v6491_v40, %v6578_v12 }
  0xa6   : > { %v821_v58 = vmul.f32 %v6537_v57, %v6467_v30  ;;  %v822_v61 = vmul.f32 %v6537_v57, %v6464_v29  ;;  %v949_v3 = vmul.f32 %v917_v63, %v6556_v0  ;;  %v950_v9 = vmul.f32 %v921_v6, %v6556_v0 }
  0xa7   : > { %v823_v42 = vmul.f32 %v6537_v57, %v6529_v54 }
  0xa9   : > { %677 = vrot.lane.b32.xlu0 %v646_v47, %s6291_s15  ;;  %675 = vrot.lane.b32.xlu1 %v645_v48, %s6291_s15  ;;  %v6551_v62 = vpop.permute.xlu1 %818 }
  0xaa   : > { %v827_v1 = vmul.f32 %v6551_v62, %v6467_v30  ;;  %v828_v4 = vmul.f32 %v6551_v62, %v6464_v29  ;;  %v6606_v27 = vpop.permute.xlu0 %1047 }
  0xab   : > { %v1057_v33 = vmul.f32 %v6606_v27, %v917_v63  ;;  %v1058_v36 = vmul.f32 %v6606_v27, %v921_v6 }
  0xad   : > { %756 = vrot.lane.b32.xlu0 %v731_v51, %s6292_s16  ;;  %754 = vrot.lane.b32.xlu1 %v730_v52, %s6292_s16  ;;  %v925_v52 = vrot.slane %v6438_v19, %v405_v50 }
  0xae   : > { %v6580_v13 = vpop.permute.xlu1 %910 }
  0xaf   : > { %v957_v16 = vmul.f32 %v921_v6, %v6580_v13  ;;  %v956_v8 = vmul.f32 %v917_v63, %v6580_v13  ;;  %v958_v50 = vmul.f32 %v925_v52, %v6580_v13 }
  0xb1   : > { %766 = vrot.lane.b32.xlu0 %v736_v55, %s6292_s16  ;;  %485 = vrot.lane.b32.xlu1 %v459_v56, %s6289_s13  ;;  %v951_v55 = vmul.f32 %v925_v52, %v6556_v0  ;;  %v829_v56 = vmul.f32 %v6551_v62, %v6529_v54 }
  0xb3   : > { %v6592_v17 = vpop.permute.xlu1 %1043 }
  0xb4   : > { %v1051_v18 = vmul.f32 %v6592_v17, %v921_v6  ;;  %v1050_v20 = vmul.f32 %v6592_v17, %v917_v63  ;;  %v1052_v19 = vmul.f32 %v6592_v17, %v925_v52 }
  0xb5   : > { %845 = vrot.lane.b32.xlu0 %v821_v58, %s6293_s22  ;;  %768 = vrot.lane.b32.xlu1 %v737_v59, %s6292_s16  ;;  %v733_v58 = vmul.f32 %v6515_v49, %v6578_v12  ;;  %v824_v59 = vmul.f32 %v6537_v57, %v6578_v12 }
  0xb8   : > { %v6616_v37 = vpop.permute.xlu1 %1144 }
  0xb9   : > { %497 = vrot.lane.b32.xlu0 %v465_v60, %s6289_s13  ;;  %847 = vrot.lane.b32.xlu1 %v822_v61, %s6293_s22  ;;  %v1151_v38 = vmul.f32 %v6616_v37, %v917_v63  ;;  %v1152_v39 = vmul.f32 %v6616_v37, %v921_v6  ;;  %v739_v60 = vmul.f32 %v6524_v53, %v6578_v12 }
  0xbc   : > { %v6634_v47 = vpop.permute.xlu1 %1148 }
  0xbd   : > { %857 = vrot.lane.b32.xlu0 %v827_v1, %s6293_s22  ;;  %576 = vrot.lane.b32.xlu1 %v550_v2, %s6290_s14  ;;  %v1159_v48 = vmul.f32 %v6634_v47, %v921_v6  ;;  %v1158_v51 = vmul.f32 %v6634_v47, %v917_v63  ;;  %v6666_v63 = vpop.permute.xlu0 %386  ;;  %v1153_v1 = vmul.f32 %v6616_v37, %v925_v52 }
  0xbe   : > { %v1059_v2 = vmul.f32 %v6606_v27, %v925_v52  ;;  %v830_v6 = vmul.f32 %v6551_v62, %v6578_v12 }
  0xc1   : > { %977 = vrot.lane.b32.xlu0 %v949_v3, %s6294_s24  ;;  %859 = vrot.lane.b32.xlu1 %v828_v4, %s6293_s22  ;;  %v6664_v61 = vpop.permute.xlu1 %391  ;;  %v6676_v4 = vpop.permute.xlu0 %1253 }
  0xc5   : > { %588 = vrot.lane.b32.xlu0 %v556_v7, %s6290_s14  ;;  %979 = vrot.lane.b32.xlu1 %v950_v9, %s6294_s24  ;;  %v6674_v3 = vpop.permute.xlu1 %1248  ;;  %v461_v7 = vmul.f32 %v6469_v31, %v6429_v10 }
  0xc9   : > { %487 = vrot.lane.b32.xlu0 %v460_v14, %s6289_s13  ;;  %667 = vrot.lane.b32.xlu1 %v641_v15, %s6291_s15  ;;  %v425_v15 = vmul.f32 %v6467_v30, %v6666_v63 }
  0xcd   : > { %993 = vrot.lane.b32.xlu0 %v957_v16, %s6294_s24  ;;  %991 = vrot.lane.b32.xlu1 %v956_v8, %s6294_s24  ;;  %v1160_v16 = vmul.f32 %v6634_v47, %v925_v52  ;;  %v952_v8 = vmul.f32 %v6445_v22, %v6556_v0  ;;  %v643_v52 = vmul.f32 %v6495_v41, %v6429_v10 }
  0xd1   : > { %1080 = vrot.lane.b32.xlu0 %v1051_v18, %s6295_s25  ;;  %1078 = vrot.lane.b32.xlu1 %v1050_v20, %s6295_s25 }
  0xd5   : > { %679 = vrot.lane.b32.xlu0 %v647_v21, %s6291_s15  ;;  %758 = vrot.lane.b32.xlu1 %v732_v26, %s6292_s16 }
  0xd9   : > { %499 = vrot.lane.b32.xlu0 %v466_v28, %s6289_s13  ;;  %578 = vrot.lane.b32.xlu1 %v551_v32, %s6290_s14  ;;  %v431_v28 = vmul.f32 %v6467_v30, %v6664_v61  ;;  %v552_v32 = vmul.f32 %v6477_v34, %v6429_v10  ;;  %v1053_v30 = vmul.f32 %v6592_v17, %v6445_v22 }
  0xdd   : > { %1092 = vrot.lane.b32.xlu0 %v1057_v33, %s6295_s25  ;;  %1094 = vrot.lane.b32.xlu1 %v1058_v36, %s6295_s25  ;;  %v467_v33 = vmul.f32 %v6479_v35, %v6429_v10 }
  0xe1   : > { %1179 = vrot.lane.b32.xlu0 %v1151_v38, %s6296_s29  ;;  %1181 = vrot.lane.b32.xlu1 %v1152_v39, %s6296_s29 }
  0xe5   : > { %849 = vrot.lane.b32.xlu0 %v823_v42, %s6293_s22  ;;  %770 = vrot.lane.b32.xlu1 %v738_v43, %s6292_s16  ;;  %v959_v43 = vmul.f32 %v6445_v22, %v6580_v13 }
  0xe9   : > { %669 = vrot.lane.b32.xlu0 %v642_v45, %s6291_s15  ;;  %590 = vrot.lane.b32.xlu1 %v557_v46, %s6290_s14 }
  0xed   : > { %1195 = vrot.lane.b32.xlu0 %v1159_v48, %s6296_s29  ;;  %1193 = vrot.lane.b32.xlu1 %v1158_v51, %s6296_s29 }
  0xf1   : > { %981 = vrot.lane.b32.xlu0 %v951_v55, %s6294_s24  ;;  %861 = vrot.lane.b32.xlu1 %v829_v56, %s6293_s22  ;;  %v558_v55 = vmul.f32 %v6491_v40, %v6429_v10 }
  0xf5   : > { %760 = vrot.lane.b32.xlu0 %v733_v58, %s6292_s16  ;;  %681 = vrot.lane.b32.xlu1 %v648_v5, %s6291_s15 }
  0xf9   : > { %1082 = vrot.lane.b32.xlu0 %v1052_v19, %s6295_s25  ;;  %995 = vrot.lane.b32.xlu1 %v958_v50, %s6294_s24  ;;  %v1154_v50 = vmul.f32 %v6616_v37, %v6445_v22 }
  0xfd   : > { %851 = vrot.lane.b32.xlu0 %v824_v59, %s6293_s22  ;;  %772 = vrot.lane.b32.xlu1 %v739_v60, %s6292_s16  ;;  %v1060_v59 = vmul.f32 %v6606_v27, %v6445_v22 }
 0x101   : > { %1183 = vrot.lane.b32.xlu0 %v1153_v1, %s6296_s29  ;;  %1096 = vrot.lane.b32.xlu1 %v1059_v2, %s6295_s25 }
 0x105   : > { %863 = vrot.lane.b32.xlu0 %v830_v6, %s6293_s22  ;;  %489 = vrot.lane.b32.xlu1 %v461_v7, %s6289_s13  ;;  %v734_v7 = vmul.f32 %v6515_v49, %v6429_v10 }
 0x107   : > { %v6684_v9 = vpop.permute.xlu0 %483  ;;  %v482_v14 = vpop.permute.xlu1 %481 }
 0x108   : > { %v506_v18 = vsel %vm505_vm0, %v482_v14, %v6684_v9  ;;  %v649_v14 = vmul.f32 %v6501_v44, %v6429_v10 }
 0x109   : > { %v528_v20 = vadd.f32 %v506_v18, %v425_v15  ;;  %1197 = vrot.lane.b32.xlu0 %v1160_v16, %s6296_s29  ;;  %983 = vrot.lane.b32.xlu1 %v952_v8, %s6294_s24 }
 0x10b   : > { %v6695_v21 = vpop.permute.xlu0 %495  ;;  %v494_v26 = vpop.permute.xlu1 %493 }
 0x10c   : > { %v511_v36 = vsel %vm505_vm0, %v494_v26, %v6695_v21  ;;  %v1161_v26 = vmul.f32 %v6634_v47, %v6445_v22 }
 0x10d   : > { %v534_v38 = vadd.f32 %v511_v36, %v431_v28  ;;  %580 = vrot.lane.b32.xlu0 %v552_v32, %s6290_s14  ;;  %501 = vrot.lane.b32.xlu1 %v467_v33, %s6289_s13  ;;  %v426_v36 = vmul.f32 %v6464_v29, %v6666_v63 }
 0x10f   : > { %v6707_v39 = vpop.permute.xlu0 %574  ;;  %v573_v42 = vpop.permute.xlu1 %572 }
 0x110   : > { %v597_v45 = vsel %vm596_vm1, %v573_v42, %v6707_v39  ;;  %v831_v42 = vmul.f32 %v6551_v62, %v6429_v10 }
 0x111   : > { %v619_v46 = vadd.f32 %v597_v45, %v528_v20  ;;  %1084 = vrot.lane.b32.xlu0 %v1053_v30, %s6295_s25  ;;  %997 = vrot.lane.b32.xlu1 %v959_v43, %s6294_s24  ;;  %v740_v20 = vmul.f32 %v6524_v53, %v6429_v10  ;;  %v825_v30 = vmul.f32 %v6537_v57, %v6429_v10 }
 0x113   : > { %v6717_v48 = vpop.permute.xlu0 %586  ;;  %v585_v51 = vpop.permute.xlu1 %584 }
 0x114   : > { %v602_v56 = vsel %vm596_vm1, %v585_v51, %v6717_v48  ;;  %v462_v51 = vmul.f32 %v6469_v31, %v6432_v11  ;;  %v1054_v31 = vmul.f32 %v6592_v17, %v6448_v23 }
 0x115   : > { %v625_v58 = vadd.f32 %v602_v56, %v534_v38  ;;  %671 = vrot.lane.b32.xlu0 %v643_v52, %s6291_s15  ;;  %592 = vrot.lane.b32.xlu1 %v558_v55, %s6290_s14  ;;  %v953_v52 = vmul.f32 %v6448_v23, %v6556_v0 }
 0x117   : > { %v6727_v5 = vpop.permute.xlu0 %665  ;;  %v664_v19 = vpop.permute.xlu1 %663 }
 0x118   : > { %v688_v60 = vsel %vm687_vm2, %v664_v19, %v6727_v5 }
 0x119   : > { %v710_v1 = vadd.f32 %v688_v60, %v619_v46  ;;  %1185 = vrot.lane.b32.xlu0 %v1154_v50, %s6296_s29  ;;  %1098 = vrot.lane.b32.xlu1 %v1060_v59, %s6295_s25  ;;  %v960_v50 = vmul.f32 %v6448_v23, %v6580_v13 }
 0x11b   : > { %v6737_v2 = vpop.permute.xlu0 %677  ;;  %v676_v6 = vpop.permute.xlu1 %675 }
 0x11c   : > { %v693_v15 = vsel %vm687_vm2, %v676_v6, %v6737_v2 }
 0x11d   : > { %v716_v16 = vadd.f32 %v693_v15, %v625_v58  ;;  %762 = vrot.lane.b32.xlu0 %v734_v7, %s6292_s16  ;;  %683 = vrot.lane.b32.xlu1 %v649_v14, %s6291_s15  ;;  %v553_v14 = vmul.f32 %v6477_v34, %v6432_v11  ;;  %v468_v15 = vmul.f32 %v6479_v35, %v6432_v11 }
 0x11e   : > { %v1061_v34 = vmul.f32 %v6606_v27, %v6448_v23 }
 0x11f   : > { %v6747_v8 = vpop.permute.xlu0 %756  ;;  %v755_v18 = vpop.permute.xlu1 %754 }
 0x120   : > { %v779_v28 = vsel %vm778_vm3, %v755_v18, %v6747_v8 }
 0x121   : > { %v801_v32 = vadd.f32 %v779_v28, %v710_v1  ;;  %774 = vrot.lane.b32.xlu0 %v740_v20, %s6292_s16  ;;  %1199 = vrot.lane.b32.xlu1 %v1161_v26, %s6296_s29  ;;  %v1155_v26 = vmul.f32 %v6616_v37, %v6448_v23 }
 0x123   : > { %v767_v33 = vpop.permute.xlu0 %766  ;;  %v486_v38 = vpop.permute.xlu1 %485 }
 0x124   : > { %v507_v22 = vsel %vm505_vm0, %v6684_v9, %v486_v38  ;;  %v432_v9 = vmul.f32 %v6464_v29, %v6664_v61 }
 0x125   : > { %v529_v43 = vadd.f32 %v507_v22, %v426_v36  ;;  %865 = vrot.lane.b32.xlu0 %v831_v42, %s6293_s22  ;;  %853 = vrot.lane.b32.xlu1 %v825_v30, %s6293_s22  ;;  %v559_v36 = vmul.f32 %v6491_v40, %v6432_v11  ;;  %v427_v22 = vmul.f32 %v6529_v54, %v6666_v63 }
 0x126   : > { %v1162_v40 = vmul.f32 %v6634_v47, %v6448_v23  ;;  %v735_v23 = vmul.f32 %v6515_v49, %v6432_v11  ;;  %v961_v49 = vmul.f32 %v6451_v24, %v6580_v13 }
 0x127   : > { %v846_v45 = vpop.permute.xlu0 %845  ;;  %v6767_v46 = vpop.permute.xlu1 %768 }
 0x128   : > { %v784_v55 = vsel %vm778_vm3, %v767_v33, %v6767_v46  ;;  %v644_v33 = vmul.f32 %v6495_v41, %v6432_v11  ;;  %v650_v41 = vmul.f32 %v6501_v44, %v6432_v11  ;;  %v741_v44 = vmul.f32 %v6524_v53, %v6432_v11 }
 0x129   : > { %v807_v56 = vadd.f32 %v784_v55, %v716_v16  ;;  %491 = vrot.lane.b32.xlu0 %v462_v51, %s6289_s13  ;;  %985 = vrot.lane.b32.xlu1 %v953_v52, %s6294_s24 }
 0x12b   : > { %v6779_v58 = vpop.permute.xlu0 %497  ;;  %v6781_v19 = vpop.permute.xlu1 %847 }
 0x12c   : > { %v512_v59 = vsel %vm505_vm0, %v6695_v21, %v6779_v58  ;;  %v870_v60 = vsel %vm869_vm4, %v846_v45, %v6781_v19 }
 0x12d   : > { %v535_v1 = vadd.f32 %v512_v59, %v432_v9  ;;  %v6792_v6 = vadd.f32 %v870_v60, %v801_v32  ;;  %1086 = vrot.lane.b32.xlu0 %v1054_v31, %s6295_s25  ;;  %999 = vrot.lane.b32.xlu1 %v960_v50, %s6294_s24  ;;  %v832_v31 = vmul.f32 %v6551_v62, %v6432_v11 }
 0x12e   : > { %v826_v50 = vmul.f32 %v6537_v57, %v6432_v11  ;;  %v954_v60 = vmul.f32 %v6451_v24, %v6556_v0 }
 0x12f   : > { %v858_v29 = vpop.permute.xlu0 %857  ;;  %v6796_v7 = vpop.permute.xlu1 %576 }
 0x130   : > { %v598_v21 = vsel %vm596_vm1, %v6707_v39, %v6796_v7 }
 0x131   : > { %v620_v16 = vadd.f32 %v598_v21, %v529_v43  ;;  %582 = vrot.lane.b32.xlu0 %v553_v14, %s6290_s14  ;;  %503 = vrot.lane.b32.xlu1 %v468_v15, %s6289_s13  ;;  %v433_v14 = vmul.f32 %v6529_v54, %v6664_v61 }
 0x133   : > { %v6807_v18 = vpop.permute.xlu0 %977  ;;  %v6809_v20 = vpop.permute.xlu1 %859 }
 0x134   : > { %v875_v35 = vsel %vm869_vm4, %v858_v29, %v6809_v20 }
 0x135   : > { %v6817_v28 = vadd.f32 %v875_v35, %v807_v56  ;;  %1187 = vrot.lane.b32.xlu0 %v1155_v26, %s6296_s29  ;;  %1100 = vrot.lane.b32.xlu1 %v1061_v34, %s6295_s25 }
 0x137   : > { %v6821_v39 = vpop.permute.xlu0 %588  ;;  %v6823_v32 = vpop.permute.xlu1 %979 }
 0x138   : > { %v603_v42 = vsel %vm596_vm1, %v6717_v48, %v6821_v39 }
 0x139   : > { %v626_v30 = vadd.f32 %v603_v42, %v535_v1  ;;  %673 = vrot.lane.b32.xlu0 %v644_v33, %s6291_s15  ;;  %594 = vrot.lane.b32.xlu1 %v559_v36, %s6290_s14  ;;  %v1163_v36 = vmul.f32 %v6634_v47, %v6451_v24  ;;  %v1156_v42 = vmul.f32 %v6616_v37, %v6451_v24  ;;  %s7985_s14 = scalar_lea.hbm %s8031_s11, %s5522_s30 }
 0x13b   : > { %v6836_v43 = vpop.permute.xlu0 %487  ;;  %v668_v45 = vpop.permute.xlu1 %667 }
 0x13c   : > { %v508_v48 = vsel %vm505_vm0, %v486_v38, %v6836_v43  ;;  %v689_v51 = vsel %vm687_vm2, %v6727_v5, %v668_v45 }
 0x13d   : > { %v530_v52 = vadd.f32 %v508_v48, %v427_v22  ;;  %v711_v55 = vadd.f32 %v689_v51, %v620_v16  ;;  %685 = vrot.lane.b32.xlu0 %v650_v41, %s6291_s15  ;;  %1201 = vrot.lane.b32.xlu1 %v1162_v40, %s6296_s29  ;;  %v1062_v16 = vmul.f32 %v6606_v27, %v6451_v24 }
 0x13f   : > { %v6848_v56 = vpop.permute.xlu0 %993  ;;  %v6850_v9 = vpop.permute.xlu1 %991 }
 0x141   : > { %776 = vrot.lane.b32.xlu0 %v741_v44, %s6292_s16  ;;  %764 = vrot.lane.b32.xlu1 %v735_v23, %s6292_s16  ;;  %s375_s16 = sand.u32 1, %s6270_s18  }
 0x142   : > { %s5209_s15 = scalar_lea.sflag [#allocation7], %s375_s16 }
 0x143   : > { %v6858_v5 = vpop.permute.xlu0 %1080  ;;  %v1079_v38 = vpop.permute.xlu1 %1078 }
 0x145   : > { %867 = vrot.lane.b32.xlu0 %v832_v31, %s6293_s22  ;;  %855 = vrot.lane.b32.xlu1 %v826_v50, %s6293_s22  ;;  %s6222_s22 = sshll.u32 %s6299_s21, 4  ;;  %s6223_s22 = int_to_ptr.vmem [resolvable:$false] %s6222_s22 }
 0x147   : > { %v680_v53 = vpop.permute.xlu0 %679  ;;  %v759_v59 = vpop.permute.xlu1 %758 }
 0x148   : > { %v694_v1 = vsel %vm687_vm2, %v6737_v2, %v680_v53  ;;  %v780_v62 = vsel %vm778_vm3, %v6747_v8, %v759_v59  ;;  %v1055_v2 = vmul.f32 %v6592_v17, %v6451_v24 }
 0x149   : > { %v717_v29 = vadd.f32 %v694_v1, %v626_v30  ;;  %v802_v57 = vadd.f32 %v780_v62, %v711_v55  ;;  %1001 = vrot.lane.b32.xlu0 %v961_v49, %s6294_s24  ;;  %987 = vrot.lane.b32.xlu1 %v954_v60, %s6294_s24 }
 0x14b   : > { %v6878_v15 = vpop.permute.xlu0 %499  ;;  %v6880_v21 = vpop.permute.xlu1 %578 }
 0x14c   : > { %v513_v8 = vsel %vm505_vm0, %v6779_v58, %v6878_v15  ;;  %v599_v26 = vsel %vm596_vm1, %v6796_v7, %v6880_v21 }
 0x14d   : > { %v536_v34 = vadd.f32 %v513_v8, %v433_v14  ;;  %v621_v54 = vadd.f32 %v599_v26, %v530_v52  ;;  %1102 = vrot.lane.b32.xlu0 %v1062_v16, %s6295_s25  ;;  %1088 = vrot.lane.b32.xlu1 %v1055_v2, %s6295_s25  ;;  %v1107_v14 = vsel %vm1106_vm6, %v1079_v38, %v6858_v5 }
 0x14f   : > { %v1093_v35 = vpop.permute.xlu0 %1092  ;;  %v6894_v33 = vpop.permute.xlu1 %1094 }
 0x151   : > { %1203 = vrot.lane.b32.xlu0 %v1163_v36, %s6296_s29  ;;  %1189 = vrot.lane.b32.xlu1 %v1156_v42, %s6296_s29 }
 0x153   : > { %v1180_v58 = vpop.permute.xlu0 %1179  ;;  %v1182_v7 = vpop.permute.xlu1 %1181 }
 0x157   : > { %v850_v30 = vpop.permute.xlu0 %849  ;;  %v771_v22 = vpop.permute.xlu1 %770 }
 0x158   : > { %v785_v41 = vsel %vm778_vm3, %v6767_v46, %v771_v22 }
 0x159   : > { %v808_v40 = vadd.f32 %v785_v41, %v717_v29 }
 0x15b   : > { %v6904_v48 = vpop.permute.xlu0 %669  ;;  %v6906_v51 = vpop.permute.xlu1 %590 }
 0x15c   : > { %v690_v52 = vsel %vm687_vm2, %v668_v45, %v6904_v48  ;;  %v604_v24 = vsel %vm596_vm1, %v6821_v39, %v6906_v51  ;;  %v1006_v45 = vsel %vm1005_vm5, %v6807_v18, %v6823_v32  ;;  %v1208_v18 = vsel %vm1207_vm7, %v1180_v58, %v1182_v7 }
 0x15d   : > { %v712_v55 = vadd.f32 %v690_v52, %v621_v54  ;;  %v627_v44 = vadd.f32 %v604_v24, %v536_v34  ;;  %v1030_v16 = vadd.f32 %v1006_v45, %v6792_v6  ;;  %v1113_v6 = vsel %vm1106_vm6, %v1093_v35, %v6894_v33 }
 0x15f   : > { %v6913_v23 = vpop.permute.xlu0 %1195  ;;  %v1194_v31 = vpop.permute.xlu1 %1193  ;;  %v1131_v26 = vadd.f32 %v1107_v14, %v1030_v16  ;;  %v428_v16 = vmul.f32 %v6578_v12, %v6666_v63 }
 0x160   : > { %v1214_v35 = vsel %vm1207_vm7, %v1194_v31, %v6913_v23 }
 0x161   : > { %v1232_v34 = vadd.f32 %v1208_v18, %v1131_v26 }
 0x163   : > { %v6915_v50 = vpop.permute.xlu0 %981  ;;  %v862_v46 = vpop.permute.xlu1 %861 }
 0x164   : > { %v1007_v38 = vsel %vm1005_vm5, %v6823_v32, %v6915_v50 }
 0x167   : > { %v6917_v49 = vpop.permute.xlu0 %760  ;;  %v6919_v60 = vpop.permute.xlu1 %681 }
 0x168   : > { %v781_v39 = vsel %vm778_vm3, %v759_v59, %v6917_v49  ;;  %v695_v1 = vsel %vm687_vm2, %v680_v53, %v6919_v60  ;;  %v871_v59 = vsel %vm869_vm4, %v6781_v19, %v850_v30  ;;  %v1012_v53 = vsel %vm1005_vm5, %v6850_v9, %v6848_v56 }
 0x169   : > { %v803_v62 = vadd.f32 %v781_v39, %v712_v55  ;;  %v718_v29 = vadd.f32 %v695_v1, %v627_v44  ;;  %v893_v54 = vadd.f32 %v871_v59, %v802_v57  ;;  %v1036_v19 = vadd.f32 %v1012_v53, %v6817_v28 }
 0x16a   : > { %v1256_v55 = vadd.f32 %v6674_v3, %v1232_v34 }
 0x16b   : > { %v6931_v2 = vpop.permute.xlu0 %1082  ;;  %v6933_v8 = vpop.permute.xlu1 %995  ;;  %v1031_v57 = vadd.f32 %v1007_v38, %v893_v54  ;;  %v1137_v24 = vadd.f32 %v1113_v6, %v1036_v19 }
 0x16c   : > { %v1108_v9 = vsel %vm1106_vm6, %v6858_v5, %v6931_v2  ;;  %v1013_v31 = vsel %vm1005_vm5, %v6848_v56, %v6933_v8  ;;  %v1268_v1 = vmax.f32 %v1256_v55, 0.0 }
 0x16d   : > { %v1132_v28 = vadd.f32 %v1108_v9, %v1031_v57  ;;  %v1238_v5 = vadd.f32 %v1214_v35, %v1137_v24  ;;  %v434_v35 = vmul.f32 %v6578_v12, %v6664_v61 }
 0x16f   : > { %v6946_v36 = vpop.permute.xlu0 %851  ;;  %v6948_v42 = vpop.permute.xlu1 %772  ;;  %v1262_v59 = vadd.f32 %v6676_v4, %v1238_v5 }
 0x170   : > { %v872_v58 = vsel %vm869_vm4, %v850_v30, %v6946_v36  ;;  %v786_v32 = vsel %vm778_vm3, %v771_v22, %v6948_v42  ;;  %v876_v30 = vsel %vm869_vm4, %v6809_v20, %v862_v46 }
 0x171   : > { %v894_v41 = vadd.f32 %v872_v58, %v803_v62  ;;  %v809_v52 = vadd.f32 %v786_v32, %v718_v29  ;;  %v899_v62 = vadd.f32 %v876_v30, %v808_v40  ;;  %v1274_v19 = vmax.f32 %v1262_v59, 0.0 }
 0x173   : > { %v1184_v44 = vpop.permute.xlu0 %1183  ;;  %v6961_v45 = vpop.permute.xlu1 %1096  ;;  %v1037_v40 = vadd.f32 %v1013_v31, %v899_v62 }
 0x174   : > { %v1209_v39 = vsel %vm1207_vm7, %v1182_v7, %v1184_v44  ;;  %v1114_v20 = vsel %vm1106_vm6, %v6894_v33, %v6961_v45 }
 0x175   : > { %v1233_v22 = vadd.f32 %v1209_v39, %v1132_v28  ;;  %v1138_v6 = vadd.f32 %v1114_v20, %v1037_v40 }
 0x177   : > { %v1257_v29 = vadd.f32 %v6674_v3, %v1233_v22  ;;  %v6970_v14 = vpop.permute.xlu0 %863  ;;  %v490_v18 = vpop.permute.xlu1 %489 }
 0x178   : > { %v877_v7 = vsel %vm869_vm4, %v862_v46, %v6970_v14  ;;  %v509_v56 = vsel %vm505_vm0, %v6836_v43, %v490_v18 }
 0x179   : > { %v1269_v53 = vmax.f32 %v1257_v29, 0.0  ;;  %v900_v26 = vadd.f32 %v877_v7, %v809_v52  ;;  %v531_v38 = vadd.f32 %v509_v56, %v428_v16 }
 0x17a   : > { %1280 = vxpose.xlu1.b32.start [1/2] (short) %v1268_v1, 128 }
 0x17b   : > { %v6982_v34 = vpop.permute.xlu0 %1197  ;;  %1312 = vxpose.xlu0.b32.start [1/2] (short) %v1269_v53, 128  ;;  %v6984_v54 = vpop.permute.xlu1 %983 }
 0x17c   : > { %v1215_v33 = vsel %vm1207_vm7, %v6913_v23, %v6982_v34  ;;  %v1008_v43 = vsel %vm1005_vm5, %v6915_v50, %v6984_v54 }
 0x17d   : > { %v1239_v46 = vadd.f32 %v1215_v33, %v1138_v6  ;;  %v1032_v9 = vadd.f32 %v1008_v43, %v894_v41 }
 0x17e   : > { %1281 = vxpose.xlu1.b32.end [2/2] (short) %v1274_v19, 128 }
 0x17f   : > { %v1263_v58 = vadd.f32 %v6676_v4, %v1239_v46  ;;  %v581_v32 = vpop.permute.xlu0 %580  ;;  %v502_v57 = vpop.permute.xlu1 %501 }
 0x180   : > { %v600_v52 = vsel %vm596_vm1, %v6880_v21, %v581_v32  ;;  %v514_v23 = vsel %vm505_vm0, %v6878_v15, %v502_v57 }
 0x181   : > { %v1275_v24 = vmax.f32 %v1263_v58, 0.0  ;;  %v622_v55 = vadd.f32 %v600_v52, %v531_v38  ;;  %v537_v28 = vadd.f32 %v514_v23, %v434_v35 }
 0x183   : > { %v1085_v50 = vpop.permute.xlu0 %1084  ;;  %1313 = vxpose.xlu0.b32.end [2/2] (short) %v1275_v24, 128  ;;  %v998_v41 = vpop.permute.xlu1 %997 }
 0x184   : > { %v1109_v5 = vsel %vm1106_vm6, %v6931_v2, %v1085_v50  ;;  %v1014_v30 = vsel %vm1005_vm5, %v6933_v8, %v998_v41 }
 0x185   : > { %v1133_v12 = vadd.f32 %v1109_v5, %v1032_v9  ;;  %v7003_v39 = vadd.f32 %v1014_v30, %v900_v26  ;;  %v429_v26 = vmul.f32 %v6429_v10, %v6666_v63  ;;  %v436_v9 = vmul.f32 %v6432_v11, %v6664_v61 }
 0x187   : > { %v672_v22 = vpop.permute.xlu0 %671  ;;  %v593_v21 = vpop.permute.xlu1 %592 }
 0x188   : > { %v691_v15 = vsel %vm687_vm2, %v6904_v48, %v672_v22  ;;  %v605_v31 = vsel %vm596_vm1, %v6906_v51, %v593_v21 }
 0x189   : > { %v713_v1 = vadd.f32 %v691_v15, %v622_v55  ;;  %v628_v62 = vadd.f32 %v605_v31, %v537_v28 }
 0x18b   : > { %v1186_v29 = vpop.permute.xlu0 %1185  ;;  %v1099_v16 = vpop.permute.xlu1 %1098 }
 0x18c   : > { %v1210_v2 = vsel %vm1207_vm7, %v1184_v44, %v1186_v29  ;;  %v430_v44 = vmul.f32 %v6432_v11, %v6666_v63 }
 0x18d   : > { %v7010_v59 = vadd.f32 %v1210_v2, %v1133_v12 }
 0x18f   : > { %v7012_v8 = vpop.permute.xlu0 %762  ;;  %v684_v20 = vpop.permute.xlu1 %683 }
 0x190   : > { %v782_v7 = vsel %vm778_vm3, %v6917_v49, %v7012_v8  ;;  %v696_v58 = vsel %vm687_vm2, %v6919_v60, %v684_v20 }
 0x191   : > { %v804_v56 = vadd.f32 %v782_v7, %v713_v1  ;;  %v719_v30 = vadd.f32 %v696_v58, %v628_v62 }
 0x193   : > { %v7017_v48 = vpop.permute.xlu0 %774  ;;  %v1200_v40 = vpop.permute.xlu1 %1199 }
 0x194   : > { %v787_v60 = vsel %vm778_vm3, %v6948_v42, %v7017_v48 }
 0x195   : > { %v810_v15 = vadd.f32 %v787_v60, %v719_v30 }
 0x197   : > { %v7019_v51 = vpop.permute.xlu0 %865  ;;  %v7021_v53 = vpop.permute.xlu1 %853 }
 0x198   : > { %v873_v63 = vsel %vm869_vm4, %v6946_v36, %v7021_v53 }
 0x199   : > { %v895_v12 = vadd.f32 %v873_v63, %v804_v56 }
 0x19b   : > { %v492_v38 = vpop.permute.xlu0 %491  ;;  %v7027_v6 = vpop.permute.xlu1 %985 }
 0x19c   : > { %v510_v19 = vsel %vm505_vm0, %v490_v18, %v492_v38  ;;  %v533_v49 = vadd.f32 %v492_v38, %v430_v44  ;;  %v435_v18 = vmul.f32 %v6429_v10, %v6664_v61  ;;  %v1009_v36 = vsel %vm1005_vm5, %v6984_v54, %v7027_v6 }
 0x19d   : > { %v532_v33 = vadd.f32 %v510_v19, %v429_v26  ;;  %v1033_v31 = vadd.f32 %v1009_v36, %v895_v12 }
 0x19f   : > { %v7030_v43 = vpop.permute.xlu0 %1086  ;;  %v7032_v46 = vpop.permute.xlu1 %999 }
 0x1a0   : > { %v1015_v42 = vsel %vm1005_vm5, %v998_v41, %v7032_v46 }
 0x1a3   : > { %v583_v35 = vpop.permute.xlu0 %582  ;;  %v504_v52 = vpop.permute.xlu1 %503 }
 0x1a4   : > { %v601_v23 = vsel %vm596_vm1, %v581_v32, %v583_v35  ;;  %v624_v24 = vadd.f32 %v583_v35, %v533_v49  ;;  %v515_v55 = vsel %vm505_vm0, %v502_v57, %v504_v52  ;;  %v539_v28 = vadd.f32 %v504_v52, %v436_v9 }
 0x1a5   : > { %v623_v5 = vadd.f32 %v601_v23, %v532_v33  ;;  %v538_v11 = vadd.f32 %v515_v55, %v435_v18  ;;  %v878_v32 = vsel %vm869_vm4, %v6970_v14, %v7019_v51  ;;  %v1110_v57 = vsel %vm1106_vm6, %v1085_v50, %v7030_v43 }
 0x1a6   : > { %v901_v1 = vadd.f32 %v878_v32, %v810_v15  ;;  %v1134_v62 = vadd.f32 %v1110_v57, %v1033_v31  ;;  %vm5053_vm0 = vcmask 326656  }
 0x1a7   : > { %v7051_v10 = vpop.permute.xlu0 %1187  ;;  %v7053_v61 = vpop.permute.xlu1 %1100 }
 0x1a8   : > { %v1211_v54 = vsel %vm1207_vm7, %v1186_v29, %v7051_v10  ;;  %v1116_v56 = vsel %vm1106_vm6, %v1099_v16, %v7053_v61  ;;  %v1039_v50 = vadd.f32 %v1015_v42, %v901_v1  ;;  %v1115_v29 = vsel %vm1106_vm6, %v6961_v45, %v1099_v16 }
 0x1a9   : > { %v1235_v38 = vadd.f32 %v1211_v54, %v1134_v62  ;;  %v1139_v23 = vadd.f32 %v1115_v29, %v7003_v39  ;;  %v1258_v39 = vadd.f32 %v6674_v3, %v7010_v59 }
 0x1aa   : > { %v1140_v41 = vadd.f32 %v1116_v56, %v1039_v50  ;;  %v1896_v50 = vld [vmem:[%s8023_s3 + $0x8] sm:$0x3] }
 0x1ab   : > { %v674_v2 = vpop.permute.xlu0 %673  ;;  %v595_v7 = vpop.permute.xlu1 %594  ;;  %v1259_v35 = vadd.f32 %v6674_v3, %v1235_v38  ;;  %v1270_v54 = vmax.f32 %v1258_v39, 0.0  ;;  %5792 = vmatprep.subr.msk.mxu1 %vm1972_vm8, %v1896_v50 }
 0x1ac   : > { %v692_v14 = vsel %vm687_vm2, %v672_v22, %v674_v2  ;;  %v715_v44 = vadd.f32 %v674_v2, %v624_v24  ;;  %v630_v26 = vadd.f32 %v595_v7, %v539_v28  ;;  %v606_v49 = vsel %vm596_vm1, %v593_v21, %v595_v7  ;;  %5793 = vmatpush3.msk.msra.mxu1 %vm1972_vm8, %v1896_v50 }
 0x1ad   : > { %v714_v19 = vadd.f32 %v692_v14, %v623_v5  ;;  %v629_v18 = vadd.f32 %v606_v49, %v538_v11  ;;  %v1216_v21 = vsel %vm1207_vm7, %v6982_v34, %v1200_v40  ;;  %v1271_v60 = vmax.f32 %v1259_v35, 0.0 }
 0x1ae   : > { %v1240_v34 = vadd.f32 %v1216_v21, %v1139_v23  ;;  %vm5132_vm1 = vcmask 261120  }
 0x1af   : > { %v686_v33 = vpop.permute.xlu0 %685  ;;  %v7068_v9 = vpop.permute.xlu1 %1201 }
 0x1b0   : > { %v697_v58 = vsel %vm687_vm2, %v684_v20, %v686_v33  ;;  %v721_v63 = vadd.f32 %v686_v33, %v630_v26  ;;  %v1217_v22 = vsel %vm1207_vm7, %v1200_v40, %v7068_v9  ;;  %v1264_v59 = vadd.f32 %v6676_v4, %v1240_v34 }
 0x1b1   : > { %v1241_v52 = vadd.f32 %v1217_v22, %v1140_v41  ;;  %v720_v24 = vadd.f32 %v697_v58, %v629_v18  ;;  %vm5206_vm2 = vcmask 73728  }
 0x1b2   : > { %v1276_v56 = vmax.f32 %v1264_v59, 0.0 }
 0x1b3   : > { %v777_v55 = vpop.permute.xlu0 %776  ;;  %v765_v28 = vpop.permute.xlu1 %764  ;;  %v1265_v11 = vadd.f32 %v6676_v4, %v1241_v52 }
 0x1b4   : > { %v788_v45 = vsel %vm778_vm3, %v7017_v48, %v777_v55  ;;  %v812_v16 = vadd.f32 %v777_v55, %v721_v63  ;;  %v783_v20 = vsel %vm778_vm3, %v7012_v8, %v765_v28  ;;  %v806_v5 = vadd.f32 %v765_v28, %v715_v44 }
 0x1b5   : > { %v811_v36 = vadd.f32 %v788_v45, %v720_v24  ;;  %v805_v30 = vadd.f32 %v783_v20, %v714_v19  ;;  %v1277_v15 = vmax.f32 %v1265_v11, 0.0 }
 0x1b7   : > { %v868_v40 = vpop.permute.xlu0 %867  ;;  %v856_v12 = vpop.permute.xlu1 %855  ;;  %1376 = vxpose.xlu1.b32.start [1/2] (short) %v1271_v60, 128 }
 0x1b8   : > { %v879_v48 = vsel %vm869_vm4, %v7019_v51, %v868_v40  ;;  %v7088_v32 = vadd.f32 %v868_v40, %v812_v16  ;;  %v874_v8 = vsel %vm869_vm4, %v7021_v53, %v856_v12  ;;  %v7092_v57 = vadd.f32 %v856_v12, %v806_v5 }
 0x1b9   : > { %v902_v31 = vadd.f32 %v879_v48, %v811_v36  ;;  %v896_v42 = vadd.f32 %v874_v8, %v805_v30  ;;  %v955_v40 = vmul.f32 %v6454_v25, %v6556_v0  ;;  %v1056_v0 = vmul.f32 %v6592_v17, %v6454_v25 }
 0x1bb   : > { %v7095_v1 = vpop.permute.xlu0 %1001  ;;  %v7097_v62 = vpop.permute.xlu1 %987  ;;  %1377 = vxpose.xlu1.b32.end [2/2] (short) %v1277_v15, 128 }
 0x1bc   : > { %v1016_v51 = vsel %vm1005_vm5, %v7032_v46, %v7095_v1  ;;  %v1010_v53 = vsel %vm1005_vm5, %v7027_v6, %v7097_v62  ;;  %1344 = vxpose.xlu0.b32.start [1/2] (short) %v1270_v54, 128  ;;  %v5281_v6 = vld [vmem:[%s8023_s3 + $0x18] sm:$0x3] }
 0x1bd   : > { %v1040_v2 = vadd.f32 %v1016_v51, %v902_v31  ;;  %v1034_v7 = vadd.f32 %v1010_v53, %v896_v42  ;;  %5761 = vmatprep.subr.msk.mxu0 %vm1972_vm8, %v5281_v6 }
 0x1be   : > { %5762 = vmatpush3.msk.msra.mxu0 %vm1972_vm8, %v5281_v6 }
 0x1bf   : > { %v7105_v14 = vpop.permute.xlu0 %1102  ;;  %v7107_v44 = vpop.permute.xlu1 %1088 }
 0x1c0   : > { %v1117_v26 = vsel %vm1106_vm6, %v7053_v61, %v7105_v14  ;;  %v1111_v46 = vsel %vm1106_vm6, %v7030_v43, %v7107_v44  ;;  %1345 = vxpose.xlu0.b32.end [2/2] (short) %v1276_v56, 128  ;;  %v5280_v43 = vld [vmem:[%s8023_s3 + $0x10] sm:$0xff]  ;;  %v1895_v61 = vld [vmem:[%s8023_s3] sm:$0xff] }
 0x1c1   : > { %v1141_v38 = vadd.f32 %v1117_v26, %v1040_v2  ;;  %v1135_v19 = vadd.f32 %v1111_v46, %v1034_v7  ;;  %5763 = vmatprep.subr.mxu0 %v5280_v43  ;;  %5794 = vmatprep.subr.mxu1 %v1895_v61 }
 0x1c2   : > { %5764 = vmatpush3.msra.mxu0 %v5280_v43  ;;  %5795 = vmatpush3.msra.mxu1 %v1895_v61  ;;  %v1063_v61 = vmul.f32 %v6606_v27, %v6454_v25 }
 0x1c3   : > { %v7131_v49 = vpop.permute.xlu0 %1203  ;;  %v7133_v41 = vpop.permute.xlu1 %1189 }
 0x1c4   : > { %v1218_v33 = vsel %vm1207_vm7, %v7068_v9, %v7131_v49  ;;  %v1212_v29 = vsel %vm1207_vm7, %v7051_v10, %v7133_v41 }
 0x1c5   : > { %v1242_v58 = vadd.f32 %v1218_v33, %v1141_v38  ;;  %v1236_v63 = vadd.f32 %v1212_v29, %v1135_v19 }
 0x1c7   : > { %v1260_v22 = vadd.f32 %v6674_v3, %v1236_v63  ;;  %v1266_v18 = vadd.f32 %v6676_v4, %v1242_v58  ;;  %v1157_v58 = vmul.f32 %v6616_v37, %v6454_v25 }
 0x1c9   : > { %v1272_v52 = vmax.f32 %v1260_v22, 0.0  ;;  %v1278_v9 = vmax.f32 %v1266_v18, 0.0 }
 0x1f6   : > { %v1296_v35 = vpop.trf.xlu1 }
 0x1f7   : > { %1473 = vst.msk [vmem:[#allocation2] sm:$0xff] %vm1472_vm9, %v1296_v35  ;;  %v1164_v35 = vmul.f32 %v6634_v47, %v6454_v25 }
 0x1f9   : > { %1408 = vxpose.xlu0.b32.start [1/2] (short) %v1272_v52, 128 }
 0x1fa   : > { %v1297_v23 = vpop.trf.xlu1 }
 0x1fb   : > { %1474 = vst.msk [vmem:[#allocation2 + $0x8] sm:$0xff] %vm1472_vm9, %v1297_v23  ;;  %v1328_v21 = vpop.trf.xlu0 }
 0x1fc   : > { %1489 = vst.msk [vmem:[#allocation2 + $0x80] sm:$0xff] %vm1472_vm9, %v1328_v21 }
 0x1fd   : > { %1409 = vxpose.xlu0.b32.end [2/2] (short) %v1278_v9, 128 }
 0x1fe   : > { %v1298_v10 = vpop.trf.xlu1 }
 0x1ff   : > { %1475 = vst.msk [vmem:[#allocation2 + $0x10] sm:$0xff] %vm1472_vm9, %v1298_v10  ;;  %v1329_v24 = vpop.trf.xlu0 }
 0x200   : > { %1490 = vst.msk [vmem:[#allocation2 + $0x88] sm:$0xff] %vm1472_vm9, %v1329_v24 }
 0x202   : > { %v1299_v55 = vpop.trf.xlu1  ;;  %v1565_v60 = vld [vmem:[#allocation2] ss:$2 sm:$0xff]  ;;  %v1569_v11 = vld [vmem:[#allocation2 + $0x1] ss:$2 sm:$0xff] }
 0x203   : > { %1476 = vst.msk [vmem:[#allocation2 + $0x18] sm:$0xff] %vm1472_vm9, %v1299_v55  ;;  %v1330_v28 = vpop.trf.xlu0  ;;  %v1580_v12 = vmax.f32 %v1565_v60, %v1569_v11 }
 0x204   : > { %1491 = vst.msk [vmem:[#allocation2 + $0x90] sm:$0xff] %vm1472_vm9, %v1330_v28 }
 0x206   : > { %v1300_v45 = vpop.trf.xlu1 }
 0x207   : > { %1477 = vst.msk [vmem:[#allocation2 + $0x20] sm:$0xff] %vm1472_vm9, %v1300_v45  ;;  %v1331_v16 = vpop.trf.xlu0  ;;  %v1616_v30 = vld [vmem:[#allocation2 + $0x80] ss:$2 sm:$0x1f] }
 0x208   : > { %1492 = vst.msk [vmem:[#allocation2 + $0x98] sm:$0xff] %vm1472_vm9, %v1331_v16  ;;  %v1620_v39 = vld [vmem:[#allocation2 + $0x81] ss:$2 sm:$0x1f] }
 0x209   : > { %v1630_v15 = vmax.f32 %v1616_v30, %v1620_v39 }
 0x20a   : > { %v1301_v20 = vpop.trf.xlu1  ;;  %v1567_v48 = vld [vmem:[#allocation2 + $0x10] ss:$2 sm:$0x1f]  ;;  %v1571_v8 = vld [vmem:[#allocation2 + $0x11] ss:$2 sm:$0x1f] }
 0x20b   : > { %1478 = vst.msk [vmem:[#allocation2 + $0x28] sm:$0xff] %vm1472_vm9, %v1301_v20  ;;  %v1332_v5 = vpop.trf.xlu0  ;;  %v1581_v56 = vmax.f32 %v1567_v48, %v1571_v8 }
 0x20c   : > { %1493 = vst.msk [vmem:[#allocation2 + $0xa0] sm:$0xff] %vm1472_vm9, %v1332_v5 }
 0x20e   : > { %v1302_v36 = vpop.trf.xlu1 }
 0x20f   : > { %1479 = vst.msk [vmem:[#allocation2 + $0x30] sm:$0xff] %vm1472_vm9, %v1302_v36  ;;  %v1333_v34 = vpop.trf.xlu0 }
 0x210   : > { %1494 = vst.msk [vmem:[#allocation2 + $0xa8] sm:$0xff] %vm1472_vm9, %v1333_v34 }
 0x211   : > { %989 = vrot.lane.b32.xlu1 %v955_v40, %s6294_s24 }
 0x212   : > { %v1573_v31 = vld [vmem:[#allocation2 + $0x1c] ss:$2 sm:$0xff]  ;;  %v1577_v42 = vld [vmem:[#allocation2 + $0x1d] ss:$2 sm:$0xff]  ;;  %v1303_v54 = vpop.trf.xlu1 }
 0x213   : > { %v1582_v59 = vmax.f32 %v1573_v31, %v1577_v42  ;;  %v1624_v51 = vld [vmem:[#allocation2 + $0x9c] ss:$2 sm:$0x1f]  ;;  %v1628_v53 = vld [vmem:[#allocation2 + $0x9d] ss:$2 sm:$0x1f]  ;;  %v1334_v2 = vpop.trf.xlu0 }
 0x214   : > { %1480 = vst.msk [vmem:[#allocation2 + $0x38] sm:$0xff] %vm1472_vm9, %v1303_v54  ;;  %v1632_v7 = vmax.f32 %v1624_v51, %v1628_v53  ;;  %1495 = vst.msk [vmem:[#allocation2 + $0xb0] sm:$0xff] %vm1472_vm9, %v1334_v2 }
 0x215   : > { %1090 = vrot.lane.b32.xlu1 %v1056_v0, %s6295_s25  ;;  %v1584_v26 = vmax.f32 %v1580_v12, %v1582_v59 }
 0x216   : > { %v1634_v46 = vmax.f32 %v1630_v15, %v1632_v7  ;;  %v1575_v6 = vld [vmem:[#allocation2 + $0x2c] ss:$2 sm:$0x1f]  ;;  %v1579_v50 = vld [vmem:[#allocation2 + $0x2d] ss:$2 sm:$0x1f]  ;;  %v1304_v38 = vpop.trf.xlu1 }
 0x217   : > { %v1583_v19 = vmax.f32 %v1575_v6, %v1579_v50  ;;  %1481 = vst.msk [vmem:[#allocation2 + $0x40] sm:$0xff] %vm1472_vm9, %v1304_v38  ;;  %v1335_v43 = vpop.trf.xlu0  ;;  %1586 = vst.msk [vmem:[#allocation3] sm:$0xff] %vm1472_vm9, %v1584_v26 }
 0x218   : > { %1496 = vst.msk [vmem:[#allocation2 + $0xb8] sm:$0xff] %vm1472_vm9, %v1335_v43  ;;  %v1626_v43 = vld [vmem:[#allocation2 + $0x8d] ss:$2 sm:$0xff] }
 0x219   : > { %1636 = vst.msk [vmem:[#allocation3 + $0x22] sm:$0x1f] %vm1587_vm10, %v1634_v46  ;;  %1104 = vrot.lane.b32.xlu1 %v1063_v61, %s6295_s25  ;;  %v1585_v17 = vmax.f32 %v1581_v56, %v1583_v19  ;;  %v1622_v19 = vld [vmem:[#allocation2 + $0x8c] ss:$2 sm:$0xff]  ;;  %s376_s25 = scalar_lea.vmem [#allocation6], %s375_s16 }
 0x21a   : > { %v1305_v33 = vpop.trf.xlu1 }
 0x21b   : > { %1482 = vst.msk [vmem:[#allocation2 + $0x48] sm:$0xff] %vm1472_vm9, %v1305_v33  ;;  %v1336_v29 = vpop.trf.xlu0  ;;  %v1638_v9 = vld [vmem:[#allocation2 + $0xa8] ss:$2 sm:$0xff]  ;;  %v1642_v21 = vld [vmem:[#allocation2 + $0xa9] ss:$2 sm:$0xff] }
 0x21c   : > { %1588 = vst.msk [vmem:[#allocation3 + $0x8] sm:$0x1f] %vm1587_vm10, %v1585_v17  ;;  %v1653_v55 = vmax.f32 %v1638_v9, %v1642_v21 }
 0x21d   : > { %1497 = vst.msk [vmem:[#allocation2 + $0xc0] sm:$0xff] %vm1472_vm9, %v1336_v29  ;;  %1191 = vrot.lane.b32.xlu1 %v1157_v58, %s6296_s29  ;;  %v1631_v58 = vmax.f32 %v1622_v19, %v1626_v43 }
 0x21e   : > { %v1306_v27 = vpop.trf.xlu1  ;;  %v1877_v63 = vld [vmem:[#allocation3] sm:$0xff] }
 0x21f   : > { %1483 = vst.msk [vmem:[#allocation2 + $0x50] sm:$0xff] %vm1472_vm9, %v1306_v27  ;;  %v1337_v22 = vpop.trf.xlu0  ;;  %5796 = vmatprep.mubr.msk.f32.mxu1 %vm1472_vm9, %v1877_v63  ;;  %v1590_v10 = vld [vmem:[#allocation2 + $0x38] ss:$2 sm:$0xff]  ;;  %v1594_v24 = vld [vmem:[#allocation2 + $0x39] ss:$2 sm:$0xff] }
 0x220   : > { %1498 = vst.msk [vmem:[#allocation2 + $0xc8] sm:$0xff] %vm1472_vm9, %v1337_v22  ;;  %v1605_v36 = vmax.f32 %v1590_v10, %v1594_v24  ;;  %v5341_v10 = vld [vmem:[%s8023_s3 + $0x30] sm:$0xff] }
 0x221   : > { %1205 = vrot.lane.b32.xlu1 %v1164_v35, %s6296_s29  ;;  %v5321_v35 = vld [vmem:[%s8023_s3 + $0x28] sm:$0x3]  ;;  %s5221_s29 = sshll.u32 %s376_s25, 4  ;;  %s5222_s29 = int_to_ptr.vmem [resolvable:$true] %s5221_s29 }
 0x222   : > { %v1307_v37 = vpop.trf.xlu1  ;;  %5823 = vmatprep.subr.msk.mxu0 %vm1972_vm8, %v5321_v35  ;;  %s6218_s0 = scalar_lea.vmem %s5222_s29, 16  ;;  %p6225_p0 = scmp.lt.s32.totalorder %s5222_s29, %s6223_s22 }
 0x223   : > { %v1897_v18 = vld [vmem:[#allocation3 + $0x1] sm:$0xff]  ;;  %1484 = vst.msk [vmem:[#allocation2 + $0x58] sm:$0xff] %vm1472_vm9, %v1307_v37  ;;  %v1338_v52 = vpop.trf.xlu0  ;;  %p6219_p11 = scmp.ne.s32.totalorder %s5222_s29, %s6218_s0 }
 0x224   : > { %5765 = vmatprep.mubr.msk.f32.mxu0 %vm1472_vm9, %v1897_v18  ;;  %1499 = vst.msk [vmem:[#allocation2 + $0xd0] sm:$0xff] %vm1472_vm9, %v1338_v52  ;;  %v1640_v28 = vld [vmem:[#allocation2 + $0xb8] ss:$2 sm:$0x1f] }
 0x225   : > { %v1644_v45 = vld [vmem:[#allocation2 + $0xb9] ss:$2 sm:$0x1f]  ;;  %p6220_p12 = pnand %p6219_p11, %p6398_p5 }
 0x226   : > { %v1308_v23 = vpop.trf.xlu1  ;;  %v1592_v30 = vld [vmem:[#allocation2 + $0x48] ss:$2 sm:$0x1f]  ;;  %v1596_v39 = vld [vmem:[#allocation2 + $0x49] ss:$2 sm:$0x1f]  ;;  %v1654_v34 = vmax.f32 %v1640_v28, %v1644_v45 }
 0x227   : > { %1485 = vst.msk [vmem:[#allocation2 + $0x60] sm:$0xff] %vm1472_vm9, %v1308_v23  ;;  %v1339_v47 = vpop.trf.xlu0  ;;  %v1606_v51 = vmax.f32 %v1592_v30, %v1596_v39  ;;  %v5342_v37 = vld [vmem:[%s8023_s3 + $0x38] sm:$0x3]  ;;  %p6221_p13 = pneg %p6220_p12 }
 0x228   : > { %1500 = vst.msk [vmem:[#allocation2 + $0xd8] sm:$0xff] %vm1472_vm9, %v1339_v47  ;;  %5854 = vmatprep.subr.msk.mxu1 %vm1972_vm8, %v5342_v37  ;;  %v5320_v47 = vld [vmem:[%s8023_s3 + $0x20] sm:$0xff] }
 0x22a   : > { %v1309_v16 = vpop.trf.xlu1 }
 0x22b   : > { %v1646_v20 = vld [vmem:[#allocation2 + $0xc4] ss:$2 sm:$0xff]  ;;  %v1650_v5 = vld [vmem:[#allocation2 + $0xc5] ss:$2 sm:$0xff]  ;;  %1486 = vst.msk [vmem:[#allocation2 + $0x68] sm:$0xff] %vm1472_vm9, %v1309_v16  ;;  %v1340_v60 = vpop.trf.xlu0 }
 0x22c   : > { %v1655_v11 = vmax.f32 %v1646_v20, %v1650_v5  ;;  %1501 = vst.msk [vmem:[#allocation2 + $0xe0] sm:$0xff] %vm1472_vm9, %v1340_v60 }
 0x22e   : > { %v1657_v40 = vmax.f32 %v1653_v55, %v1655_v11  ;;  %v1598_v12 = vld [vmem:[#allocation2 + $0x54] ss:$2 sm:$0xff]  ;;  %v1602_v48 = vld [vmem:[#allocation2 + $0x55] ss:$2 sm:$0xff]  ;;  %v1310_v8 = vpop.trf.xlu1 }
 0x22f   : > { %v1607_v15 = vmax.f32 %v1598_v12, %v1602_v48  ;;  %v1648_v31 = vld [vmem:[#allocation2 + $0xd4] ss:$2 sm:$0x1f]  ;;  %v1652_v42 = vld [vmem:[#allocation2 + $0xd5] ss:$2 sm:$0x1f]  ;;  %v1341_v54 = vpop.trf.xlu0 }
 0x230   : > { %1487 = vst.msk [vmem:[#allocation2 + $0x70] sm:$0xff] %vm1472_vm9, %v1310_v8  ;;  %1659 = vst.msk [vmem:[#allocation3 + $0x27] sm:$0xff] %vm1472_vm9, %v1657_v40  ;;  %v1656_v59 = vmax.f32 %v1648_v31, %v1652_v42 }
 0x231   : > { %1502 = vst.msk [vmem:[#allocation2 + $0xe8] sm:$0xff] %vm1472_vm9, %v1341_v54  ;;  %v1609_v53 = vmax.f32 %v1605_v36, %v1607_v15 }
 0x232   : > { %v1658_v2 = vmax.f32 %v1654_v34, %v1656_v59  ;;  %v1600_v0 = vld [vmem:[#allocation2 + $0x64] ss:$2 sm:$0x1f]  ;;  %v1604_v7 = vld [vmem:[#allocation2 + $0x65] ss:$2 sm:$0x1f]  ;;  %v1311_v56 = vpop.trf.xlu1 }
 0x233   : > { %1611 = vst.msk [vmem:[#allocation3 + $0xd] sm:$0xff] %vm1472_vm9, %v1609_v53  ;;  %v1608_v26 = vmax.f32 %v1600_v0, %v1604_v7  ;;  %1488 = vst.msk [vmem:[#allocation2 + $0x78] sm:$0xff] %vm1472_vm9, %v1311_v56  ;;  %v1342_v46 = vpop.trf.xlu0 }
 0x234   : > { %1503 = vst.msk [vmem:[#allocation2 + $0xf0] sm:$0xff] %vm1472_vm9, %v1342_v46 }
 0x235   : > { %1660 = vst.msk [vmem:[#allocation3 + $0x2f] sm:$0x1f] %vm1587_vm10, %v1658_v2  ;;  %v1610_v6 = vmax.f32 %v1606_v51, %v1608_v26 }
 0x236   : > { %v1392_v50 = vpop.trf.xlu1 }
 0x237   : > { %v1343_v38 = vpop.trf.xlu0  ;;  %1612 = vst.msk [vmem:[#allocation3 + $0x15] sm:$0x1f] %vm1587_vm10, %v1610_v6 }
 0x238   : > { %1521 = vst.msk [vmem:[#allocation2 + $0x180] sm:$0xff] %vm1472_vm9, %v1392_v50  ;;  %1504 = vst.msk [vmem:[#allocation2 + $0xf8] sm:$0xff] %vm1472_vm9, %v1343_v38  ;;  %v1662_v55 = vld [vmem:[#allocation2 + $0xe0] ss:$2 sm:$0xff]  ;;  %v1666_v28 = vld [vmem:[#allocation2 + $0xe1] ss:$2 sm:$0xff] }
 0x239   : > { %v1677_v5 = vmax.f32 %v1662_v55, %v1666_v28 }
 0x23a   : > { %v1614_v61 = vld [vmem:[#allocation2 + $0x70] ss:$2 sm:$0xff]  ;;  %v1618_v17 = vld [vmem:[#allocation2 + $0x71] ss:$2 sm:$0xff]  ;;  %v1898_v33 = vld [vmem:[#allocation3 + $0x9] sm:$0xff]  ;;  %v1393_v29 = vpop.trf.xlu1 }
 0x23b   : > { %v1629_v27 = vmax.f32 %v1614_v61, %v1618_v17  ;;  %v1360_v63 = vpop.trf.xlu0  ;;  %5766 = vmatmul.mubr.msk.f32.vlgmr.msra.gmra.mxu0 %vm1472_vm9, %v1898_v33  ;;  %v1878_v22 = vld [vmem:[#allocation3 + $0x8] sm:$0xff]  ;;  %1522 = vst.msk [vmem:[#allocation2 + $0x188] sm:$0xff] %vm1472_vm9, %v1393_v29 }
 0x23c   : > { %1505 = vst.msk [vmem:[#allocation2 + $0x100] sm:$0xff] %vm1472_vm9, %v1360_v63  ;;  %5797 = vmatmul.mubr.msk.f32.vlgmr.msra.gmra.mxu1 %vm1472_vm9, %v1878_v22  ;;  %5824 = vmatpush3.msk.msra.mxu0 %vm1972_vm8, %v5321_v35  ;;  %v1902_v31 = vld [vmem:[#allocation3 + $0x29] sm:$0xff] }
 0x23d   : > { %v1633_v18 = vmax.f32 %v1629_v27, %v1631_v58  ;;  %5855 = vmatpush3.msk.msra.mxu1 %vm1972_vm8, %v5342_v37  ;;  %5825 = vmatprep.subr.mxu0 %v5320_v47  ;;  %v1882_v42 = vld [vmem:[#allocation3 + $0x28] sm:$0xff] }
 0x23e   : > { %v1899_v52 = vld [vmem:[#allocation3 + $0x11] sm:$0xff]  ;;  %v1394_v9 = vpop.trf.xlu1  ;;  %5856 = vmatprep.subr.mxu1 %v5341_v10  ;;  %5826 = vmatpush3.msra.mxu0 %v5320_v47 }
 0x23f   : > { %v1879_v23 = vld [vmem:[#allocation3 + $0x10] sm:$0xff]  ;;  %1635 = vst.msk [vmem:[#allocation3 + $0x1a] sm:$0xff] %vm1472_vm9, %v1633_v18  ;;  %v1361_v21 = vpop.trf.xlu0  ;;  %5768 = vmatprep.mubr.msk.f32.mxu0 %vm1472_vm9, %v1899_v52  ;;  %1523 = vst.msk [vmem:[#allocation2 + $0x190] sm:$0xff] %vm1472_vm9, %v1394_v9  ;;  %5857 = vmatpush3.msra.mxu1 %v5341_v10  ;;  %v1664_v16 = vld [vmem:[#allocation2 + $0xf0] ss:$2 sm:$0x1f]  ;;  %v962_v10 = vmul.f32 %v6454_v25, %v6580_v13 }
 0x240   : > { %5799 = vmatprep.mubr.msk.f32.mxu1 %vm1472_vm9, %v1879_v23  ;;  %1506 = vst.msk [vmem:[#allocation2 + $0x108] sm:$0xff] %vm1472_vm9, %v1361_v21  ;;  %v1668_v20 = vld [vmem:[#allocation2 + $0xf1] ss:$2 sm:$0x1f] }
 0x241   : > { %v1678_v8 = vmax.f32 %v1664_v16, %v1668_v20 }
 0x242   : > { %v1395_v24 = vpop.trf.xlu1 }
 0x243   : > { %v1362_v45 = vpop.trf.xlu0  ;;  %1524 = vst.msk [vmem:[#allocation2 + $0x198] sm:$0xff] %vm1472_vm9, %v1395_v24 }
 0x244   : > { %1507 = vst.msk [vmem:[#allocation2 + $0x110] sm:$0xff] %vm1472_vm9, %v1362_v45 }
 0x246   : > { %v1900_v60 = vld [vmem:[#allocation3 + $0x19] sm:$0xff]  ;;  %v1901_v36 = vld [vmem:[#allocation3 + $0x21] sm:$0xff]  ;;  %v1396_v30 = vpop.trf.xlu1 }
 0x247   : > { %v1880_v11 = vld [vmem:[#allocation3 + $0x18] sm:$0xff]  ;;  %v1670_v39 = vld [vmem:[#allocation2 + $0xfc] ss:$2 sm:$0xff]  ;;  %v1674_v34 = vld [vmem:[#allocation2 + $0xfd] ss:$2 sm:$0xff]  ;;  %v1363_v40 = vpop.trf.xlu0  ;;  %5769 = vmatmul.mubr.msk.f32.gmra.mxu0 %vm1472_vm9, %v1900_v60  ;;  %1525 = vst.msk [vmem:[#allocation2 + $0x1a0] sm:$0xff] %vm1472_vm9, %v1396_v30 }
 0x248   : > { %5800 = vmatmul.mubr.msk.f32.gmra.mxu1 %vm1472_vm9, %v1880_v11  ;;  %v1881_v12 = vld [vmem:[#allocation3 + $0x20] sm:$0xff]  ;;  %v1679_v48 = vmax.f32 %v1670_v39, %v1674_v34  ;;  %1508 = vst.msk [vmem:[#allocation2 + $0x118] sm:$0xff] %vm1472_vm9, %v1363_v40  ;;  %5771 = vmatprep.mubr.msk.f32.mxu0 %vm1472_vm9, %v1901_v36  ;;  %v1734_v26 = vld [vmem:[#allocation2 + $0x188] ss:$2 sm:$0xff]  ;;  %v1738_v46 = vld [vmem:[#allocation2 + $0x189] ss:$2 sm:$0xff] }
 0x249   : > { %5802 = vmatprep.mubr.msk.f32.mxu1 %vm1472_vm9, %v1881_v12  ;;  %v1749_v43 = vmax.f32 %v1734_v26, %v1738_v46  ;;  %v7263_v39 = vld [vmem:[%s8023_s3 + $0x48] sm:$0x3] }
 0x24a   : > { %v1681_v15 = vmax.f32 %v1677_v5, %v1679_v48  ;;  %v1397_v54 = vpop.trf.xlu1  ;;  %5885 = vmatprep.subr.msk.mxu0 %vm1972_vm8, %v7263_v39 }
 0x24b   : > { %v1672_v59 = vld [vmem:[#allocation2 + $0x10c] ss:$2 sm:$0x1f]  ;;  %v1676_v51 = vld [vmem:[#allocation2 + $0x10d] ss:$2 sm:$0x1f]  ;;  %v1364_v53 = vpop.trf.xlu0  ;;  %5772 = vmatmul.mubr.msk.f32.gmra.mxu0 %vm1472_vm9, %v1902_v31 }
 0x24c   : > { %5803 = vmatmul.mubr.msk.f32.gmra.mxu1 %vm1472_vm9, %v1882_v42  ;;  %1526 = vst.msk [vmem:[#allocation2 + $0x1a8] sm:$0xff] %vm1472_vm9, %v1397_v54  ;;  %1683 = vst.msk [vmem:[#allocation3 + $0x34] sm:$0xff] %vm1472_vm9, %v1681_v15  ;;  %v1680_v2 = vmax.f32 %v1672_v59, %v1676_v51 }
 0x24d   : > { %1509 = vst.msk [vmem:[#allocation2 + $0x120] sm:$0xff] %vm1472_vm9, %v1364_v53 }
 0x24e   : > { %v1682_v0 = vmax.f32 %v1678_v8, %v1680_v2  ;;  %v1398_v7 = vpop.trf.xlu1  ;;  %v1736_v61 = vld [vmem:[#allocation2 + $0x198] ss:$2 sm:$0x1f]  ;;  %v1740_v17 = vld [vmem:[#allocation2 + $0x199] ss:$2 sm:$0x1f] }
 0x24f   : > { %v1365_v56 = vpop.trf.xlu0  ;;  %1527 = vst.msk [vmem:[#allocation2 + $0x1b0] sm:$0xff] %vm1472_vm9, %v1398_v7  ;;  %v1750_v37 = vmax.f32 %v1736_v61, %v1740_v17 }
 0x250   : > { %1684 = vst.msk [vmem:[#allocation3 + $0x3c] sm:$0x1f] %vm1587_vm10, %v1682_v0 }
 0x251   : > { %1510 = vst.msk [vmem:[#allocation2 + $0x128] sm:$0xff] %vm1472_vm9, %v1365_v56 }
 0x252   : > { %v1399_v6 = vpop.trf.xlu1 }
 0x253   : > { %v1366_v50 = vpop.trf.xlu0  ;;  %v1903_v38 = vld [vmem:[#allocation3 + $0x31] sm:$0xff]  ;;  %1528 = vst.msk [vmem:[#allocation2 + $0x1b8] sm:$0xff] %vm1472_vm9, %v1399_v6 }
 0x254   : > { %1511 = vst.msk [vmem:[#allocation2 + $0x130] sm:$0xff] %vm1472_vm9, %v1366_v50  ;;  %5774 = vmatprep.mubr.msk.f32.mxu0 %vm1472_vm9, %v1903_v38  ;;  %v1883_v19 = vld [vmem:[#allocation3 + $0x30] sm:$0xff]  ;;  %v1686_v28 = vld [vmem:[#allocation2 + $0x118] ss:$2 sm:$0xff]  ;;  %v1690_v45 = vld [vmem:[#allocation2 + $0x119] ss:$2 sm:$0xff] }
 0x255   : > { %5805 = vmatprep.mubr.msk.f32.mxu1 %vm1472_vm9, %v1883_v19  ;;  %v1701_v20 = vmax.f32 %v1686_v28, %v1690_v45 }
 0x256   : > { %v1742_v33 = vld [vmem:[#allocation2 + $0x1a4] ss:$2 sm:$0xff]  ;;  %v1746_v29 = vld [vmem:[#allocation2 + $0x1a5] ss:$2 sm:$0xff]  ;;  %v1400_v58 = vpop.trf.xlu1 }
 0x257   : > { %v1367_v27 = vpop.trf.xlu0  ;;  %v1904_v63 = vld [vmem:[#allocation3 + $0x39] sm:$0xff]  ;;  %v1751_v35 = vmax.f32 %v1742_v33, %v1746_v29  ;;  %1529 = vst.msk [vmem:[#allocation2 + $0x1c0] sm:$0xff] %vm1472_vm9, %v1400_v58 }
 0x258   : > { %v1884_v22 = vld [vmem:[#allocation3 + $0x38] sm:$0xff]  ;;  %1512 = vst.msk [vmem:[#allocation2 + $0x138] sm:$0xff] %vm1472_vm9, %v1367_v27  ;;  %5775 = vmatmul.mubr.msk.f32.gmra.mxu0 %vm1472_vm9, %v1904_v63 }
 0x259   : > { %5806 = vmatmul.mubr.msk.f32.gmra.mxu1 %vm1472_vm9, %v1884_v22  ;;  %v1753_v18 = vmax.f32 %v1749_v43, %v1751_v35 }
 0x25a   : > { %v1744_v52 = vld [vmem:[#allocation2 + $0x1b4] ss:$2 sm:$0x1f]  ;;  %v1748_v23 = vld [vmem:[#allocation2 + $0x1b5] ss:$2 sm:$0x1f]  ;;  %v1401_v9 = vpop.trf.xlu1 }
 0x25b   : > { %v1368_v21 = vpop.trf.xlu0  ;;  %1755 = vst.msk [vmem:[#allocation3 + $0x5b] sm:$0xff] %vm1472_vm9, %v1753_v18  ;;  %v1752_v47 = vmax.f32 %v1744_v52, %v1748_v23  ;;  %1530 = vst.msk [vmem:[#allocation2 + $0x1c8] sm:$0xff] %vm1472_vm9, %v1401_v9  ;;  %v1688_v5 = vld [vmem:[#allocation2 + $0x128] ss:$2 sm:$0x1f] }
 0x25c   : > { %1513 = vst.msk [vmem:[#allocation2 + $0x140] sm:$0xff] %vm1472_vm9, %v1368_v21  ;;  %v1692_v60 = vld [vmem:[#allocation2 + $0x129] ss:$2 sm:$0x1f] }
 0x25d   : > { %v1754_v24 = vmax.f32 %v1750_v37, %v1752_v47  ;;  %v1702_v34 = vmax.f32 %v1688_v5, %v1692_v60 }
 0x25e   : > { %1003 = vrot.lane.b32.xlu0 %v962_v10, %s6294_s24  ;;  %v1402_v55 = vpop.trf.xlu1  ;;  %s6224_s24 = scalar_lea.vmem %s6223_s22, 32 }
 0x25f   : > { %v1369_v16 = vpop.trf.xlu0  ;;  %1756 = vst.msk [vmem:[#allocation3 + $0x63] sm:$0x1f] %vm1587_vm10, %v1754_v24  ;;  %p6226_p1 = scmp.lt.s32.totalorder %s6224_s24, %s6218_s0 }
 0x260   : > { %1531 = vst.msk [vmem:[#allocation2 + $0x1d0] sm:$0xff] %vm1472_vm9, %v1402_v55  ;;  %1514 = vst.msk [vmem:[#allocation2 + $0x148] sm:$0xff] %vm1472_vm9, %v1369_v16 }
 0x261   : > { %p6227_p2 = por %p6226_p1, %p6225_p0 }
 0x262   : > { %v1403_v11 = vpop.trf.xlu1  ;;  %v1758_v51 = vld [vmem:[#allocation2 + $0x1c0] ss:$2 sm:$0xff]  ;;  %v1762_v53 = vld [vmem:[#allocation2 + $0x1c1] ss:$2 sm:$0xff] }
 0x263   : > { %v1694_v36 = vld [vmem:[#allocation2 + $0x134] ss:$2 sm:$0xff]  ;;  %v1698_v30 = vld [vmem:[#allocation2 + $0x135] ss:$2 sm:$0xff]  ;;  %v1370_v25 = vpop.trf.xlu0  ;;  %1532 = vst.msk [vmem:[#allocation2 + $0x1d8] sm:$0xff] %vm1472_vm9, %v1403_v11  ;;  %v1773_v26 = vmax.f32 %v1758_v51, %v1762_v53  ;;  %p6228_p3 = pnand %p6227_p2, %p6221_p13 }
 0x264   : > { %v1703_v13 = vmax.f32 %v1694_v36, %v1698_v30  ;;  %1515 = vst.msk [vmem:[#allocation2 + $0x150] sm:$0xff] %vm1472_vm9, %v1370_v25 }
 0x266   : > { %v1705_v40 = vmax.f32 %v1701_v20, %v1703_v13  ;;  %v1404_v12 = vpop.trf.xlu1 }
 0x267   : > { %v1696_v48 = vld [vmem:[#allocation2 + $0x144] ss:$2 sm:$0x1f]  ;;  %v1700_v8 = vld [vmem:[#allocation2 + $0x145] ss:$2 sm:$0x1f]  ;;  %v1371_v15 = vpop.trf.xlu0 }
 0x268   : > { %1533 = vst.msk [vmem:[#allocation2 + $0x1e0] sm:$0xff] %vm1472_vm9, %v1404_v12  ;;  %1707 = vst.msk [vmem:[#allocation3 + $0x41] sm:$0xff] %vm1472_vm9, %v1705_v40  ;;  %v1704_v31 = vmax.f32 %v1696_v48, %v1700_v8 }
 0x269   : > { %1516 = vst.msk [vmem:[#allocation2 + $0x158] sm:$0xff] %vm1472_vm9, %v1371_v15 }
 0x26a   : > { %v1706_v42 = vmax.f32 %v1702_v34, %v1704_v31  ;;  %v1405_v54 = vpop.trf.xlu1  ;;  %v1760_v46 = vld [vmem:[#allocation2 + $0x1d0] ss:$2 sm:$0x1f]  ;;  %v1764_v6 = vld [vmem:[#allocation2 + $0x1d1] ss:$2 sm:$0x1f] }
 0x26b   : > { %v1372_v59 = vpop.trf.xlu0  ;;  %1534 = vst.msk [vmem:[#allocation2 + $0x1e8] sm:$0xff] %vm1472_vm9, %v1405_v54  ;;  %v1774_v17 = vmax.f32 %v1760_v46, %v1764_v6  ;;  %v1889_v54 = vld [vmem:[#allocation3 + $0x60] sm:$0xff] }
 0x26c   : > { %1708 = vst.msk [vmem:[#allocation3 + $0x49] sm:$0x1f] %vm1587_vm10, %v1706_v42 }
 0x26d   : > { %1517 = vst.msk [vmem:[#allocation2 + $0x160] sm:$0xff] %vm1472_vm9, %v1372_v59 }
 0x26e   : > { %v1406_v2 = vpop.trf.xlu1 }
 0x26f   : > { %v1373_v0 = vpop.trf.xlu0  ;;  %v1885_v7 = vld [vmem:[#allocation3 + $0x40] sm:$0xff]  ;;  %1535 = vst.msk [vmem:[#allocation2 + $0x1f0] sm:$0xff] %vm1472_vm9, %v1406_v2 }
 0x270   : > { %1518 = vst.msk [vmem:[#allocation2 + $0x168] sm:$0xff] %vm1472_vm9, %v1373_v0  ;;  %5808 = vmatprep.mubr.msk.f32.mxu1 %vm1472_vm9, %v1885_v7  ;;  %v1905_v56 = vld [vmem:[#allocation3 + $0x41] sm:$0xff] }
 0x271   : > { %5777 = vmatprep.mubr.msk.f32.mxu0 %vm1472_vm9, %v1905_v56  ;;  %v1710_v35 = vld [vmem:[#allocation2 + $0x150] ss:$2 sm:$0xff]  ;;  %v1714_v37 = vld [vmem:[#allocation2 + $0x151] ss:$2 sm:$0xff] }
 0x272   : > { %v1766_v50 = vld [vmem:[#allocation2 + $0x1dc] ss:$2 sm:$0xff]  ;;  %v1770_v38 = vld [vmem:[#allocation2 + $0x1dd] ss:$2 sm:$0xff]  ;;  %v1407_v19 = vpop.trf.xlu1  ;;  %v1725_v9 = vmax.f32 %v1710_v35, %v1714_v37 }
 0x273   : > { %v1374_v43 = vpop.trf.xlu0  ;;  %v1775_v61 = vmax.f32 %v1766_v50, %v1770_v38  ;;  %1536 = vst.msk [vmem:[#allocation2 + $0x1f8] sm:$0xff] %vm1472_vm9, %v1407_v19 }
 0x274   : > { %1519 = vst.msk [vmem:[#allocation2 + $0x170] sm:$0xff] %vm1472_vm9, %v1374_v43 }
 0x275   : > { %v1777_v33 = vmax.f32 %v1773_v26, %v1775_v61 }
 0x276   : > { %v1768_v29 = vld [vmem:[#allocation2 + $0x1ec] ss:$2 sm:$0x1f]  ;;  %v1772_v58 = vld [vmem:[#allocation2 + $0x1ed] ss:$2 sm:$0x1f] }
 0x277   : > { %v1375_v27 = vpop.trf.xlu0  ;;  %1779 = vst.msk [vmem:[#allocation3 + $0x68] sm:$0xff] %vm1472_vm9, %v1777_v33  ;;  %v1776_v63 = vmax.f32 %v1768_v29, %v1772_v58  ;;  %v1712_v52 = vld [vmem:[#allocation2 + $0x160] ss:$2 sm:$0x1f] }
 0x278   : > { %1520 = vst.msk [vmem:[#allocation2 + $0x178] sm:$0xff] %vm1472_vm9, %v1375_v27  ;;  %v1716_v23 = vld [vmem:[#allocation2 + $0x161] ss:$2 sm:$0x1f] }
 0x279   : > { %v1778_v22 = vmax.f32 %v1774_v17, %v1776_v63  ;;  %v1726_v21 = vmax.f32 %v1712_v52, %v1716_v23 }
 0x27b   : > { %v1424_v18 = vpop.trf.xlu0  ;;  %1780 = vst.msk [vmem:[#allocation3 + $0x70] sm:$0x1f] %vm1587_vm10, %v1778_v22 }
 0x27c   : > { %1537 = vst.msk [vmem:[#allocation2 + $0x200] sm:$0xff] %vm1472_vm9, %v1424_v18 }
 0x27e   : > { %v1909_v0 = vld [vmem:[#allocation3 + $0x61] sm:$0xff] }
 0x27f   : > { %v1718_v47 = vld [vmem:[#allocation2 + $0x16c] ss:$2 sm:$0xff]  ;;  %v1720_v10 = vld [vmem:[#allocation2 + $0x17c] ss:$2 sm:$0x1f]  ;;  %v1425_v24 = vpop.trf.xlu0 }
 0x280   : > { %v1722_v55 = vld [vmem:[#allocation2 + $0x16d] ss:$2 sm:$0xff]  ;;  %v1724_v28 = vld [vmem:[#allocation2 + $0x17d] ss:$2 sm:$0x1f]  ;;  %1538 = vst.msk [vmem:[#allocation2 + $0x208] sm:$0xff] %vm1472_vm9, %v1425_v24 }
 0x281   : > { %v1727_v45 = vmax.f32 %v1718_v47, %v1722_v55  ;;  %v1728_v16 = vmax.f32 %v1720_v10, %v1724_v28  ;;  %v1890_v26 = vld [vmem:[#allocation3 + $0x68] sm:$0xff] }
 0x282   : > { %v1910_v56 = vld [vmem:[#allocation3 + $0x69] sm:$0xff] }
 0x283   : > { %v1729_v20 = vmax.f32 %v1725_v9, %v1727_v45  ;;  %v1730_v5 = vmax.f32 %v1726_v21, %v1728_v16  ;;  %v1426_v60 = vpop.trf.xlu0  ;;  %v990_v11 = vpop.permute.xlu1 %989  ;;  %v1786_v59 = vld [vmem:[#allocation2 + $0x1f9] ss:$2 sm:$0xff] }
 0x284   : > { %1539 = vst.msk [vmem:[#allocation2 + $0x210] sm:$0xff] %vm1472_vm9, %v1426_v60  ;;  %v1011_v25 = vsel %vm1005_vm5, %v7097_v62, %v990_v11 }
 0x285   : > { %1731 = vst.msk [vmem:[#allocation3 + $0x4e] sm:$0xff] %vm1472_vm9, %v1729_v20  ;;  %v1035_v15 = vadd.f32 %v1011_v25, %v7092_v57 }
 0x286   : > { %1732 = vst.msk [vmem:[#allocation3 + $0x56] sm:$0x1f] %vm1587_vm10, %v1730_v5 }
 0x287   : > { %v1427_v36 = vpop.trf.xlu0  ;;  %v1091_v30 = vpop.permute.xlu1 %1090 }
 0x288   : > { %1540 = vst.msk [vmem:[#allocation2 + $0x218] sm:$0xff] %vm1472_vm9, %v1427_v36  ;;  %v1112_v40 = vsel %vm1106_vm6, %v7107_v44, %v1091_v30  ;;  %v1782_v44 = vld [vmem:[#allocation2 + $0x1f8] ss:$2 sm:$0xff] }
 0x289   : > { %v1136_v51 = vadd.f32 %v1112_v40, %v1035_v15  ;;  %v1797_v46 = vmax.f32 %v1782_v44, %v1786_v59  ;;  %v2594_v44 = vld [vmem:[#allocation3 + $0xd] sm:$0xff] }
 0x28a   : > { %v2344_v59 = vld [vmem:[#allocation3 + $0xa] sm:$0xff] }
 0x28b   : > { %v1428_v13 = vpop.trf.xlu0  ;;  %v7290_v34 = vpop.permute.xlu1 %1104  ;;  %v1784_v6 = vld [vmem:[#allocation2 + $0x208] ss:$2 sm:$0x1f]  ;;  %v1788_v50 = vld [vmem:[#allocation2 + $0x209] ss:$2 sm:$0x1f] }
 0x28c   : > { %1541 = vst.msk [vmem:[#allocation2 + $0x220] sm:$0xff] %vm1472_vm9, %v1428_v13  ;;  %v1906_v12 = vld [vmem:[#allocation3 + $0x49] sm:$0xff]  ;;  %v1798_v33 = vmax.f32 %v1784_v6, %v1788_v50  ;;  %v7358_v6 = vld [vmem:[#allocation3 + $0x32] sm:$0xff]  ;;  %v2600_v50 = vld [vmem:[#allocation3 + $0x3d] sm:$0xff] }
 0x28d   : > { %v1886_v48 = vld [vmem:[#allocation3 + $0x48] sm:$0xff]  ;;  %v1907_v8 = vld [vmem:[#allocation3 + $0x51] sm:$0xff]  ;;  %5778 = vmatmul.mubr.msk.f32.gmra.mxu0 %vm1472_vm9, %v1906_v12  ;;  %v1908_v62 = vld [vmem:[#allocation3 + $0x59] sm:$0xff] }
 0x28e   : > { %5809 = vmatmul.mubr.msk.f32.gmra.mxu1 %vm1472_vm9, %v1886_v48  ;;  %v1887_v31 = vld [vmem:[#allocation3 + $0x50] sm:$0xff]  ;;  %5780 = vmatprep.mubr.msk.f32.mxu0 %vm1472_vm9, %v1907_v8  ;;  %v1888_v42 = vld [vmem:[#allocation3 + $0x58] sm:$0xff] }
 0x28f   : > { %5811 = vmatprep.mubr.msk.f32.mxu1 %vm1472_vm9, %v1887_v31  ;;  %v1429_v53 = vpop.trf.xlu0  ;;  %v1192_v2 = vpop.permute.xlu1 %1191 }
 0x290   : > { %1542 = vst.msk [vmem:[#allocation2 + $0x228] sm:$0xff] %vm1472_vm9, %v1429_v53  ;;  %v1213_v57 = vsel %vm1207_vm7, %v7133_v41, %v1192_v2  ;;  %v2345_v53 = vld [vmem:[#allocation3 + $0x12] sm:$0xff]  ;;  %v2596_v2 = vld [vmem:[#allocation3 + $0x1d] sm:$0xff] }
 0x291   : > { %v1237_v7 = vadd.f32 %v1213_v57, %v1136_v51  ;;  %5781 = vmatmul.mubr.msk.f32.gmra.mxu0 %vm1472_vm9, %v1908_v62  ;;  %v2595_v51 = vld [vmem:[#allocation3 + $0x15] sm:$0xff] }
 0x292   : > { %5812 = vmatmul.mubr.msk.f32.gmra.mxu1 %vm1472_vm9, %v1888_v42  ;;  %5783 = vmatprep.mubr.msk.f32.mxu0 %vm1472_vm9, %v1909_v0  ;;  %v5362_v0 = vld [vmem:[%s8023_s3 + $0x40] sm:$0xff]  ;;  %v7343_v57 = vld [vmem:[#allocation3 + $0x1a] sm:$0xff] }
 0x293   : > { %5814 = vmatprep.mubr.msk.f32.mxu1 %vm1472_vm9, %v1889_v54  ;;  %v1790_v38 = vld [vmem:[#allocation2 + $0x214] ss:$2 sm:$0xff]  ;;  %v1794_v19 = vld [vmem:[#allocation2 + $0x215] ss:$2 sm:$0xff]  ;;  %v1261_v43 = vadd.f32 %v6674_v3, %v1237_v7  ;;  %v1430_v61 = vpop.trf.xlu0 }
 0x294   : > { %v1799_v41 = vmax.f32 %v1790_v38, %v1794_v19  ;;  %1543 = vst.msk [vmem:[#allocation2 + $0x230] sm:$0xff] %vm1472_vm9, %v1430_v61  ;;  %v2343_v54 = vld [vmem:[#allocation3 + $0x2] sm:$0xff]  ;;  %v7363_v38 = vld [vmem:[#allocation3 + $0x3a] sm:$0xff] }
 0x295   : > { %v1273_v17 = vmax.f32 %v1261_v43, 0.0  ;;  %5784 = vmatmul.mubr.msk.f32.gmra.mxu0 %vm1472_vm9, %v1910_v56  ;;  %v2597_v7 = vld [vmem:[#allocation3 + $0x25] sm:$0xff] }
 0x296   : > { %5815 = vmatmul.mubr.msk.f32.gmra.mxu1 %vm1472_vm9, %v1890_v26  ;;  %v1801_v29 = vmax.f32 %v1797_v46, %v1799_v41  ;;  %v7348_v56 = vld [vmem:[#allocation3 + $0x22] sm:$0xff]  ;;  %v2598_v26 = vld [vmem:[#allocation3 + $0x2d] sm:$0xff] }
 0x297   : > { %v1792_v58 = vld [vmem:[#allocation2 + $0x224] ss:$2 sm:$0x1f]  ;;  %v1796_v27 = vld [vmem:[#allocation2 + $0x225] ss:$2 sm:$0x1f]  ;;  %v1431_v63 = vpop.trf.xlu0 }
 0x298   : > { %1803 = vst.msk [vmem:[#allocation3 + $0x75] sm:$0xff] %vm1472_vm9, %v1801_v29  ;;  %v1800_v22 = vmax.f32 %v1792_v58, %v1796_v27  ;;  %1544 = vst.msk [vmem:[#allocation2 + $0x238] sm:$0xff] %vm1472_vm9, %v1431_v63  ;;  %1440 = vxpose.xlu1.b32.start [1/2] (short) (narrow) %v1273_v17, 88  ;;  %v7353_v46 = vld [vmem:[#allocation3 + $0x2a] sm:$0xff]  ;;  %v7368_v61 = vld [vmem:[#allocation3 + $0x42] sm:$0xff]  ;;  %v1118_v27 = vsel %vm1106_vm6, %v7105_v14, %v7290_v34 }
 0x299   : > { %v2601_v19 = vld [vmem:[#allocation3 + $0x45] sm:$0xff]  ;;  %v2602_v41 = vld [vmem:[#allocation3 + $0x4d] sm:$0xff]  ;;  %v5384_v58 = vld [vmem:[%s8023_s3 + $0x58] sm:$0x3] }
 0x29a   : > { %v1802_v3 = vmax.f32 %v1798_v33, %v1800_v22  ;;  %v1206_v33 = vpop.permute.xlu1 %1205  ;;  %v7382_v63 = vld [vmem:[#allocation3 + $0x4a] sm:$0xff]  ;;  %v2603_v22 = vld [vmem:[#allocation3 + $0x55] sm:$0xff]  ;;  %5916 = vmatprep.subr.msk.mxu1 %vm1972_vm8, %v5384_v58 }
 0x29b   : > { %v1432_v35 = vpop.trf.xlu0  ;;  %v7396_v34 = vld [vmem:[#allocation3 + $0x5a] sm:$0xff] }
 0x29c   : > { %1804 = vst.msk [vmem:[#allocation3 + $0x7d] sm:$0x1f] %vm1587_vm10, %v1802_v3  ;;  %v2604_v3 = vld [vmem:[#allocation3 + $0x5d] sm:$0xff] }
 0x29d   : > { %1545 = vst.msk [vmem:[#allocation2 + $0x240] sm:$0xff] %vm1472_vm9, %v1432_v35  ;;  %v1219_v35 = vsel %vm1207_vm7, %v7131_v49, %v1206_v33  ;;  %v2606_v49 = vld [vmem:[#allocation3 + $0x6d] sm:$0xff] }
 0x29f   : > { %v1433_v37 = vpop.trf.xlu0  ;;  %v1911_v18 = vld [vmem:[#allocation3 + $0x71] sm:$0xff]  ;;  %v1810_v24 = vld [vmem:[#allocation2 + $0x231] ss:$2 sm:$0xff] }
 0x2a0   : > { %1546 = vst.msk [vmem:[#allocation2 + $0x248] sm:$0xff] %vm1472_vm9, %v1433_v37  ;;  %5786 = vmatprep.mubr.msk.f32.mxu0 %vm1472_vm9, %v1911_v18  ;;  %v1891_v52 = vld [vmem:[#allocation3 + $0x70] sm:$0xff]  ;;  %v1806_v10 = vld [vmem:[#allocation2 + $0x230] ss:$2 sm:$0xff] }
 0x2a1   : > { %5817 = vmatprep.mubr.msk.f32.mxu1 %vm1472_vm9, %v1891_v52  ;;  %v1821_v28 = vmax.f32 %v1806_v10, %v1810_v24  ;;  %v2605_v37 = vld [vmem:[#allocation3 + $0x65] sm:$0xff]  ;;  %v5405_v10 = vld [vmem:[%s8023_s3 + $0x68] sm:$0x3] }
 0x2a2   : > { %v7402_v52 = vld [vmem:[#allocation3 + $0x62] sm:$0xff] }
 0x2a3   : > { %v1434_v23 = vpop.trf.xlu0  ;;  %v1912_v9 = vld [vmem:[#allocation3 + $0x79] sm:$0xff] }
 0x2a4   : > { %v1892_v21 = vld [vmem:[#allocation3 + $0x78] sm:$0xff]  ;;  %1547 = vst.msk [vmem:[#allocation2 + $0x250] sm:$0xff] %vm1472_vm9, %v1434_v23  ;;  %5787 = vmatmul.mubr.msk.f32.gmra.mxu0 %vm1472_vm9, %v1912_v9  ;;  %v7407_v9 = vld [vmem:[#allocation3 + $0x6a] sm:$0xff] }
 0x2a5   : > { %5818 = vmatmul.mubr.msk.f32.gmra.mxu1 %vm1472_vm9, %v1892_v21  ;;  %v2607_v21 = vld [vmem:[#allocation3 + $0x75] sm:$0xff] }
 0x2a6   : > { %v7420_v24 = vld [vmem:[#allocation3 + $0x7a] sm:$0xff] }
 0x2a7   : > { %v1435_v47 = vpop.trf.xlu0  ;;  %v1808_v45 = vld [vmem:[#allocation2 + $0x240] ss:$2 sm:$0x1f]  ;;  %v1812_v16 = vld [vmem:[#allocation2 + $0x241] ss:$2 sm:$0x1f] }
 0x2a8   : > { %1548 = vst.msk [vmem:[#allocation2 + $0x258] sm:$0xff] %vm1472_vm9, %v1435_v47  ;;  %v1822_v36 = vmax.f32 %v1808_v45, %v1812_v16  ;;  %v2845_v16 = vld [vmem:[#allocation3 + $0xe] sm:$0xff] }
 0x2ab   : > { %v1436_v55 = vpop.trf.xlu0 }
 0x2ac   : > { %1549 = vst.msk [vmem:[#allocation2 + $0x260] sm:$0xff] %vm1472_vm9, %v1436_v55 }
 0x2af   : > { %v1814_v20 = vld [vmem:[#allocation2 + $0x24c] ss:$2 sm:$0xff]  ;;  %v1818_v5 = vld [vmem:[#allocation2 + $0x24d] ss:$2 sm:$0xff]  ;;  %v1437_v60 = vpop.trf.xlu0 }
 0x2b0   : > { %v1823_v11 = vmax.f32 %v1814_v20, %v1818_v5  ;;  %1550 = vst.msk [vmem:[#allocation2 + $0x268] sm:$0xff] %vm1472_vm9, %v1437_v60  ;;  %v2846_v20 = vld [vmem:[#allocation3 + $0x16] sm:$0xff]  ;;  %v2847_v5 = vld [vmem:[#allocation3 + $0x1e] sm:$0xff]  ;;  %v2848_v60 = vld [vmem:[#allocation3 + $0x26] sm:$0xff] }
 0x2b2   : > { %v1825_v30 = vmax.f32 %v1821_v28, %v1823_v11  ;;  %v2849_v11 = vld [vmem:[#allocation3 + $0x2e] sm:$0xff] }
 0x2b3   : > { %v1816_v25 = vld [vmem:[#allocation2 + $0x25c] ss:$2 sm:$0x1f]  ;;  %v1820_v13 = vld [vmem:[#allocation2 + $0x25d] ss:$2 sm:$0x1f]  ;;  %v1438_v40 = vpop.trf.xlu0 }
 0x2b4   : > { %1827 = vst.msk [vmem:[#allocation3 + $0x82] sm:$0xff] %vm1472_vm9, %v1825_v30  ;;  %v1824_v12 = vmax.f32 %v1816_v25, %v1820_v13  ;;  %1551 = vst.msk [vmem:[#allocation2 + $0x270] sm:$0xff] %vm1472_vm9, %v1438_v40  ;;  %v5404_v30 = vld [vmem:[%s8023_s3 + $0x60] sm:$0xff]  ;;  %v2850_v25 = vld [vmem:[#allocation3 + $0x36] sm:$0xff] }
 0x2b5   : > { %v2851_v13 = vld [vmem:[#allocation3 + $0x3e] sm:$0xff]  ;;  %v2852_v40 = vld [vmem:[#allocation3 + $0x46] sm:$0xff] }
 0x2b6   : > { %v1826_v48 = vmax.f32 %v1822_v36, %v1824_v12  ;;  %v5383_v36 = vld [vmem:[%s8023_s3 + $0x50] sm:$0xff]  ;;  %v2853_v12 = vld [vmem:[#allocation3 + $0x4e] sm:$0xff] }
 0x2b7   : > { %v1439_v8 = vpop.trf.xlu0 }
 0x2b8   : > { %1828 = vst.msk [vmem:[#allocation3 + $0x8a] sm:$0x1f] %vm1587_vm10, %v1826_v48  ;;  %v2854_v48 = vld [vmem:[#allocation3 + $0x56] sm:$0xff] }
 0x2b9   : > { %1552 = vst.msk [vmem:[#allocation2 + $0x278] sm:$0xff] %vm1472_vm9, %v1439_v8  ;;  %v2855_v8 = vld [vmem:[#allocation3 + $0x5e] sm:$0xff] }
 0x2bb   : > { %v1913_v15 = vld [vmem:[#allocation3 + $0x81] sm:$0xff] }
 0x2bc   : > { %v1893_v31 = vld [vmem:[#allocation3 + $0x80] sm:$0xff]  ;;  %5789 = vmatprep.mubr.msk.f32.mxu0 %vm1472_vm9, %v1913_v15 }
 0x2bd   : > { %5820 = vmatprep.mubr.msk.f32.mxu1 %vm1472_vm9, %v1893_v31  ;;  %v2608_v47 = vld [vmem:[#allocation3 + $0x7d] sm:$0xff]  ;;  %v2856_v31 = vld [vmem:[#allocation3 + $0x66] sm:$0xff] }
 0x2be   : > { %v7426_v28 = vld [vmem:[#allocation3 + $0x82] sm:$0xff]  ;;  %v7452_v15 = vld [vmem:[%s8023_s3 + $0x78] sm:$0x3] }
 0x2bf   : > { %v1914_v62 = vld [vmem:[#allocation3 + $0x89] sm:$0x1f] }
 0x2c0   : > { %v1894_v42 = vld [vmem:[#allocation3 + $0x88] sm:$0x1f]  ;;  %5790 = vmatmul.mubr.msk.f32.gmra.mxu0 %vm1472_vm9, %v1914_v62 }
 0x2c1   : > { %5821 = vmatmul.mubr.msk.f32.gmra.mxu1 %vm1472_vm9, %v1894_v42  ;;  %5827 = vmatprep.mubr.msk.f32.mxu0 %vm1472_vm9, %v2343_v54  ;;  %v2609_v55 = vld [vmem:[#allocation3 + $0x85] sm:$0xff]  ;;  %v2857_v42 = vld [vmem:[#allocation3 + $0x6e] sm:$0xff] }
 0x2c2   : > { %5858 = vmatprep.mubr.msk.f32.mxu1 %vm1472_vm9, %v2594_v44  ;;  %v2360_v45 = vld [vmem:[#allocation3 + $0x8a] sm:$0x1f] }
 0x2c4   : > { %5828 = vmatmul.mubr.msk.f32.vlgmr.msra.gmra.mxu0 %vm1472_vm9, %v2344_v59 }
 0x2c5   : > { %5859 = vmatmul.mubr.msk.f32.vlgmr.msra.gmra.mxu1 %vm1472_vm9, %v2595_v51  ;;  %5830 = vmatprep.mubr.msk.f32.mxu0 %vm1472_vm9, %v2345_v53  ;;  %v2858_v53 = vld [vmem:[#allocation3 + $0x76] sm:$0xff] }
 0x2c6   : > { %5861 = vmatprep.mubr.msk.f32.mxu1 %vm1472_vm9, %v2596_v2  ;;  %5886 = vmatpush3.msk.msra.mxu0 %vm1972_vm8, %v7263_v39  ;;  %v2599_v39 = vld [vmem:[#allocation3 + $0x35] sm:$0xff] }
 0x2c7   : > { %5887 = vmatprep.subr.mxu0 %v5362_v0  ;;  %5917 = vmatpush3.msk.msra.mxu1 %vm1972_vm8, %v5384_v58 }
 0x2c8   : > { %5831 = vmatmul.mubr.msk.f32.gmra.mxu0 %vm1472_vm9, %v7343_v57  ;;  %5918 = vmatprep.subr.mxu1 %v5383_v36 }
 0x2c9   : > { %5862 = vmatmul.mubr.msk.f32.gmra.mxu1 %vm1472_vm9, %v2597_v7  ;;  %5833 = vmatprep.mubr.msk.f32.mxu0 %vm1472_vm9, %v7348_v56  ;;  %v2860_v7 = vld [vmem:[#allocation3 + $0x86] sm:$0xff] }
 0x2ca   : > { %5864 = vmatprep.mubr.msk.f32.mxu1 %vm1472_vm9, %v2598_v26  ;;  %5888 = vmatpush3.msra.mxu0 %v5362_v0  ;;  %v2859_v0 = vld [vmem:[#allocation3 + $0x7e] sm:$0xff]  ;;  %v7468_v26 = vld [vmem:[%s8023_s3 + $0x88] sm:$0x3] }
 0x2cb   : > { %5947 = vmatprep.subr.msk.mxu0 %vm1972_vm8, %v5405_v10  ;;  %5919 = vmatpush3.msra.mxu1 %v5383_v36 }
 0x2cc   : > { %5834 = vmatmul.mubr.msk.f32.gmra.mxu0 %vm1472_vm9, %v7353_v46  ;;  %5978 = vmatprep.subr.msk.mxu1 %vm1972_vm8, %v7452_v15 }
 0x2cd   : > { %5865 = vmatmul.mubr.msk.f32.gmra.mxu1 %vm1472_vm9, %v2599_v39  ;;  %5836 = vmatprep.mubr.msk.f32.mxu0 %vm1472_vm9, %v7358_v6 }
 0x2ce   : > { %5867 = vmatprep.mubr.msk.f32.mxu1 %vm1472_vm9, %v2600_v50 }
 0x2d0   : > { %v1004_v43 = vpop.permute.xlu0 %1003  ;;  %5837 = vmatmul.mubr.msk.f32.gmra.mxu0 %vm1472_vm9, %v7363_v38 }
 0x2d1   : > { %5868 = vmatmul.mubr.msk.f32.gmra.mxu1 %vm1472_vm9, %v2601_v19  ;;  %v1017_v17 = vsel %vm1005_vm5, %v7095_v1, %v1004_v43  ;;  %5839 = vmatprep.mubr.msk.f32.mxu0 %vm1472_vm9, %v7368_v61 }
 0x2d2   : > { %5870 = vmatprep.mubr.msk.f32.mxu1 %vm1472_vm9, %v2602_v41  ;;  %v1041_v29 = vadd.f32 %v1017_v17, %v7088_v32  ;;  %v7388_v32 = vld [vmem:[#allocation3 + $0x52] sm:$0xff] }
 0x2d4   : > { %v1142_v1 = vadd.f32 %v1118_v27, %v1041_v29  ;;  %5840 = vmatmul.mubr.msk.f32.gmra.mxu0 %vm1472_vm9, %v7382_v63 }
 0x2d5   : > { %5871 = vmatmul.mubr.msk.f32.gmra.mxu1 %vm1472_vm9, %v2603_v22  ;;  %5842 = vmatprep.mubr.msk.f32.mxu0 %vm1472_vm9, %v7388_v32 }
 0x2d6   : > { %5873 = vmatprep.mubr.msk.f32.mxu1 %vm1472_vm9, %v2604_v3  ;;  %v1243_v14 = vadd.f32 %v1219_v35, %v1142_v1 }
 0x2d8   : > { %v1267_v18 = vadd.f32 %v6676_v4, %v1243_v14  ;;  %5843 = vmatmul.mubr.msk.f32.gmra.mxu0 %vm1472_vm9, %v7396_v34  ;;  %v7412_v4 = vld [vmem:[#allocation3 + $0x72] sm:$0xff] }
 0x2d9   : > { %5874 = vmatmul.mubr.msk.f32.gmra.mxu1 %vm1472_vm9, %v2605_v37  ;;  %5845 = vmatprep.mubr.msk.f32.mxu0 %vm1472_vm9, %v7402_v52 }
 0x2da   : > { %5876 = vmatprep.mubr.msk.f32.mxu1 %vm1472_vm9, %v2606_v49  ;;  %v1279_v23 = vmax.f32 %v1267_v18, 0.0 }
 0x2dc   : > { %5846 = vmatmul.mubr.msk.f32.gmra.mxu0 %vm1472_vm9, %v7407_v9  ;;  %1441 = vxpose.xlu1.b32.end [2/2] (short) (narrow) %v1279_v23, 88 }
 0x2dd   : > { %5877 = vmatmul.mubr.msk.f32.gmra.mxu1 %vm1472_vm9, %v2607_v21  ;;  %5848 = vmatprep.mubr.msk.f32.mxu0 %vm1472_vm9, %v7412_v4 }
 0x2de   : > { %5879 = vmatprep.mubr.msk.f32.mxu1 %vm1472_vm9, %v2608_v47 }
 0x2e0   : > { %5849 = vmatmul.mubr.msk.f32.gmra.mxu0 %vm1472_vm9, %v7420_v24 }
 0x2e1   : > { %5880 = vmatmul.mubr.msk.f32.gmra.mxu1 %vm1472_vm9, %v2609_v55  ;;  %5851 = vmatprep.mubr.msk.f32.mxu0 %vm1472_vm9, %v7426_v28 }
 0x2e4   : > { %5852 = vmatmul.mubr.msk.f32.gmra.mxu0 %vm1472_vm9, %v2360_v45 }
 0x2e5   : > { %5889 = vmatprep.mubr.msk.f32.mxu0 %vm1472_vm9, %v2845_v16 }
 0x2e8   : > { %5890 = vmatmul.mubr.msk.f32.vlgmr.msra.gmra.mxu0 %vm1472_vm9, %v2846_v20 }
 0x2e9   : > { %5892 = vmatprep.mubr.msk.f32.mxu0 %vm1472_vm9, %v2847_v5  ;;  %5948 = vmatpush3.msk.msra.mxu0 %vm1972_vm8, %v5405_v10 }
 0x2ea   : > { %5949 = vmatprep.subr.mxu0 %v5404_v30 }
 0x2eb   : > { %5950 = vmatpush3.msra.mxu0 %v5404_v30 }
 0x2ec   : > { %5893 = vmatmul.mubr.msk.f32.gmra.mxu0 %vm1472_vm9, %v2848_v60  ;;  %6009 = vmatprep.subr.msk.mxu0 %vm1972_vm8, %v7468_v26 }
 0x2ed   : > { %5895 = vmatprep.mubr.msk.f32.mxu0 %vm1472_vm9, %v2849_v11 }
 0x2f0   : > { %5896 = vmatmul.mubr.msk.f32.gmra.mxu0 %vm1472_vm9, %v2850_v25 }
 0x2f1   : > { %5898 = vmatprep.mubr.msk.f32.mxu0 %vm1472_vm9, %v2851_v13 }
 0x2f4   : > { %5899 = vmatmul.mubr.msk.f32.gmra.mxu0 %vm1472_vm9, %v2852_v40 }
 0x2f5   : > { %5901 = vmatprep.mubr.msk.f32.mxu0 %vm1472_vm9, %v2853_v12 }
 0x2f8   : > { %5902 = vmatmul.mubr.msk.f32.gmra.mxu0 %vm1472_vm9, %v2854_v48 }
 0x2f9   : > { %5904 = vmatprep.mubr.msk.f32.mxu0 %vm1472_vm9, %v2855_v8 }
 0x2fb   : > { %v5767_v62 = vpop.f32.mrf.mxu0 }
 0x2fc   : > { %5905 = vmatmul.mubr.msk.f32.gmra.mxu0 %vm1472_vm9, %v2856_v31  ;;  %v5798_v54 = vpop.f32.mrf.mxu1 }
 0x2fd   : > { %5907 = vmatprep.mubr.msk.f32.mxu0 %vm1472_vm9, %v2857_v42  ;;  %v7458_v44 = vadd.f32 %v5798_v54, %v5767_v62  ;;  %v2042_v59 = vpop.f32.mrf.mxu0  ;;  %v1830_v54 = vld [vmem:[#allocation2 + $0x268] ss:$2 sm:$0xff] }
 0x2fe   : > { %v2254_v51 = vpop.f32.mrf.mxu1 }
 0x2ff   : > { %v7460_v2 = vadd.f32 %v2254_v51, %v2042_v59  ;;  %v1834_v59 = vld [vmem:[#allocation2 + $0x269] ss:$2 sm:$0xff] }
 0x300   : > { %5908 = vmatmul.mubr.msk.f32.gmra.mxu0 %vm1472_vm9, %v2858_v53 }
 0x301   : > { %5910 = vmatprep.mubr.msk.f32.mxu0 %vm1472_vm9, %v2859_v0 }
 0x304   : > { %5911 = vmatmul.mubr.msk.f32.gmra.mxu0 %vm1472_vm9, %v2860_v7 }
 0x307   : > { %v5770_v39 = vpop.f32.mrf.mxu0 }
 0x308   : > { %v5801_v50 = vpop.f32.mrf.mxu1 }
 0x309   : > { %v7472_v19 = vadd.f32 %v5801_v50, %v5770_v39  ;;  %v2052_v43 = vpop.f32.mrf.mxu0 }
 0x30a   : > { %v2264_v41 = vpop.f32.mrf.mxu1 }
 0x30b   : > { %v7474_v17 = vadd.f32 %v2264_v41, %v2052_v43  ;;  %v5773_v33 = vpop.f32.mrf.mxu0  ;;  %v1845_v43 = vmax.f32 %v1830_v54, %v1834_v59  ;;  %v5446_v54 = vld [vmem:[%s8023_s3 + $0x80] sm:$0xff] }
 0x30c   : > { %v5804_v29 = vpop.f32.mrf.mxu1 }
 0x30d   : > { %v7476_v58 = vadd.f32 %v5804_v29, %v5773_v33  ;;  %v2062_v27 = vpop.f32.mrf.mxu0 }
 0x30e   : > { %v2274_v22 = vpop.f32.mrf.mxu1 }
 0x30f   : > { %v7478_v1 = vadd.f32 %v2274_v22, %v2062_v27 }
 0x318   : > { %v5776_v3 = vpop.f32.mrf.mxu0 }
 0x319   : > { %v5807_v35 = vpop.f32.mrf.mxu1 }
 0x31a   : > { %v7480_v14 = vadd.f32 %v5807_v35, %v5776_v3  ;;  %v2072_v37 = vpop.f32.mrf.mxu0 }
 0x31b   : > { %v2284_v18 = vpop.f32.mrf.mxu1 }
 0x31c   : > { %v7482_v49 = vadd.f32 %v2284_v18, %v2072_v37 }
 0x34d   : > { %v5779_v23 = vpop.f32.mrf.mxu0 }
 0x34e   : > { %v5810_v21 = vpop.f32.mrf.mxu1 }
 0x34f   : > { %v7484_v47 = vadd.f32 %v5810_v21, %v5779_v23  ;;  %v2082_v10 = vpop.f32.mrf.mxu0 }
 0x350   : > { %v2294_v55 = vpop.f32.mrf.mxu1 }
 0x351   : > { %v7486_v45 = vadd.f32 %v2294_v55, %v2082_v10  ;;  %v5782_v16 = vpop.f32.mrf.mxu0 }
 0x352   : > { %v5813_v20 = vpop.f32.mrf.mxu1 }
 0x353   : > { %v7488_v5 = vadd.f32 %v5813_v20, %v5782_v16  ;;  %v2092_v60 = vpop.f32.mrf.mxu0 }
 0x354   : > { %v2304_v11 = vpop.f32.mrf.mxu1  ;;  %v1456_v30 = vpop.trf.xlu1 }
 0x355   : > { %v7490_v36 = vadd.f32 %v2304_v11, %v2092_v60  ;;  %v5785_v25 = vpop.f32.mrf.mxu0  ;;  %1553 = vst.msk [vmem:[#allocation2 + $0x280] sm:$0xff] %vm1472_vm9, %v1456_v30 }
 0x356   : > { %v5816_v13 = vpop.f32.mrf.mxu1 }
 0x357   : > { %v7493_v40 = vadd.f32 %v5816_v13, %v5785_v25  ;;  %v2102_v12 = vpop.f32.mrf.mxu0 }
 0x358   : > { %v2314_v48 = vpop.f32.mrf.mxu1  ;;  %v1457_v8 = vpop.trf.xlu1 }
 0x359   : > { %v7495_v31 = vadd.f32 %v2314_v48, %v2102_v12  ;;  %1554 = vst.msk [vmem:[#allocation2 + $0x288] sm:$0xff] %vm1472_vm9, %v1457_v8  ;;  %v3096_v12 = vld [vmem:[#allocation3 + $0xf] sm:$0xff]  ;;  %v3097_v8 = vld [vmem:[#allocation3 + $0x17] sm:$0xff] }
 0x35c   : > { %v1458_v62 = vpop.trf.xlu1  ;;  %v1832_v27 = vld [vmem:[#allocation2 + $0x278] ss:$2 sm:$0x1f]  ;;  %v1836_v22 = vld [vmem:[#allocation2 + $0x279] ss:$2 sm:$0x1f] }
 0x35d   : > { %1555 = vst.msk [vmem:[#allocation2 + $0x290] sm:$0xff] %vm1472_vm9, %v1458_v62  ;;  %v1846_v21 = vmax.f32 %v1832_v27, %v1836_v22  ;;  %v3098_v62 = vld [vmem:[#allocation3 + $0x1f] sm:$0xff] }
 0x360   : > { %v1459_v42 = vpop.trf.xlu1 }
 0x361   : > { %1556 = vst.msk [vmem:[#allocation2 + $0x298] sm:$0xff] %vm1472_vm9, %v1459_v42  ;;  %v5425_v42 = vld [vmem:[%s8023_s3 + $0x70] sm:$0xff] }
 0x364   : > { %v5788_v51 = vpop.f32.mrf.mxu0  ;;  %v1838_v0 = vld [vmem:[#allocation2 + $0x284] ss:$2 sm:$0xff]  ;;  %v1842_v7 = vld [vmem:[#allocation2 + $0x285] ss:$2 sm:$0xff]  ;;  %v1460_v50 = vpop.trf.xlu1 }
 0x365   : > { %v5819_v53 = vpop.f32.mrf.mxu1  ;;  %v1847_v41 = vmax.f32 %v1838_v0, %v1842_v7  ;;  %1557 = vst.msk [vmem:[#allocation2 + $0x2a0] sm:$0xff] %vm1472_vm9, %v1460_v50  ;;  %v3101_v7 = vld [vmem:[#allocation3 + $0x37] sm:$0xff] }
 0x366   : > { %v7500_v39 = vadd.f32 %v5819_v53, %v5788_v51  ;;  %v2112_v33 = vpop.f32.mrf.mxu0 }
 0x367   : > { %v2324_v29 = vpop.f32.mrf.mxu1  ;;  %v1849_v35 = vmax.f32 %v1845_v43, %v1847_v41 }
 0x368   : > { %v7503_v3 = vadd.f32 %v2324_v29, %v2112_v33  ;;  %v1840_v37 = vld [vmem:[#allocation2 + $0x294] ss:$2 sm:$0x1f]  ;;  %v1844_v18 = vld [vmem:[#allocation2 + $0x295] ss:$2 sm:$0x1f]  ;;  %v1461_v23 = vpop.trf.xlu1 }
 0x369   : > { %1851 = vst.msk [vmem:[#allocation3 + $0x8f] sm:$0xff] %vm1472_vm9, %v1849_v35  ;;  %v1848_v10 = vmax.f32 %v1840_v37, %v1844_v18  ;;  %1558 = vst.msk [vmem:[#allocation2 + $0x2a8] sm:$0xff] %vm1472_vm9, %v1461_v23  ;;  %v3102_v33 = vld [vmem:[#allocation3 + $0x3f] sm:$0xff]  ;;  %v3103_v37 = vld [vmem:[#allocation3 + $0x47] sm:$0xff] }
 0x36b   : > { %v1850_v55 = vmax.f32 %v1846_v21, %v1848_v10 }
 0x36c   : > { %v1462_v16 = vpop.trf.xlu1 }
 0x36d   : > { %1852 = vst.msk [vmem:[#allocation3 + $0x97] sm:$0x1f] %vm1587_vm10, %v1850_v55 }
 0x36e   : > { %1559 = vst.msk [vmem:[#allocation2 + $0x2b0] sm:$0xff] %vm1472_vm9, %v1462_v16 }
 0x370   : > { %v1463_v20 = vpop.trf.xlu1  ;;  %v2610_v60 = vld [vmem:[#allocation3 + $0x8d] sm:$0xff] }
 0x371   : > { %1560 = vst.msk [vmem:[#allocation2 + $0x2b8] sm:$0xff] %vm1472_vm9, %v1463_v20  ;;  %5882 = vmatprep.mubr.msk.f32.mxu1 %vm1472_vm9, %v2610_v60  ;;  %v2861_v11 = vld [vmem:[#allocation3 + $0x8e] sm:$0xff] }
 0x372   : > { %5913 = vmatprep.mubr.msk.f32.mxu0 %vm1472_vm9, %v2861_v11  ;;  %v1854_v59 = vld [vmem:[#allocation2 + $0x2a0] ss:$2 sm:$0xff]  ;;  %v1858_v51 = vld [vmem:[#allocation2 + $0x2a1] ss:$2 sm:$0xff] }
 0x373   : > { %v1869_v50 = vmax.f32 %v1854_v59, %v1858_v51 }
 0x374   : > { %v1464_v30 = vpop.trf.xlu1  ;;  %v2611_v25 = vld [vmem:[#allocation3 + $0x95] sm:$0x1f] }
 0x375   : > { %v2862_v13 = vld [vmem:[#allocation3 + $0x96] sm:$0x1f]  ;;  %1561 = vst.msk [vmem:[#allocation2 + $0x2c0] sm:$0xff] %vm1472_vm9, %v1464_v30  ;;  %5883 = vmatmul.mubr.msk.f32.gmra.mxu1 %vm1472_vm9, %v2611_v25 }
 0x376   : > { %5914 = vmatmul.mubr.msk.f32.gmra.mxu0 %vm1472_vm9, %v2862_v13  ;;  %5920 = vmatprep.mubr.msk.f32.mxu1 %vm1472_vm9, %v3096_v12 }
 0x377   : > { %5951 = vmatprep.mubr.msk.f32.mxu0 %vm1472_vm9, %v7343_v57 }
 0x378   : > { %v1465_v48 = vpop.trf.xlu1  ;;  %v1856_v29 = vld [vmem:[#allocation2 + $0x2b0] ss:$2 sm:$0x1f]  ;;  %v1860_v27 = vld [vmem:[#allocation2 + $0x2b1] ss:$2 sm:$0x1f] }
 0x379   : > { %1562 = vst.msk [vmem:[#allocation2 + $0x2c8] sm:$0xff] %vm1472_vm9, %v1465_v48  ;;  %5921 = vmatmul.mubr.msk.f32.vlgmr.msra.gmra.mxu1 %vm1472_vm9, %v3097_v8  ;;  %v1870_v10 = vmax.f32 %v1856_v29, %v1860_v27  ;;  %v3106_v48 = vld [vmem:[#allocation3 + $0x5f] sm:$0xff]  ;;  %v3112_v27 = vld [vmem:[#allocation3 + $0x8f] sm:$0xff] }
 0x37a   : > { %5952 = vmatmul.mubr.msk.f32.vlgmr.msra.gmra.mxu0 %vm1472_vm9, %v7348_v56  ;;  %5979 = vmatpush3.msk.msra.mxu1 %vm1972_vm8, %v7452_v15  ;;  %v3099_v56 = vld [vmem:[#allocation3 + $0x27] sm:$0xff]  ;;  %v3100_v15 = vld [vmem:[#allocation3 + $0x2f] sm:$0xff] }
 0x37b   : > { %5923 = vmatprep.mubr.msk.f32.mxu1 %vm1472_vm9, %v3098_v62  ;;  %5954 = vmatprep.mubr.msk.f32.mxu0 %vm1472_vm9, %v7353_v46 }
 0x37c   : > { %6010 = vmatpush3.msk.msra.mxu0 %vm1972_vm8, %v7468_v26  ;;  %v1466_v57 = vpop.trf.xlu1  ;;  %5980 = vmatprep.subr.mxu1 %v5425_v42 }
 0x37d   : > { %6011 = vmatprep.subr.mxu0 %v5446_v54  ;;  %1564 = vst.msk [vmem:[#allocation2 + $0x2d0] sm:$0x3f] %vm1563_vm11, %v1466_v57  ;;  %5924 = vmatmul.mubr.msk.f32.gmra.mxu1 %vm1472_vm9, %v3099_v56  ;;  %v3107_v57 = vld [vmem:[#allocation3 + $0x67] sm:$0xff] }
 0x37e   : > { %5955 = vmatmul.mubr.msk.f32.gmra.mxu0 %vm1472_vm9, %v7358_v6  ;;  %5926 = vmatprep.mubr.msk.f32.mxu1 %vm1472_vm9, %v3100_v15 }
 0x37f   : > { %5957 = vmatprep.mubr.msk.f32.mxu0 %vm1472_vm9, %v7363_v38  ;;  %5981 = vmatpush3.msra.mxu1 %v5425_v42 }
 0x380   : > { %v5791_v46 = vpop.f32.mrf.mxu0  ;;  %6012 = vmatpush3.msra.mxu0 %v5446_v54  ;;  %v1862_v53 = vld [vmem:[#allocation2 + $0x2bc] ss:$2 sm:$0xff]  ;;  %v1866_v0 = vld [vmem:[#allocation2 + $0x2bd] ss:$2 sm:$0xff] }
 0x381   : > { %v5822_v26 = vpop.f32.mrf.mxu1  ;;  %v1871_v43 = vmax.f32 %v1862_v53, %v1866_v0  ;;  %5927 = vmatmul.mubr.msk.f32.gmra.mxu1 %vm1472_vm9, %v3101_v7  ;;  %v3361_v0 = vld [vmem:[#allocation3 + $0x8a] sm:$0xff] }
 0x382   : > { %5958 = vmatmul.mubr.msk.f32.gmra.mxu0 %vm1472_vm9, %v7368_v61  ;;  %v2122_v6 = vpop.f32.mrf.mxu0  ;;  %5929 = vmatprep.mubr.msk.f32.mxu1 %vm1472_vm9, %v3102_v33  ;;  %v3109_v26 = vld [vmem:[#allocation3 + $0x77] sm:$0xff] }
 0x383   : > { %v2334_v41 = vpop.f32.mrf.mxu1  ;;  %5960 = vmatprep.mubr.msk.f32.mxu0 %vm1472_vm9, %v7382_v63  ;;  %v1873_v38 = vmax.f32 %v1869_v50, %v1871_v43  ;;  %v3104_v63 = vld [vmem:[#allocation3 + $0x4f] sm:$0xff] }
 0x384   : > { %v5829_v22 = vpop.f32.mrf.mxu0  ;;  %v1864_v18 = vld [vmem:[#allocation2 + $0x2cc] ss:$2 sm:$0x1f]  ;;  %v1868_v23 = vld [vmem:[#allocation2 + $0x2cd] ss:$2 sm:$0x1f] }
 0x385   : > { %v5860_v35 = vpop.f32.mrf.mxu1  ;;  %v2577_v21 = vadd.f32 %v5829_v22, %v7458_v44  ;;  %1875 = vst.msk [vmem:[#allocation3 + $0x9c] sm:$0xff] %vm1472_vm9, %v1873_v38  ;;  %v1872_v61 = vmax.f32 %v1864_v18, %v1868_v23  ;;  %5930 = vmatmul.mubr.msk.f32.gmra.mxu1 %vm1472_vm9, %v3103_v37  ;;  %v3111_v41 = vld [vmem:[#allocation3 + $0x87] sm:$0xff]  ;;  %v3113_v23 = vld [vmem:[#allocation3 + $0x97] sm:$0x1f] }
 0x386   : > { %5961 = vmatmul.mubr.msk.f32.gmra.mxu0 %vm1472_vm9, %v7388_v32  ;;  %v2487_v55 = vpop.f32.mrf.mxu0  ;;  %5932 = vmatprep.mubr.msk.f32.mxu1 %vm1472_vm9, %v3104_v63  ;;  %v3105_v32 = vld [vmem:[#allocation3 + $0x57] sm:$0xff] }
 0x387   : > { %v2738_v16 = vpop.f32.mrf.mxu1  ;;  %v7552_v20 = vadd.f32 %v5860_v35, %v2577_v21  ;;  %v2576_v60 = vadd.f32 %v2487_v55, %v7460_v2  ;;  %5963 = vmatprep.mubr.msk.f32.mxu0 %vm1472_vm9, %v7396_v34  ;;  %v1874_v44 = vmax.f32 %v1870_v10, %v1872_v61  ;;  %v3598_v55 = vld [vmem:[#allocation3 + $0x1b] sm:$0xff] }
 0x388   : > { %v5832_v11 = vpop.f32.mrf.mxu0 }
 0x389   : > { %v5863_v30 = vpop.f32.mrf.mxu1  ;;  %v7558_v25 = vadd.f32 %v2738_v16, %v2576_v60  ;;  %v2579_v13 = vadd.f32 %v5832_v11, %v7472_v19  ;;  %1876 = vst.msk [vmem:[#allocation3 + $0xa4] sm:$0x1f] %vm1587_vm10, %v1874_v44  ;;  %5933 = vmatmul.mubr.msk.f32.gmra.mxu1 %vm1472_vm9, %v3105_v32 }
 0x38a   : > { %5964 = vmatmul.mubr.msk.f32.gmra.mxu0 %vm1472_vm9, %v7402_v52  ;;  %v2497_v2 = vpop.f32.mrf.mxu0  ;;  %5935 = vmatprep.mubr.msk.f32.mxu1 %vm1472_vm9, %v3106_v48 }
 0x38b   : > { %v2748_v12 = vpop.f32.mrf.mxu1  ;;  %v7565_v8 = vadd.f32 %v5863_v30, %v2579_v13  ;;  %v2578_v34 = vadd.f32 %v2497_v2, %v7474_v17  ;;  %5966 = vmatprep.mubr.msk.f32.mxu0 %vm1472_vm9, %v7407_v9  ;;  %v3108_v17 = vld [vmem:[#allocation3 + $0x6f] sm:$0xff]  ;;  %v3599_v30 = vld [vmem:[#allocation3 + $0x23] sm:$0xff] }
 0x38c   : > { %v5835_v19 = vpop.f32.mrf.mxu0  ;;  %v3850_v13 = vld [vmem:[#allocation3 + $0x24] sm:$0xff] }
 0x38d   : > { %v5866_v62 = vpop.f32.mrf.mxu1  ;;  %v7571_v42 = vadd.f32 %v2748_v12, %v2578_v34  ;;  %v2581_v54 = vadd.f32 %v5835_v19, %v7476_v58  ;;  %5936 = vmatmul.mubr.msk.f32.gmra.mxu1 %vm1472_vm9, %v3107_v57  ;;  %v3600_v12 = vld [vmem:[#allocation3 + $0x2b] sm:$0xff]  ;;  %v3601_v57 = vld [vmem:[#allocation3 + $0x33] sm:$0xff] }
 0x38e   : > { %5967 = vmatmul.mubr.msk.f32.gmra.mxu0 %vm1472_vm9, %v7412_v4  ;;  %v2507_v52 = vpop.f32.mrf.mxu0  ;;  %5938 = vmatprep.mubr.msk.f32.mxu1 %vm1472_vm9, %v3108_v17  ;;  %v3602_v17 = vld [vmem:[#allocation3 + $0x3b] sm:$0xff] }
 0x38f   : > { %v2758_v56 = vpop.f32.mrf.mxu1  ;;  %v7577_v15 = vadd.f32 %v5866_v62, %v2581_v54  ;;  %v2580_v59 = vadd.f32 %v2507_v52, %v7478_v1  ;;  %5969 = vmatprep.mubr.msk.f32.mxu0 %vm1472_vm9, %v7420_v24  ;;  %v3110_v1 = vld [vmem:[#allocation3 + $0x7f] sm:$0xff]  ;;  %v3852_v52 = vld [vmem:[#allocation3 + $0x34] sm:$0xff] }
 0x390   : > { %v5838_v9 = vpop.f32.mrf.mxu0  ;;  %v3364_v21 = vld [vmem:[#allocation3 + $0xa2] sm:$0x1f] }
 0x391   : > { %v5869_v58 = vpop.f32.mrf.mxu1  ;;  %v7583_v51 = vadd.f32 %v2758_v56, %v2580_v59  ;;  %v2583_v46 = vadd.f32 %v5838_v9, %v7480_v14  ;;  %5939 = vmatmul.mubr.msk.f32.gmra.mxu1 %vm1472_vm9, %v3109_v26  ;;  %v3853_v59 = vld [vmem:[#allocation3 + $0x3c] sm:$0xff] }
 0x392   : > { %5970 = vmatmul.mubr.msk.f32.gmra.mxu0 %vm1472_vm9, %v7426_v28  ;;  %v2517_v4 = vpop.f32.mrf.mxu0  ;;  %5941 = vmatprep.mubr.msk.f32.mxu1 %vm1472_vm9, %v3110_v1  ;;  %v3362_v28 = vld [vmem:[#allocation3 + $0x92] sm:$0xff]  ;;  %v3603_v26 = vld [vmem:[#allocation3 + $0x43] sm:$0xff] }
 0x393   : > { %v2768_v53 = vpop.f32.mrf.mxu1  ;;  %v7589_v7 = vadd.f32 %v5869_v58, %v2583_v46  ;;  %v2582_v24 = vadd.f32 %v2517_v4, %v7482_v49  ;;  %5972 = vmatprep.mubr.msk.f32.mxu0 %vm1472_vm9, %v3361_v0  ;;  %v3363_v49 = vld [vmem:[#allocation3 + $0x9a] sm:$0xff]  ;;  %v3854_v4 = vld [vmem:[#allocation3 + $0x44] sm:$0xff]  ;;  %v3855_v0 = vld [vmem:[#allocation3 + $0x4c] sm:$0xff] }
 0x394   : > { %v5841_v50 = vpop.f32.mrf.mxu0  ;;  %v3604_v1 = vld [vmem:[#allocation3 + $0x4b] sm:$0xff] }
 0x395   : > { %v5872_v14 = vpop.f32.mrf.mxu1  ;;  %v7594_v43 = vadd.f32 %v2768_v53, %v2582_v24  ;;  %v2585_v6 = vadd.f32 %v5841_v50, %v7484_v47  ;;  %5942 = vmatmul.mubr.msk.f32.gmra.mxu1 %vm1472_vm9, %v3111_v41  ;;  %v3605_v50 = vld [vmem:[#allocation3 + $0x53] sm:$0xff]  ;;  %v3606_v41 = vld [vmem:[#allocation3 + $0x5b] sm:$0xff] }
 0x396   : > { %5973 = vmatmul.mubr.msk.f32.gmra.mxu0 %vm1472_vm9, %v3362_v28  ;;  %v2527_v33 = vpop.f32.mrf.mxu0  ;;  %5944 = vmatprep.mubr.msk.f32.mxu1 %vm1472_vm9, %v3112_v27  ;;  %v3857_v28 = vld [vmem:[#allocation3 + $0x5c] sm:$0xff] }
 0x397   : > { %v2778_v29 = vpop.f32.mrf.mxu1  ;;  %v7599_v38 = vadd.f32 %v5872_v14, %v2585_v6  ;;  %v2584_v22 = vadd.f32 %v2527_v33, %v7486_v45  ;;  %5975 = vmatprep.mubr.msk.f32.mxu0 %vm1472_vm9, %v3363_v49  ;;  %v3849_v45 = vld [vmem:[#allocation3 + $0x1c] sm:$0xff]  ;;  %v3856_v14 = vld [vmem:[#allocation3 + $0x54] sm:$0xff]  ;;  %v3858_v49 = vld [vmem:[#allocation3 + $0x64] sm:$0xff] }
 0x398   : > { %v5844_v35 = vpop.f32.mrf.mxu0  ;;  %v3607_v27 = vld [vmem:[#allocation3 + $0x63] sm:$0xff] }
 0x399   : > { %v5875_v47 = vpop.f32.mrf.mxu1  ;;  %v7604_v37 = vadd.f32 %v2778_v29, %v2584_v22  ;;  %v2587_v18 = vadd.f32 %v5844_v35, %v7488_v5  ;;  %5945 = vmatmul.mubr.msk.f32.gmra.mxu1 %vm1472_vm9, %v3113_v23  ;;  %v3608_v35 = vld [vmem:[#allocation3 + $0x6b] sm:$0xff]  ;;  %v3609_v23 = vld [vmem:[#allocation3 + $0x73] sm:$0xff] }
 0x39a   : > { %5976 = vmatmul.mubr.msk.f32.gmra.mxu0 %vm1472_vm9, %v3364_v21  ;;  %v2537_v10 = vpop.f32.mrf.mxu0  ;;  %5982 = vmatprep.mubr.msk.f32.mxu1 %vm1472_vm9, %v3598_v55  ;;  %v3860_v21 = vld [vmem:[#allocation3 + $0x74] sm:$0xff]  ;;  %v3861_v55 = vld [vmem:[#allocation3 + $0x7c] sm:$0xff] }
 0x39b   : > { %v2788_v61 = vpop.f32.mrf.mxu1  ;;  %v7609_v16 = vadd.f32 %v5875_v47, %v2587_v18  ;;  %v2586_v63 = vadd.f32 %v2537_v10, %v7490_v36  ;;  %6013 = vmatprep.mubr.msk.f32.mxu0 %vm1472_vm9, %v3849_v45  ;;  %v3851_v36 = vld [vmem:[#allocation3 + $0x2c] sm:$0xff] }
 0x39c   : > { %v5847_v60 = vpop.f32.mrf.mxu0  ;;  %v3859_v47 = vld [vmem:[#allocation3 + $0x6c] sm:$0xff] }
 0x39d   : > { %v5878_v5 = vpop.f32.mrf.mxu1  ;;  %v7614_v44 = vadd.f32 %v2788_v61, %v2586_v63  ;;  %v2589_v11 = vadd.f32 %v5847_v60, %v7493_v40  ;;  %5983 = vmatmul.mubr.msk.f32.vlgmr.msra.gmra.mxu1 %vm1472_vm9, %v3599_v30  ;;  %v3610_v61 = vld [vmem:[#allocation3 + $0x7b] sm:$0xff]  ;;  %v3611_v63 = vld [vmem:[#allocation3 + $0x83] sm:$0xff]  ;;  %v3863_v30 = vld [vmem:[#allocation3 + $0x8c] sm:$0xff] }
 0x39e   : > { %6014 = vmatmul.mubr.msk.f32.vlgmr.msra.gmra.mxu0 %vm1472_vm9, %v3850_v13  ;;  %v2547_v32 = vpop.f32.mrf.mxu0  ;;  %5985 = vmatprep.mubr.msk.f32.mxu1 %vm1472_vm9, %v3600_v12  ;;  %v3862_v60 = vld [vmem:[#allocation3 + $0x84] sm:$0xff] }
 0x39f   : > { %v2798_v2 = vpop.f32.mrf.mxu1  ;;  %v7619_v48 = vadd.f32 %v5878_v5, %v2589_v11  ;;  %v2588_v34 = vadd.f32 %v2547_v32, %v7495_v31  ;;  %6016 = vmatprep.mubr.msk.f32.mxu0 %vm1472_vm9, %v3851_v36  ;;  %v3612_v11 = vld [vmem:[#allocation3 + $0x8b] sm:$0xff]  ;;  %v3613_v32 = vld [vmem:[#allocation3 + $0x93] sm:$0xff]  ;;  %v3614_v36 = vld [vmem:[#allocation3 + $0x9b] sm:$0xff] }
 0x3a0   : > { %v5850_v19 = vpop.f32.mrf.mxu0 }
 0x3a1   : > { %v5881_v40 = vpop.f32.mrf.mxu1  ;;  %v7624_v62 = vadd.f32 %v2798_v2, %v2588_v34  ;;  %v2591_v54 = vadd.f32 %v5850_v19, %v7500_v39  ;;  %5986 = vmatmul.mubr.msk.f32.gmra.mxu1 %vm1472_vm9, %v3601_v57  ;;  %v3864_v2 = vld [vmem:[#allocation3 + $0x94] sm:$0xff]  ;;  %v3865_v34 = vld [vmem:[#allocation3 + $0x9c] sm:$0xff] }
 0x3a2   : > { %6017 = vmatmul.mubr.msk.f32.gmra.mxu0 %vm1472_vm9, %v3852_v52  ;;  %v2557_v56 = vpop.f32.mrf.mxu0  ;;  %5988 = vmatprep.mubr.msk.f32.mxu1 %vm1472_vm9, %v3602_v17 }
 0x3a3   : > { %v7629_v31 = vadd.f32 %v5881_v40, %v2591_v54  ;;  %v2590_v9 = vadd.f32 %v2557_v56, %v7503_v3  ;;  %6019 = vmatprep.mubr.msk.f32.mxu0 %vm1472_vm9, %v3853_v59  ;;  %v2808_v58 = vpop.f32.mrf.mxu1  ;;  %v3615_v40 = vld [vmem:[#allocation3 + $0xa3] sm:$0x1f] }
 0x3a4   : > { %v5853_v46 = vpop.f32.mrf.mxu0  ;;  %v3866_v54 = vld [vmem:[#allocation3 + $0xa4] sm:$0x1f] }
 0x3a5   : > { %v7634_v39 = vadd.f32 %v2808_v58, %v2590_v9  ;;  %5989 = vmatmul.mubr.msk.f32.gmra.mxu1 %vm1472_vm9, %v3603_v26  ;;  %v5502_v26 = vld [vmem:[%s8025_s5 + $0x98] sm:$0xff] }
 0x3a6   : > { %6020 = vmatmul.mubr.msk.f32.gmra.mxu0 %vm1472_vm9, %v3854_v4  ;;  %v2567_v53 = vpop.f32.mrf.mxu0  ;;  %5991 = vmatprep.mubr.msk.f32.mxu1 %vm1472_vm9, %v3604_v1  ;;  %v5501_v4 = vld [vmem:[%s8025_s5 + $0x90] sm:$0xff] }
 0x3a7   : > { %6022 = vmatprep.mubr.msk.f32.mxu0 %vm1472_vm9, %v3855_v0  ;;  %v7742_v53 = vld [vmem:[%s8025_s5 + $0xd0] sm:$0xf] }
 0x3a8   : > { %v5891_v3 = vpop.f32.mrf.mxu0 }
 0x3a9   : > { %v7641_v24 = vadd.f32 %v5891_v3, %v7552_v20  ;;  %5992 = vmatmul.mubr.msk.f32.gmra.mxu1 %vm1472_vm9, %v3605_v50 }
 0x3aa   : > { %6023 = vmatmul.mubr.msk.f32.gmra.mxu0 %vm1472_vm9, %v3856_v14  ;;  %v2989_v6 = vpop.f32.mrf.mxu0  ;;  %5994 = vmatprep.mubr.msk.f32.mxu1 %vm1472_vm9, %v3606_v41 }
 0x3ab   : > { %v7646_v33 = vadd.f32 %v2989_v6, %v7558_v25  ;;  %6025 = vmatprep.mubr.msk.f32.mxu0 %vm1472_vm9, %v3857_v28 }
 0x3ac   : > { %v5894_v29 = vpop.f32.mrf.mxu0 }
 0x3ad   : > { %v7651_v20 = vadd.f32 %v5894_v29, %v7565_v8  ;;  %5995 = vmatmul.mubr.msk.f32.gmra.mxu1 %vm1472_vm9, %v3607_v27 }
 0x3ae   : > { %6026 = vmatmul.mubr.msk.f32.gmra.mxu0 %vm1472_vm9, %v3858_v49  ;;  %v2999_v22 = vpop.f32.mrf.mxu0  ;;  %5997 = vmatprep.mubr.msk.f32.mxu1 %vm1472_vm9, %v3608_v35 }
 0x3af   : > { %v7656_v25 = vadd.f32 %v2999_v22, %v7571_v42  ;;  %6028 = vmatprep.mubr.msk.f32.mxu0 %vm1472_vm9, %v3859_v47 }
 0x3b0   : > { %v5897_v18 = vpop.f32.mrf.mxu0 }
 0x3b1   : > { %v7661_v8 = vadd.f32 %v5897_v18, %v7577_v15  ;;  %5998 = vmatmul.mubr.msk.f32.gmra.mxu1 %vm1472_vm9, %v3609_v23 }
 0x3b2   : > { %6029 = vmatmul.mubr.msk.f32.gmra.mxu0 %vm1472_vm9, %v3860_v21  ;;  %v3009_v10 = vpop.f32.mrf.mxu0  ;;  %6000 = vmatprep.mubr.msk.f32.mxu1 %vm1472_vm9, %v3610_v61 }
 0x3b3   : > { %v7666_v42 = vadd.f32 %v3009_v10, %v7583_v51  ;;  %6031 = vmatprep.mubr.msk.f32.mxu0 %vm1472_vm9, %v3861_v55 }
 0x3b4   : > { %v5900_v45 = vpop.f32.mrf.mxu0 }
 0x3b5   : > { %v7671_v15 = vadd.f32 %v5900_v45, %v7589_v7  ;;  %6001 = vmatmul.mubr.msk.f32.gmra.mxu1 %vm1472_vm9, %v3611_v63 }
 0x3b6   : > { %6032 = vmatmul.mubr.msk.f32.gmra.mxu0 %vm1472_vm9, %v3862_v60  ;;  %v3019_v5 = vpop.f32.mrf.mxu0  ;;  %6003 = vmatprep.mubr.msk.f32.mxu1 %vm1472_vm9, %v3612_v11 }
 0x3b7   : > { %v7676_v51 = vadd.f32 %v3019_v5, %v7594_v43  ;;  %6034 = vmatprep.mubr.msk.f32.mxu0 %vm1472_vm9, %v3863_v30 }
 0x3b8   : > { %v5903_v13 = vpop.f32.mrf.mxu0 }
 0x3b9   : > { %v7681_v7 = vadd.f32 %v5903_v13, %v7599_v38  ;;  %6004 = vmatmul.mubr.msk.f32.gmra.mxu1 %vm1472_vm9, %v3613_v32 }
 0x3ba   : > { %6035 = vmatmul.mubr.msk.f32.gmra.mxu0 %vm1472_vm9, %v3864_v2  ;;  %v3029_v12 = vpop.f32.mrf.mxu0  ;;  %6006 = vmatprep.mubr.msk.f32.mxu1 %vm1472_vm9, %v3614_v36 }
 0x3bb   : > { %v7686_v43 = vadd.f32 %v3029_v12, %v7604_v37  ;;  %6037 = vmatprep.mubr.msk.f32.mxu0 %vm1472_vm9, %v3865_v34 }
 0x3bc   : > { %v5906_v19 = vpop.f32.mrf.mxu0 }
 0x3bd   : > { %v7691_v38 = vadd.f32 %v5906_v19, %v7609_v16  ;;  %6007 = vmatmul.mubr.msk.f32.gmra.mxu1 %vm1472_vm9, %v3615_v40 }
 0x3be   : > { %6038 = vmatmul.mubr.msk.f32.gmra.mxu0 %vm1472_vm9, %v3866_v54  ;;  %v3039_v57 = vpop.f32.mrf.mxu0 }
 0x3bf   : > { %v7696_v52 = vadd.f32 %v3039_v57, %v7614_v44  ;;  %v5470_v44 = vld [vmem:[%s8025_s5 + $0x28] sm:$0xf] }
 0x3c0   : > { %v5909_v37 = vpop.f32.mrf.mxu0  ;;  %6040 = vmatprep.subr.msk.mxu1 %vm4239_vm12, %v5470_v44 }
 0x3c1   : > { %v7699_v56 = vadd.f32 %v5909_v37, %v7619_v48  ;;  %6041 = vmatpush3.msk.msra.mxu1 %vm4239_vm12, %v5470_v44  ;;  %v5469_v48 = vld [vmem:[%s8025_s5 + $0x20] sm:$0xff] }
 0x3c2   : > { %v3049_v17 = vpop.f32.mrf.mxu0  ;;  %6042 = vmatprep.subr.mxu1 %v5469_v48 }
 0x3c3   : > { %v7702_v59 = vadd.f32 %v3049_v17, %v7624_v62  ;;  %6043 = vmatpush3.msra.mxu1 %v5469_v48  ;;  %v5468_v62 = vld [vmem:[%s8025_s5 + $0x18] sm:$0xff] }
 0x3c4   : > { %v5912_v16 = vpop.f32.mrf.mxu0  ;;  %6044 = vmatprep.subr.mxu1 %v5468_v62 }
 0x3c5   : > { %v7705_v9 = vadd.f32 %v5912_v16, %v7629_v31  ;;  %6045 = vmatpush3.msra.mxu1 %v5468_v62  ;;  %v7724_v31 = vld [vmem:[%s8025_s5 + $0x10] sm:$0xf] }
 0x3c6   : > { %v3059_v58 = vpop.f32.mrf.mxu0  ;;  %6049 = vmatprep.subr.msk.mxu1 %vm4239_vm12, %v7724_v31 }
 0x3c7   : > { %v7708_v46 = vadd.f32 %v3059_v58, %v7634_v39  ;;  %v5503_v39 = vld [vmem:[%s8025_s5 + $0xa0] sm:$0xf] }
 0x3c8   : > { %6094 = vmatprep.subr.msk.mxu0 %vm4239_vm12, %v5503_v39 }
 0x3c9   : > { %6095 = vmatpush3.msk.msra.mxu0 %vm4239_vm12, %v5503_v39 }
 0x3ca   : > { %6096 = vmatprep.subr.mxu0 %v5502_v26 }
 0x3cb   : > { %6097 = vmatpush3.msra.mxu0 %v5502_v26 }
 0x3cc   : > { %6098 = vmatprep.subr.mxu0 %v5501_v4 }
 0x3cd   : > { %6099 = vmatpush3.msra.mxu0 %v5501_v4 }
 0x3ce   : > { %6112 = vmatprep.subr.msk.mxu0 %vm4239_vm12, %v7742_v53 }
 0x435   : > { %v5884_v1 = vpop.f32.mrf.mxu1 }
 0x436   : > { %v5915_v0 = vpop.f32.mrf.mxu0 }
 0x437   : > { %v2818_v3 = vpop.f32.mrf.mxu1 }
 0x438   : > { %v3069_v50 = vpop.f32.mrf.mxu0 }
 0x439   : > { %v5922_v14 = vpop.f32.mrf.mxu1 }
 0x43a   : > { %v5953_v6 = vpop.f32.mrf.mxu0  ;;  %v3330_v37 = vadd.f32 %v5922_v14, %v7641_v24  ;;  %v7788_v24 = vld [vmem:[%s8024_s4] ss:$0 sm:$0xff] }
 0x43b   : > { %v3240_v41 = vpop.f32.mrf.mxu1 }
 0x43c   : > { %v3491_v28 = vpop.f32.mrf.mxu0  ;;  %v3329_v58 = vadd.f32 %v3240_v41, %v7646_v33  ;;  %v3581_v62 = vadd.f32 %v5953_v6, %v3330_v37 }
 0x43d   : > { %v5925_v29 = vpop.f32.mrf.mxu1 }
 0x43e   : > { %v5956_v27 = vpop.f32.mrf.mxu0  ;;  %v3332_v39 = vadd.f32 %v5925_v29, %v7651_v20  ;;  %v3580_v1 = vadd.f32 %v3491_v28, %v3329_v58 }
 0x43f   : > { %v3250_v49 = vpop.f32.mrf.mxu1 }
 0x440   : > { %v3501_v22 = vpop.f32.mrf.mxu0  ;;  %v3331_v0 = vadd.f32 %v3250_v49, %v7656_v25  ;;  %v3583_v41 = vadd.f32 %v5956_v27, %v3332_v39 }
 0x441   : > { %v5928_v35 = vpop.f32.mrf.mxu1 }
 0x442   : > { %v5959_v47 = vpop.f32.mrf.mxu0  ;;  %v3334_v50 = vadd.f32 %v5928_v35, %v7661_v8  ;;  %v3582_v28 = vadd.f32 %v3501_v22, %v3331_v0 }
 0x443   : > { %v3260_v18 = vpop.f32.mrf.mxu1 }
 0x444   : > { %v3511_v23 = vpop.f32.mrf.mxu0  ;;  %v3333_v20 = vadd.f32 %v3260_v18, %v7666_v42  ;;  %v3585_v8 = vadd.f32 %v5959_v47, %v3334_v50 }
 0x445   : > { %v5931_v21 = vpop.f32.mrf.mxu1 }
 0x446   : > { %v7746_v10 = vpop.f32.mrf.mxu0  ;;  %v3336_v35 = vadd.f32 %v5931_v21, %v7671_v15 }
 0x447   : > { %v3270_v61 = vpop.f32.mrf.mxu1 }
 0x448   : > { %v7748_v55 = vpop.f32.mrf.mxu0  ;;  %v3335_v42 = vadd.f32 %v3270_v61, %v7676_v51  ;;  %v3587_v21 = vadd.f32 %v7746_v10, %v3336_v35 }
 0x449   : > { %v5934_v45 = vpop.f32.mrf.mxu1 }
 0x44a   : > { %v7750_v63 = vpop.f32.mrf.mxu0  ;;  %v3338_v0 = vadd.f32 %v5934_v45, %v7681_v7 }
 0x44b   : > { %v7752_v60 = vpop.f32.mrf.mxu1 }
 0x44c   : > { %v7754_v5 = vpop.f32.mrf.mxu0 }
 0x44d   : > { %v7756_v11 = vpop.f32.mrf.mxu1 }
 0x44e   : > { %v7758_v30 = vpop.f32.mrf.mxu0 }
 0x44f   : > { %v7760_v13 = vpop.f32.mrf.mxu1 }
 0x450   : > { %v7762_v32 = vpop.f32.mrf.mxu0 }
 0x451   : > { %v7764_v2 = vpop.f32.mrf.mxu1 }
 0x452   : > { %v7766_v12 = vpop.f32.mrf.mxu0 }
 0x453   : > { %v7768_v36 = vpop.f32.mrf.mxu1 }
 0x454   : > { %v7770_v34 = vpop.f32.mrf.mxu0 }
 0x455   : > { %v7772_v19 = vpop.f32.mrf.mxu1 }
 0x456   : > { %v7774_v40 = vpop.f32.mrf.mxu0 }
 0x457   : > { %v7776_v54 = vpop.f32.mrf.mxu1 }
 0x458   : > { %v7778_v57 = vpop.f32.mrf.mxu0 }
 0x459   : > { %v5946_v17 = vpop.f32.mrf.mxu1 }
 0x45a   : > { %v5977_v16 = vpop.f32.mrf.mxu0 }
 0x45b   : > { %v3320_v44 = vpop.f32.mrf.mxu1 }
 0x45c   : > { %v3571_v48 = vpop.f32.mrf.mxu0 }
 0x45d   : > { %v5984_v26 = vpop.f32.mrf.mxu1 }
 0x45e   : > { %v6015_v4 = vpop.f32.mrf.mxu0  ;;  %v3832_v3 = vadd.f32 %v5984_v26, %v3581_v62  ;;  %v3584_v26 = vadd.f32 %v3511_v23, %v3333_v20 }
 0x45f   : > { %v3742_v14 = vpop.f32.mrf.mxu1 }
 0x460   : > { %v3993_v33 = vpop.f32.mrf.mxu0  ;;  %v4083_v17 = vadd.f32 %v6015_v4, %v3832_v3  ;;  %v3831_v6 = vadd.f32 %v3742_v14, %v3580_v1 }
 0x461   : > { %v5987_v29 = vpop.f32.mrf.mxu1 }
 0x462   : > { %v6018_v37 = vpop.f32.mrf.mxu0  ;;  %v4108_v25 = vadd.f32 %v7788_v24, %v4083_v17  ;;  %v4082_v49 = vadd.f32 %v3993_v33, %v3831_v6  ;;  %v3834_v16 = vadd.f32 %v5987_v29, %v3583_v41  ;;  %v3586_v33 = vadd.f32 %v7748_v55, %v3335_v42 }
 0x463   : > { %v3752_v58 = vpop.f32.mrf.mxu1  ;;  %v3337_v41 = vadd.f32 %v7752_v60, %v7686_v43  ;;  %v3589_v29 = vadd.f32 %v7750_v63, %v3338_v0 }
 0x464   : > { %v4003_v44 = vpop.f32.mrf.mxu0  ;;  %v4126_v48 = vmax.f32 %v4108_v25, 0.0  ;;  %v4107_v27 = vadd.f32 %v7788_v24, %v4082_v49  ;;  %v4085_v62 = vadd.f32 %v6018_v37, %v3834_v16  ;;  %v3833_v39 = vadd.f32 %v3752_v58, %v3582_v28 }
 0x465   : > { %v5990_v18 = vpop.f32.mrf.mxu1  ;;  %v3340_v37 = vadd.f32 %v7756_v11, %v7691_v38  ;;  %v3588_v16 = vadd.f32 %v7754_v5, %v3337_v41 }
 0x466   : > { %v6021_v22 = vpop.f32.mrf.mxu0  ;;  %4145 = vst.msk [vmem:[#allocation4 + $0x8] sm:$0xff] %vm4143_vm13, %v4126_v48  ;;  %v4125_v4 = vmax.f32 %v4107_v27, 0.0  ;;  %v4110_v47 = vadd.f32 %v7788_v24, %v4085_v62  ;;  %v4084_v1 = vadd.f32 %v4003_v44, %v3833_v39  ;;  %v3836_v15 = vadd.f32 %v5990_v18, %v3585_v8 }
 0x467   : > { %v3762_v3 = vpop.f32.mrf.mxu1  ;;  %v3339_v8 = vadd.f32 %v7760_v13, %v7696_v52  ;;  %v3591_v48 = vadd.f32 %v7758_v30, %v3340_v37  ;;  %v3342_v27 = vadd.f32 %v7764_v2, %v7699_v56  ;;  %v3341_v18 = vadd.f32 %v7768_v36, %v7702_v59 }
 0x468   : > { %v4013_v50 = vpop.f32.mrf.mxu0  ;;  %4144 = vst.msk [vmem:[#allocation4] sm:$0xff] %vm4143_vm13, %v4125_v4  ;;  %v4128_v23 = vmax.f32 %v4110_v47, 0.0  ;;  %v4109_v51 = vadd.f32 %v7788_v24, %v4084_v1  ;;  %v4087_v61 = vadd.f32 %v6021_v22, %v3836_v15  ;;  %v3835_v14 = vadd.f32 %v3762_v3, %v3584_v26 }
 0x469   : > { %v5993_v17 = vpop.f32.mrf.mxu1  ;;  %v3590_v42 = vadd.f32 %v7762_v32, %v3339_v8  ;;  %v3344_v32 = vadd.f32 %v7772_v19, %v7705_v9 }
 0x46a   : > { %v6024_v6 = vpop.f32.mrf.mxu0  ;;  %4147 = vst.msk [vmem:[#allocation4 + $0x18] sm:$0xff] %vm4143_vm13, %v4128_v23  ;;  %v4127_v10 = vmax.f32 %v4109_v51, 0.0  ;;  %v4112_v7 = vadd.f32 %v7788_v24, %v4087_v61  ;;  %v4086_v45 = vadd.f32 %v4013_v50, %v3835_v14  ;;  %v3838_v20 = vadd.f32 %v5993_v17, %v3587_v21 }
 0x46b   : > { %v3772_v28 = vpop.f32.mrf.mxu1  ;;  %v3593_v21 = vadd.f32 %v7766_v12, %v3342_v27  ;;  %v3592_v14 = vadd.f32 %v7770_v34, %v3341_v18 }
 0x46c   : > { %v4023_v25 = vpop.f32.mrf.mxu0  ;;  %4146 = vst.msk [vmem:[#allocation4 + $0x10] sm:$0xff] %vm4143_vm13, %v4127_v10  ;;  %v4130_v55 = vmax.f32 %v4112_v7, 0.0  ;;  %v4111_v43 = vadd.f32 %v7788_v24, %v4086_v45  ;;  %v4089_v60 = vadd.f32 %v6024_v6, %v3838_v20  ;;  %v3837_v49 = vadd.f32 %v3772_v28, %v3586_v33 }
 0x46d   : > { %v5996_v35 = vpop.f32.mrf.mxu1  ;;  %v3343_v33 = vadd.f32 %v7776_v54, %v7708_v46  ;;  %v3595_v45 = vadd.f32 %v7774_v40, %v3344_v32 }
 0x46e   : > { %v6027_v58 = vpop.f32.mrf.mxu0  ;;  %4149 = vst.msk [vmem:[#allocation4 + $0x28] sm:$0xff] %vm4143_vm13, %v4130_v55  ;;  %v4129_v63 = vmax.f32 %v4111_v43, 0.0  ;;  %v4114_v38 = vadd.f32 %v7788_v24, %v4089_v60  ;;  %v4088_v11 = vadd.f32 %v4023_v25, %v3837_v49  ;;  %v3840_v44 = vadd.f32 %v5996_v35, %v3589_v29 }
 0x46f   : > { %v3782_v62 = vpop.f32.mrf.mxu1  ;;  %v4163_v30 = vld [vmem:[#allocation4] ss:$2 sm:$0x1f]  ;;  %v4165_v15 = vld [vmem:[#allocation4 + $0x1] ss:$2 sm:$0x1f]  ;;  %v3594_v25 = vadd.f32 %v7778_v57, %v3343_v33 }
 0x470   : > { %v4033_v39 = vpop.f32.mrf.mxu0  ;;  %4148 = vst.msk [vmem:[#allocation4 + $0x20] sm:$0xff] %vm4143_vm13, %v4129_v63  ;;  %v4132_v5 = vmax.f32 %v4114_v38, 0.0  ;;  %v4113_v52 = vadd.f32 %v7788_v24, %v4088_v11  ;;  %v4091_v13 = vadd.f32 %v6027_v58, %v3840_v44  ;;  %v3839_v26 = vadd.f32 %v3782_v62, %v3588_v16 }
 0x471   : > { %v5999_v22 = vpop.f32.mrf.mxu1  ;;  %v4170_v17 = vmax.f32 %v4163_v30, %v4165_v15 }
 0x472   : > { %v6030_v4 = vpop.f32.mrf.mxu0  ;;  %4151 = vst.msk [vmem:[#allocation4 + $0x38] sm:$0xff] %vm4143_vm13, %v4132_v5  ;;  %v4131_v56 = vmax.f32 %v4113_v52, 0.0  ;;  %v4116_v2 = vadd.f32 %v7788_v24, %v4091_v13  ;;  %v4090_v47 = vadd.f32 %v4033_v39, %v3839_v26  ;;  %v3842_v1 = vadd.f32 %v5999_v22, %v3591_v48 }
 0x473   : > { %v3792_v0 = vpop.f32.mrf.mxu1  ;;  %v4167_v59 = vld [vmem:[#allocation4 + $0xd] ss:$2 sm:$0x1f]  ;;  %v4169_v36 = vld [vmem:[#allocation4 + $0xe] ss:$2 sm:$0x1f] }
 0x474   : > { %v4043_v3 = vpop.f32.mrf.mxu0  ;;  %4150 = vst.msk [vmem:[#allocation4 + $0x30] sm:$0xff] %vm4143_vm13, %v4131_v56  ;;  %v4134_v50 = vmax.f32 %v4116_v2, 0.0  ;;  %v4115_v23 = vadd.f32 %v7788_v24, %v4090_v47  ;;  %v4093_v51 = vadd.f32 %v6030_v4, %v3842_v1  ;;  %v3841_v61 = vadd.f32 %v3792_v0, %v3590_v42 }
 0x475   : > { %v6002_v12 = vpop.f32.mrf.mxu1  ;;  %v4171_v9 = vmax.f32 %v4167_v59, %v4169_v36 }
 0x476   : > { %v6033_v41 = vpop.f32.mrf.mxu0  ;;  %4153 = vst.msk [vmem:[#allocation4 + $0x48] sm:$0xff] %vm4143_vm13, %v4134_v50  ;;  %v4133_v19 = vmax.f32 %v4115_v23, 0.0  ;;  %v4118_v6 = vadd.f32 %v7788_v24, %v4093_v51  ;;  %v4092_v10 = vadd.f32 %v4043_v3, %v3841_v61  ;;  %v3844_v7 = vadd.f32 %v6002_v12, %v3593_v21 }
 0x477   : > { %v3802_v20 = vpop.f32.mrf.mxu1  ;;  %v4172_v37 = vmax.f32 %v4170_v17, %v4171_v9  ;;  %v4175_v60 = vld [vmem:[#allocation4 + $0x1a] ss:$2 sm:$0x1f]  ;;  %v4177_v49 = vld [vmem:[#allocation4 + $0x1b] ss:$2 sm:$0x1f] }
 0x478   : > { %v4053_v29 = vpop.f32.mrf.mxu0  ;;  %4152 = vst.msk [vmem:[#allocation4 + $0x40] sm:$0xff] %vm4143_vm13, %v4133_v19  ;;  %v4136_v34 = vmax.f32 %v4118_v6, 0.0  ;;  %v4117_v46 = vadd.f32 %v7788_v24, %v4092_v10  ;;  %v4095_v54 = vadd.f32 %v6033_v41, %v3844_v7  ;;  %v3843_v28 = vadd.f32 %v3802_v20, %v3592_v14  ;;  %v4179_v58 = vld [vmem:[#allocation4 + $0x27] ss:$2 sm:$0x1f]  ;;  %v4224_v20 = vld [vmem:[%s8025_s5] sm:$0xff] }
 0x479   : > { %v6005_v55 = vpop.f32.mrf.mxu1  ;;  %4173 = vst.msk [vmem:[#allocation5] sm:$0x1f] %vm4161_vm14, %v4172_v37  ;;  %v4182_v52 = vmax.f32 %v4175_v60, %v4177_v49  ;;  %v4225_v10 = vld [vmem:[%s8025_s5 + $0x8] sm:$0xff] }
 0x47a   : > { %v6036_v43 = vpop.f32.mrf.mxu0  ;;  %4155 = vst.msk [vmem:[#allocation4 + $0x58] sm:$0xff] %vm4143_vm13, %v4136_v34  ;;  %v4135_v40 = vmax.f32 %v4117_v46, 0.0  ;;  %v4120_v16 = vadd.f32 %v7788_v24, %v4095_v54  ;;  %v4094_v8 = vadd.f32 %v4053_v29, %v3843_v28  ;;  %v3846_v35 = vadd.f32 %v6005_v55, %v3595_v45  ;;  %v5479_v29 = vld [vmem:[%s8025_s5 + $0x40] sm:$0xf]  ;;  %v5477_v54 = vld [vmem:[%s8025_s5 + $0x30] sm:$0xff]  ;;  %v5514_v49 = vld [vmem:[%s8025_s5 + $0xc8] sm:$0xff] }
 0x47b   : > { %v3812_v63 = vpop.f32.mrf.mxu1  ;;  %v4181_v11 = vld [vmem:[#allocation4 + $0x28] ss:$2 sm:$0x1f]  ;;  %v4187_v44 = vld [vmem:[#allocation4 + $0x34] ss:$2 sm:$0x1f] }
 0x47c   : > { %v4063_v38 = vpop.f32.mrf.mxu0  ;;  %4154 = vst.msk [vmem:[#allocation4 + $0x50] sm:$0xff] %vm4143_vm13, %v4135_v40  ;;  %v4138_v57 = vmax.f32 %v4120_v16, 0.0  ;;  %v4119_v48 = vadd.f32 %v7788_v24, %v4094_v8  ;;  %v4097_v27 = vadd.f32 %v6036_v43, %v3846_v35  ;;  %v3845_v62 = vadd.f32 %v3812_v63, %v3594_v25  ;;  %v4189_v39 = vld [vmem:[#allocation4 + $0x35] ss:$2 sm:$0x1f]  ;;  %v5484_v43 = vld [vmem:[%s8025_s5 + $0x50] sm:$0xff] }
 0x47d   : > { %v6008_v5 = vpop.f32.mrf.mxu1  ;;  %v4183_v13 = vmax.f32 %v4179_v58, %v4181_v11  ;;  %v4194_v2 = vmax.f32 %v4187_v44, %v4189_v39  ;;  %v5485_v28 = vld [vmem:[%s8025_s5 + $0x58] sm:$0xf]  ;;  %v5483_v16 = vld [vmem:[%s8025_s5 + $0x48] sm:$0xff]  ;;  %v5513_v8 = vld [vmem:[%s8025_s5 + $0xc0] sm:$0xff] }
 0x47e   : > { %4157 = vst.msk [vmem:[#allocation4 + $0x68] sm:$0xff] %vm4143_vm13, %v4138_v57  ;;  %v4137_v26 = vmax.f32 %v4119_v48, 0.0  ;;  %v4122_v42 = vadd.f32 %v7788_v24, %v4097_v27  ;;  %v4096_v18 = vadd.f32 %v4063_v38, %v3845_v62  ;;  %v6039_v22 = vpop.f32.mrf.mxu0  ;;  %v5491_v35 = vld [vmem:[%s8025_s5 + $0x70] sm:$0xf]  ;;  %v5490_v58 = vld [vmem:[%s8025_s5 + $0x68] sm:$0xff]  ;;  %v5489_v11 = vld [vmem:[%s8025_s5 + $0x60] sm:$0xff] }
 0x47f   : > { %v4184_v4 = vmax.f32 %v4182_v52, %v4183_v13  ;;  %v4191_v30 = vld [vmem:[#allocation4 + $0x41] ss:$2 sm:$0x1f]  ;;  %v4193_v56 = vld [vmem:[#allocation4 + $0x42] ss:$2 sm:$0x1f]  ;;  %v3822_v47 = vpop.f32.mrf.mxu1 }
 0x480   : > { %4156 = vst.msk [vmem:[#allocation4 + $0x60] sm:$0xff] %vm4143_vm13, %v4137_v26  ;;  %v4140_v1 = vmax.f32 %v4122_v42, 0.0  ;;  %v4121_v15 = vadd.f32 %v7788_v24, %v4096_v18  ;;  %v4195_v21 = vmax.f32 %v4191_v30, %v4193_v56  ;;  %v4073_v3 = vpop.f32.mrf.mxu0  ;;  %v5497_v44 = vld [vmem:[%s8025_s5 + $0x88] sm:$0xf]  ;;  %v5496_v48 = vld [vmem:[%s8025_s5 + $0x80] sm:$0xff]  ;;  %v5495_v62 = vld [vmem:[%s8025_s5 + $0x78] sm:$0xff] }
 0x481   : > { %4185 = vst.msk [vmem:[#allocation5 + $0x5] sm:$0x1f] %vm4161_vm14, %v4184_v4  ;;  %v5509_v39 = vld [vmem:[%s8025_s5 + $0xb8] sm:$0xf]  ;;  %v5508_v52 = vld [vmem:[%s8025_s5 + $0xb0] sm:$0xff]  ;;  %v5507_v26 = vld [vmem:[%s8025_s5 + $0xa8] sm:$0xff] }
 0x482   : > { %4159 = vst.msk [vmem:[#allocation4 + $0x78] sm:$0xff] %vm4143_vm13, %v4140_v1  ;;  %v4139_v32 = vmax.f32 %v4121_v15, 0.0  ;;  %v4196_v0 = vmax.f32 %v4194_v2, %v4195_v21  ;;  %v6297_v18 = vmov 0.0   ;;  %v5051_v22 = vld [vmem:[%s8027_s7 + $0x20] sm:$0xff]  ;;  %v5050_v4 = vld [vmem:[%s8027_s7 + $0x18] sm:$0xff]  ;;  %v5049_v30 = vld [vmem:[%s8027_s7 + $0x10] sm:$0xff] }
 0x483   : > { %v4199_v59 = vld [vmem:[#allocation4 + $0x4e] ss:$2 sm:$0x1f]  ;;  %v4201_v36 = vld [vmem:[#allocation4 + $0x4f] ss:$2 sm:$0x1f] }
 0x484   : > { %4158 = vst.msk [vmem:[#allocation4 + $0x70] sm:$0xff] %vm4143_vm13, %v4139_v32  ;;  %v4206_v51 = vmax.f32 %v4199_v59, %v4201_v36  ;;  %v5048_v56 = vld [vmem:[%s8027_s7 + $0x8] sm:$0xff]  ;;  %v5047_v2 = vld [vmem:[%s8027_s7] sm:$0xff]  ;;  %v5130_v47 = vld [vmem:[%s8029_s9 + $0x18] sm:$0xff] }
 0x485   : > { %4197 = vst.msk [vmem:[#allocation5 + $0xa] sm:$0x1f] %vm4161_vm14, %v4196_v0  ;;  %v5129_v1 = vld [vmem:[%s8029_s9 + $0x10] sm:$0xff] }
 0x487   : > { %v4203_v50 = vld [vmem:[#allocation4 + $0x5b] ss:$2 sm:$0x1f]  ;;  %v4205_v23 = vld [vmem:[#allocation4 + $0x5c] ss:$2 sm:$0x1f] }
 0x488   : > { %v4207_v61 = vmax.f32 %v4203_v50, %v4205_v23  ;;  %v4227_v14 = vld [vmem:[#allocation5 + $0x1] sm:$0xff] }
 0x489   : > { %6046 = vmatprep.mubr.msk.f32.mxu1 %vm4143_vm13, %v4227_v14  ;;  %v4222_v7 = vld [vmem:[#allocation5] sm:$0xff] }
 0x48a   : > { %v4208_v24 = vmax.f32 %v4206_v51, %v4207_v61  ;;  %v4400_v46 = vld [vmem:[#allocation5 + $0x2] sm:$0xff] }
 0x48b   : > { %v4211_v33 = vld [vmem:[#allocation4 + $0x68] ss:$2 sm:$0x1f]  ;;  %v4213_v12 = vld [vmem:[#allocation4 + $0x69] ss:$2 sm:$0x1f] }
 0x48c   : > { %4209 = vst.msk [vmem:[#allocation5 + $0xf] sm:$0x1f] %vm4161_vm14, %v4208_v24  ;;  %v4215_v41 = vld [vmem:[#allocation4 + $0x75] ss:$2 sm:$0x1f]  ;;  %v4218_v9 = vmax.f32 %v4211_v33, %v4213_v12 }
 0x48d   : > { %v4217_v17 = vld [vmem:[#allocation4 + $0x76] ss:$2 sm:$0x1f] }
 0x48e   : > { %v4219_v19 = vmax.f32 %v4215_v41, %v4217_v17  ;;  %v4228_v6 = vld [vmem:[#allocation5 + $0x9] sm:$0x1f] }
 0x48f   : > { %6047 = vmatmul.mubr.msk.f32.vlgmr.msra.gmra.mxu1 %vm4143_vm13, %v4228_v6  ;;  %v4223_v37 = vld [vmem:[#allocation5 + $0x8] sm:$0x1f] }
 0x490   : > { %v4220_v45 = vmax.f32 %v4218_v9, %v4219_v19  ;;  %6050 = vmatpush3.msk.msra.mxu1 %vm4239_vm12, %v7724_v31  ;;  %6055 = vmatprep.mubr.msk.f32.mxu1 %vm4143_vm13, %v4222_v7  ;;  %v5478_v31 = vld [vmem:[%s8025_s5 + $0x38] sm:$0xff]  ;;  %v4401_v55 = vld [vmem:[#allocation5 + $0xa] sm:$0x1f] }
 0x491   : > { %6051 = vmatprep.subr.mxu1 %v4225_v10  ;;  %v4490_v60 = vld [vmem:[#allocation5 + $0x5] sm:$0xff] }
 0x492   : > { %4221 = vst.msk [vmem:[#allocation5 + $0x14] sm:$0x1f] %vm4161_vm14, %v4220_v45  ;;  %6052 = vmatpush3.msra.mxu1 %v4225_v10  ;;  %v4580_v38 = vld [vmem:[#allocation5 + $0x6] sm:$0xff] }
 0x493   : > { %6053 = vmatprep.subr.mxu1 %v4224_v20  ;;  %v4760_v34 = vld [vmem:[#allocation5 + $0xa] sm:$0xff] }
 0x494   : > { %6054 = vmatpush3.msra.mxu1 %v4224_v20  ;;  %6100 = vmatprep.mubr.msk.f32.mxu0 %vm4143_vm13, %v4760_v34  ;;  %v4940_v40 = vld [vmem:[#allocation5 + $0xc] sm:$0xff] }
 0x495   : > { %6056 = vmatmul.mubr.msk.f32.vlgmr.msra.gmra.mxu1 %vm4143_vm13, %v4223_v37  ;;  %6058 = vmatprep.subr.msk.mxu1 %vm4239_vm12, %v5479_v29  ;;  %v4581_v57 = vld [vmem:[#allocation5 + $0xe] sm:$0x1f]  ;;  %v5519_v37 = vld [vmem:[%s8026_s6] ss:$0 sm:$0xff] }
 0x496   : > { %6059 = vmatpush3.msk.msra.mxu1 %vm4239_vm12, %v5479_v29  ;;  %6064 = vmatprep.mubr.msk.f32.mxu1 %vm4143_vm13, %v4400_v46  ;;  %v4670_v27 = vld [vmem:[#allocation5 + $0x7] sm:$0xff]  ;;  %v4671_v5 = vld [vmem:[#allocation5 + $0xf] sm:$0x1f] }
 0x497   : > { %6060 = vmatprep.subr.mxu1 %v5478_v31  ;;  %v4850_v13 = vld [vmem:[#allocation5 + $0xb] sm:$0xff] }
 0x498   : > { %6061 = vmatpush3.msra.mxu1 %v5478_v31 }
 0x499   : > { %6062 = vmatprep.subr.mxu1 %v5477_v54  ;;  %v4761_v25 = vld [vmem:[#allocation5 + $0x12] sm:$0x1f] }
 0x49a   : > { %6063 = vmatpush3.msra.mxu1 %v5477_v54  ;;  %6101 = vmatmul.mubr.msk.f32.vlgmr.msra.gmra.mxu0 %vm4143_vm13, %v4761_v25  ;;  %v4941_v63 = vld [vmem:[#allocation5 + $0x14] sm:$0x1f] }
 0x49b   : > { %6065 = vmatmul.mubr.msk.f32.vlgmr.msra.gmra.mxu1 %vm4143_vm13, %v4401_v55  ;;  %6067 = vmatprep.subr.msk.mxu1 %vm4239_vm12, %v5485_v28  ;;  %v4851_v42 = vld [vmem:[#allocation5 + $0x13] sm:$0x1f] }
 0x49c   : > { %6068 = vmatpush3.msk.msra.mxu1 %vm4239_vm12, %v5485_v28  ;;  %6073 = vmatprep.mubr.msk.f32.mxu1 %vm4143_vm13, %v4490_v60  ;;  %v5127_v60 = vld [vmem:[%s8029_s9] sm:$0xff] }
 0x49d   : > { %6113 = vmatpush3.msk.msra.mxu0 %vm4239_vm12, %v7742_v53  ;;  %6069 = vmatprep.subr.mxu1 %v5484_v43  ;;  %v4491_v53 = vld [vmem:[#allocation5 + $0xd] sm:$0x1f] }
 0x49e   : > { %6114 = vmatprep.subr.mxu0 %v5514_v49  ;;  %6118 = vmatprep.mubr.msk.f32.mxu0 %vm4143_vm13, %v4940_v40 }
 0x49f   : > { %6070 = vmatpush3.msra.mxu1 %v5484_v43  ;;  %6115 = vmatpush3.msra.mxu0 %v5514_v49  ;;  %v5128_v43 = vld [vmem:[%s8029_s9 + $0x8] sm:$0xff]  ;;  %v5052_v49 = vld [vmem:[%s8028_s8] sm:$0x1] }
 0x4a0   : > { %6071 = vmatprep.subr.mxu1 %v5483_v16  ;;  %6116 = vmatprep.subr.mxu0 %v5513_v8 }
 0x4a1   : > { %6072 = vmatpush3.msra.mxu1 %v5483_v16  ;;  %6117 = vmatpush3.msra.mxu0 %v5513_v8 }
 0x4a2   : > { %6074 = vmatmul.mubr.msk.f32.vlgmr.msra.gmra.mxu1 %vm4143_vm13, %v4491_v53  ;;  %6076 = vmatprep.subr.msk.mxu1 %vm4239_vm12, %v5491_v35 }
 0x4a3   : > { %6119 = vmatmul.mubr.msk.f32.vlgmr.msra.gmra.mxu0 %vm4143_vm13, %v4941_v63  ;;  %6077 = vmatpush3.msk.msra.mxu1 %vm4239_vm12, %v5491_v35  ;;  %v5131_v35 = vld [vmem:[%s8030_s10] sm:$0x1] }
 0x4a4   : > { %6082 = vmatprep.mubr.msk.f32.mxu1 %vm4143_vm13, %v4580_v38  ;;  %6078 = vmatprep.subr.mxu1 %v5490_v58 }
 0x4a5   : > { %6079 = vmatpush3.msra.mxu1 %v5490_v58  ;;  %6134 = vmatprep.subr.mxu0 %v6297_v18 }
 0x4a6   : > { %6080 = vmatprep.subr.mxu1 %v5489_v11  ;;  %6142 = vmatprep.mubr.msk.f32.mxu0 %vm6298_vm15, %v6297_v18 }
 0x4a7   : > { %6081 = vmatpush3.msra.mxu1 %v5489_v11  ;;  %6135 = vmatpush3.msra.mxu0 %v5130_v47 }
 0x4a8   : > { %6083 = vmatmul.mubr.msk.f32.vlgmr.msra.gmra.mxu1 %vm4143_vm13, %v4581_v57  ;;  %6085 = vmatprep.subr.msk.mxu1 %vm4239_vm12, %v5497_v44 }
 0x4a9   : > { %6086 = vmatpush3.msk.msra.mxu1 %vm4239_vm12, %v5497_v44  ;;  %6091 = vmatprep.mubr.msk.f32.mxu1 %vm4143_vm13, %v4670_v27 }
 0x4aa   : > { %6087 = vmatprep.subr.mxu1 %v5496_v48  ;;  %6136 = vmatprep.subr.mxu0 %v6297_v18 }
 0x4ab   : > { %6088 = vmatpush3.msra.mxu1 %v5496_v48  ;;  %6137 = vmatpush3.msra.mxu0 %v5129_v1 }
 0x4ac   : > { %6089 = vmatprep.subr.mxu1 %v5495_v62  ;;  %6138 = vmatprep.subr.mxu0 %v6297_v18 }
 0x4ad   : > { %6090 = vmatpush3.msra.mxu1 %v5495_v62  ;;  %6139 = vmatpush3.msra.mxu0 %v5128_v43 }
 0x4ae   : > { %6092 = vmatmul.mubr.msk.f32.vlgmr.msra.gmra.mxu1 %vm4143_vm13, %v4671_v5  ;;  %6103 = vmatprep.subr.msk.mxu1 %vm4239_vm12, %v5509_v39 }
 0x4af   : > { %6104 = vmatpush3.msk.msra.mxu1 %vm4239_vm12, %v5509_v39  ;;  %6109 = vmatprep.mubr.msk.f32.mxu1 %vm4143_vm13, %v4850_v13 }
 0x4b0   : > { %6105 = vmatprep.subr.mxu1 %v5508_v52  ;;  %6140 = vmatprep.subr.mxu0 %v6297_v18 }
 0x4b1   : > { %6106 = vmatpush3.msra.mxu1 %v5508_v52  ;;  %6141 = vmatpush3.msra.mxu0 %v5127_v60 }
 0x4b2   : > { %6107 = vmatprep.subr.mxu1 %v5507_v26 }
 0x4b3   : > { %6108 = vmatpush3.msra.mxu1 %v5507_v26 }
 0x4b4   : > { %6110 = vmatmul.mubr.msk.f32.vlgmr.msra.gmra.mxu1 %vm4143_vm13, %v4851_v42  ;;  %6121 = vmatprep.subr.mxu1 %v6297_v18 }
 0x4b5   : > { %6122 = vmatpush3.msra.mxu1 %v5051_v22  ;;  %6131 = vmatprep.mubr.msk.f32.mxu1 %vm6298_vm15, %v6297_v18 }
 0x4b6   : > { %6123 = vmatprep.subr.mxu1 %v6297_v18 }
 0x4b7   : > { %6124 = vmatpush3.msra.mxu1 %v5050_v4 }
 0x4b8   : > { %6125 = vmatprep.subr.mxu1 %v6297_v18 }
 0x4b9   : > { %6126 = vmatpush3.msra.mxu1 %v5049_v30 }
 0x4ba   : > { %6127 = vmatprep.subr.mxu1 %v6297_v18 }
 0x4bb   : > { %6128 = vmatpush3.msra.mxu1 %v5048_v56 }
 0x4bc   : > { %6129 = vmatprep.subr.mxu1 %v6297_v18 }
 0x4bd   : > { %6130 = vmatpush3.msra.mxu1 %v5047_v2 }
 0x54f   : > { %v6048_v15 = vpop.f32.mrf.mxu1 }
 0x551   : > { %v4309_v21 = vpop.f32.mrf.mxu1 }
 0x555   : > { %v6057_v32 = vpop.f32.mrf.mxu1 }
 0x557   : > { %v4392_v0 = vpop.f32.mrf.mxu1 }
 0x558   : > { %v4393_v24 = vadd.f32 %v4392_v0, %v4309_v21 }
 0x55a   : > { %v6102_v3 = vpop.f32.mrf.mxu0 }
 0x55b   : > { %v6066_v59 = vpop.f32.mrf.mxu1 }
 0x55c   : > { %v4841_v36 = vpop.f32.mrf.mxu0 }
 0x55d   : > { %v4481_v50 = vpop.f32.mrf.mxu1 }
 0x55e   : > { %v4489_v33 = vadd.f32 %v4481_v50, %v4393_v24 }
 0x562   : > { %v6075_v23 = vpop.f32.mrf.mxu1 }
 0x563   : > { %v6120_v51 = vpop.f32.mrf.mxu0 }
 0x564   : > { %v4571_v61 = vpop.f32.mrf.mxu1 }
 0x565   : > { %v4579_v41 = vadd.f32 %v4571_v61, %v4489_v33  ;;  %v5021_v29 = vpop.f32.mrf.mxu0 }
 0x568   : > { %v6084_v14 = vpop.f32.mrf.mxu1 }
 0x56a   : > { %v4661_v12 = vpop.f32.mrf.mxu1 }
 0x56b   : > { %v4669_v9 = vadd.f32 %v4661_v12, %v4579_v41 }
 0x56e   : > { %v6093_v17 = vpop.f32.mrf.mxu1 }
 0x570   : > { %v4751_v19 = vpop.f32.mrf.mxu1 }
 0x571   : > { %v4759_v6 = vadd.f32 %v4751_v19, %v4669_v9 }
 0x573   : > { %v4849_v7 = vadd.f32 %v4841_v36, %v4759_v6 }
 0x574   : > { %v6111_v10 = vpop.f32.mrf.mxu1 }
 0x576   : > { %v4931_v45 = vpop.f32.mrf.mxu1 }
 0x577   : > { %v4939_v20 = vadd.f32 %v4931_v45, %v4849_v7 }
 0x579   : > { %v5029_v31 = vadd.f32 %v5021_v29, %v4939_v20 }
 0x57b   : > { %v5037_v34 = vadd.f32 %v5519_v37, %v5029_v31 }
 0x57d   : > { %v5038_v46 = vmax.f32 %v5037_v34, 0.0 }
 0x57f   : > { %v5040_v54 = vrot.slane %v5038_v46, 1 }
 0x581   : > { %v5042_v28 = vmax.f32 %v5038_v46, %v5040_v54 }
 0x583   : > { %v5044_v25 = vrot.slane %v5042_v28, 5 }
 0x585   : > { %v5046_v55 = vmax.f32 %v5042_v28, %v5044_v25 }
 0x587   : > { %6132 = vmatmul.mubr.msk.f32.vlgmr.msra.gmra.mxu1 %vm5053_vm0, %v5046_v55 }
 0x647   : > { %v5123_v40 = vpop.f32.mrf.mxu1 }
 0x648   : > { %v5124_v16 = vadd.f32 %v5123_v40, %v5052_v49 }
 0x649   : > { %v6133_v8 = vpop.f32.mrf.mxu1 }
 0x64a   : > { %6143 = vmatmul.mubr.msk.f32.vlgmr.msra.gmra.mxu0 %vm5132_vm1, %v5124_v16 }
 0x70a   : > { %v5202_v53 = vpop.f32.mrf.mxu0 }
 0x70b   : > { %v5203_v58 = vadd.f32 %v5202_v53, %v5131_v35 }
 0x70c   : > { %v6144_v63 = vpop.f32.mrf.mxu0 }
 0x70d   : > { %5207 = vst.msk [vmem:[%s376_s25] sm:$0x1] %vm5206_vm2, %v5203_v58 }
 0x70e   : > { %6231 = shalt.err (!%p6228_p3)
}
 0x70f   : > { %s6232_s30 = scalar_lea.hbm %s7985_s14, 16  ;;  %s6236_s12 = scalar_lea.hbm %s8031_s11, 32 }
 0x710   : > { %p6233_p4 = scmp.ne.s32.totalorder %s7985_s14, %s6232_s30  ;;  %p6237_p9 = scmp.lt.s32.totalorder %s7985_s14, %s8031_s11 }
 0x711   : > { %p6238_p10 = scmp.lt.s32.totalorder %s6236_s12, %s6232_s30 }
 0x712   : > { %p6234_p7 = pnand %p6233_p4, %p6398_p5 }
 0x713   : > { %p6239_p11 = por %p6238_p10, %p6237_p9 }
 0x714   : > { %p6235_p8 = pneg %p6234_p7 }
 0x716   : > { %p6240_p12 = pnand %p6239_p11, %p6235_p8 }
 0x718   : > { %6243 = shalt.err (!%p6240_p12)
}
 0x719   : > { %6146 = dma.vmem_to_hbm [thread:$0]  (%p6398_p5), %s5222_s29, 16, %s7985_s14, %s5209_s15  }
 0x71a PF: > { %p6152_p13 = scmp.ge.s32.totalorder %s6278_s20, 2  ;;  %s5233_s0 = sand.u32 1, %s6266_s17  }
 0x71b   : > { %s5234_s22 = scalar_lea.sflag [#allocation7], %s5233_s0 }
 0x71c   : > { %p6149_p0 = pnand %p6152_p13, %p6402_p6 }
 0x71e   : > { %p6150_p1 = pneg %p6149_p0 }
 0x720   : > { %6261 = dma.done.wait (%p6150_p1), %s5234_s22, 16  }
 0x721   : > { %6263 = vsyncadd (%p6150_p1), %s5234_s22, 4294967280  ;;  %p21_p2 = scmp.ge.s32.totalorder %s6385_s23, 4   ;;  %s8036_s17 = smov %s6270_s18 }
 0x722   : > { %s8037_s18 = smov %s6274_s19  ;;  %s8038_s19 = smov %s6396_s26 }
 0x723   : > { %s8039_s20 = smov %s6385_s23  ;;  %23 = sbr.rel (!%p21_p2) target bundleno = 5 (0x5), region = 237 }
 0x728   :  { %5238 = vsyncpa [#allocation7], 1 }
 0x729   :  { %5240 = vsyncpa [#allocation7 + $0x1], 1 }

</bundles_post_ra>
